<compile_context>
chip_gen: v6e
topology: v6e:2x2x1
jax: 0.10.0
libtpu: 0.0.40
codegen_flags: <defaults>
</compile_context>

<pallas_src>
import numpy as np
import jax
import jax.numpy as jnp
from jax import lax
from jax.experimental import pallas as pl
from jax.experimental.pallas import tpu as pltpu

LEAKY_SLOPE = 0.01   # nn.LeakyReLU() default negative_slope
BN_EPS = 1e-5        # nn.BatchNorm2d default eps


def _round_up(x, m):
    return (x + m - 1) // m * m


def _conv_out(size, k, stride, pad):
    return (size + 2 * pad - k) // stride + 1


# ----------------------------------------------------------------------- kernel ---

def _make_fused_kernel(num_layers, layer_mpads):
    """Fused forward (one image): [conv(as matmul) + folded-BN + LeakyReLU] x L.

    layer_mpads[l] = (m_real, m_pad): real / padded per-image output-pixel count."""

    def kernel(*refs):
        out_ref = refs[-1]

        def bn_lrelu(acc, s_ref, b_ref, m_real, m_pad):
            y = acc * s_ref[...] + b_ref[...]
            y = jnp.where(y > 0, y, LEAKY_SLOPE * y)
            if m_pad > m_real:           # static branch: zero padded tail rows
                rows = lax.broadcasted_iota(jnp.int32, y.shape, 0)
                y = jnp.where(rows < m_real, y, 0.0)
            return y

        # ---- layer 1: patches pre-gathered from the raw input in the wrapper ----
        p_ref, w_ref, s_ref, b_ref = refs[0:4]
        o = bn_lrelu(
            jnp.dot(p_ref[...], w_ref[...], preferred_element_type=jnp.float32),
            s_ref, b_ref, *layer_mpads[0])                  # (M1, C1) f32

        # ---- layers 2..L: in-kernel im2col via per-image tap-selection matmul ----
        idx = 4
        for li in range(1, num_layers):
            g_ref, w_ref, s_ref, b_ref = refs[idx:idx + 4]
            idx += 4
            c_prev = o.shape[1]
            taps = w_ref.shape[0] // c_prev                 # KH * KW
            m_pad = g_ref.shape[0] // taps                  # padded per-image pixels
            # One MXU matmul gathers, for every (tap, output pixel), the c_prev
            # input channels under that kernel tap (G is 0/1 -> exact gather).
            h = jnp.dot(g_ref[...], o.astype(jnp.bfloat16),
                        preferred_element_type=jnp.float32)  # (taps*m_pad, c_prev)
            hb = h.astype(jnp.bfloat16)
            w_all = w_ref[...]                               # (taps*c_prev, c_out)
            acc = None
            for t in range(taps):                            # accumulate conv taps
                part = jnp.dot(hb[t * m_pad:(t + 1) * m_pad, :],
                               w_all[t * c_prev:(t + 1) * c_prev, :],
                               preferred_element_type=jnp.float32)
                acc = part if acc is None else acc + part
            o = bn_lrelu(acc, s_ref, b_ref, *layer_mpads[li])  # (m_pad, c_out) f32

        out_ref[...] = o

    return kernel


# ----------------------------------------------------------------- preparation ---

def _im2col_first_layer_nchw(x_nchw, kh, kw, stride, pad):
    """NCHW -> per-image patches (N, OH*OW, KH*KW*C), columns ordered (kh, kw, c).
    Slices the NCHW array directly (NHWC transpose folded into the tap stack)."""
    n, c, h, w = x_nchw.shape
    xp = jnp.pad(x_nchw, ((0, 0), (0, 0), (pad, pad), (pad, pad)))
    oh = _conv_out(h, kh, stride, pad)
    ow = _conv_out(w, kw, stride, pad)
    cols = []
    for i in range(kh):
        for j in range(kw):
            cols.append(xp[:, :, i:i + stride * oh:stride, j:j + stride * ow:stride])
    p = jnp.stack(cols, axis=-1)                  # (N, C, OH, OW, taps)
    p = jnp.transpose(p, (0, 2, 3, 4, 1))         # (N, OH, OW, taps, C)
    return p.reshape(n, oh * ow, kh * kw * c)


def _build_tap_gather(ih, iw, oh, ow, kh, kw, stride, pad, m_pad, in_rows):
    """Per-image 0/1 gather matrix (kh*kw*m_pad, in_rows).  Row t*m_pad + p selects,
    for output pixel p (ordered (oy, ox)) and kernel tap t=(i, j), the row of the
    previous per-image activation (ordered (y, x)) it reads; taps landing in conv
    padding (and the m_pad tail rows) stay all-zero.  Batch independent."""
    g = np.zeros((kh * kw * m_pad, in_rows), np.float32)
    for t in range(kh * kw):
        i, j = divmod(t, kw)
        for oy in range(oh):
            sy = stride * oy + i - pad
            if sy < 0 or sy >= ih:
                continue
            for ox in range(ow):
                sx = stride * ox + j - pad
                if sx < 0 or sx >= iw:
                    continue
                g[t * m_pad + oy * ow + ox, sy * iw + sx] = 1.0
    return g


def prepare_backbone(params, x_shape):
    """One-time prep: fold BN into per-channel scale/bias, re-layout conv weights to
    (KH*KW*C_in, C_out) bf16 matmul operands, build per-image tap-gather matrices,
    and compute a cost estimate for the fused call."""
    n, c_in0, h, w = x_shape
    ih, iw = h, w
    m_pad_prev = None
    arrays = []
    layer_mpads = []
    flops_img = 0
    for li, p in enumerate(params):
        c_out, c_in, kh, kw = p["w"].shape
        stride, pad = p["stride"], p["pad"]
        oh = _conv_out(ih, kh, stride, pad)
        ow = _conv_out(iw, kw, stride, pad)
        m = oh * ow                                  # per-image output pixels
        # pad M to bf16 sublane packing so in-kernel per-tap slices stay aligned
        m_pad = m if li == 0 else _round_up(m, 16)
        layer_mpads.append((m, m_pad))

        w_mat = jnp.transpose(p["w"], (2, 3, 1, 0)).reshape(kh * kw * c_in, c_out)
        scale = p["gamma"] / jnp.sqrt(p["rvar"] + BN_EPS)
        bias = p["beta"] - p["rmean"] * scale

        if li == 0:
            if li == 0 and (oh, ow) is not None:
                l1_meta = dict(k=(kh, kw), stride=stride, pad=pad,
                               c_in=c_in, out_hw=(oh, ow))
            flops_img += 2 * m_pad * (kh * kw * c_in) * c_out
        else:
            g = _build_tap_gather(ih, iw, oh, ow, kh, kw, stride, pad,
                                  m_pad, m_pad_prev)
            arrays.append(jnp.asarray(g, jnp.bfloat16))
            flops_img += 2 * (kh * kw * m_pad) * m_pad_prev * c_in   # gather matmul
            flops_img += 2 * (kh * kw) * m_pad * c_in * c_out        # conv taps
        arrays += [w_mat.astype(jnp.bfloat16),
                   scale.reshape(1, c_out).astype(jnp.float32),
                   bias.reshape(1, c_out).astype(jnp.float32)]

        ih, iw, m_pad_prev = oh, ow, m_pad

    m1 = l1_meta["out_hw"][0] * l1_meta["out_hw"][1]
    k1 = l1_meta["k"][0] * l1_meta["k"][1] * l1_meta["c_in"]
    c_last = params[-1]["w"].shape[0]
    bytes_in = sum(int(np.prod(a.shape)) * a.dtype.itemsize for a in arrays)
    bytes_in += n * m1 * k1 * 2                       # layer-1 patches (bf16)
    bytes_out = n * m_pad_prev * c_last * 4           # f32 output

    meta = dict(
        batch=n,
        l1_k=l1_meta["k"], l1_stride=l1_meta["stride"], l1_pad=l1_meta["pad"],
        l1_c_in=l1_meta["c_in"], l1_out_hw=l1_meta["out_hw"],
        out_hw=(ih, iw), out_c=c_last,
        m_img=layer_mpads[-1][0], m_img_pad=layer_mpads[-1][1],
        layer_mpads=layer_mpads, num_layers=len(params),
        flops=n * flops_img, bytes_accessed=bytes_in + bytes_out)
    return tuple(arrays), meta


def make_backbone_forward(meta):
    kernel = _make_fused_kernel(meta["num_layers"], meta["layer_mpads"])
    n = meta["batch"]
    kh, kw = meta["l1_k"]
    stride, pad = meta["l1_stride"], meta["l1_pad"]
    oh1, ow1 = meta["l1_out_hw"]
    m1 = oh1 * ow1
    k1 = kh * kw * meta["l1_c_in"]
    oh, ow = meta["out_hw"]
    c_out = meta["out_c"]
    m_img, m_img_pad = meta["m_img"], meta["m_img_pad"]

    cost = pl.CostEstimate(flops=meta["flops"], transcendentals=0,
                           bytes_accessed=meta["bytes_accessed"])

    def forward(x_nchw, arrays):
        p1 = _im2col_first_layer_nchw(x_nchw, kh, kw, stride, pad).astype(jnp.bfloat16)
        inputs = (p1,) + tuple(arrays)
        in_specs = [pl.BlockSpec((None, m1, k1), lambda b: (b, 0, 0))]
        # Constant operands: same block index every grid step -> not re-DMA'd.
        in_specs += [pl.BlockSpec(a.shape, lambda b: (0, 0)) for a in arrays]
        out = pl.pallas_call(
            kernel,
            out_shape=jax.ShapeDtypeStruct((n, m_img_pad, c_out), jnp.float32),
            grid=(n,),
            in_specs=in_specs,
            out_specs=pl.BlockSpec((None, m_img_pad, c_out), lambda b: (b, 0, 0)),
            compiler_params=pltpu.CompilerParams(
                dimension_semantics=("parallel",)),   # batch axis -> v7x megacore
            cost_estimate=cost,
        )(*inputs)
        # Final spatial is 1x1 for MNIST sizing, so this epilogue is just a
        # slice + trivial reshape; consumers wanting (N*OH*OW, C) can take `out`.
        y = out[:, :m_img, :].reshape(n, oh, ow, c_out)
        return jnp.transpose(y, (0, 3, 1, 2))         # NCHW, matching the module

    return jax.jit(forward)


# ------------------------------------------------------------------- test setup ---

def init_backbone_params(key, in_channel, hidden_dims):
    """Deterministic synthetic parameters matching BackboneMNIST.__init__ shapes."""
    cfgs = []
    c_in = in_channel
    for li, hdim in enumerate(hidden_dims):
        if li == 0:
            stride, pad = 2, 3
        elif li == len(hidden_dims) - 1:
            stride, pad = 1, 0
        else:
            stride, pad = 2, 1
        cfgs.append((c_in, hdim, stride, pad))
        c_in = hdim

    params = []
    for (ci, co, stride, pad) in cfgs:
        key, k1, k2, k3, k4, k5 = jax.random.split(key, 6)
        fan_in = ci * 4 * 4
        params.append(dict(
            w=jax.random.normal(k1, (co, ci, 4, 4), jnp.float32) / jnp.sqrt(fan_in),
            gamma=1.0 + 0.1 * jax.random.normal(k2, (co,), jnp.float32),
            beta=0.1 * jax.random.normal(k3, (co,), jnp.float32),
            rmean=0.1 * jax.random.normal(k4, (co,), jnp.float32),
            rvar=jax.random.uniform(k5, (co,), jnp.float32, minval=0.5, maxval=1.5),
            stride=stride, pad=pad))
    return params


def _reference_forward(x_nchw, params, cast_dtype=None):
    """Pure-JAX reference (lax.conv).  With cast_dtype=bf16 it reproduces the
    kernel's arithmetic (bf16 conv operands, f32 accumulation)."""
    x = x_nchw
    for p in params:
        xin = x if cast_dtype is None else x.astype(cast_dtype)
        win = p["w"] if cast_dtype is None else p["w"].astype(cast_dtype)
        y = lax.conv_general_dilated(
            xin, win, window_strides=(p["stride"], p["stride"]),
            padding=[(p["pad"], p["pad"])] * 2,
            dimension_numbers=("NCHW", "OIHW", "NCHW"),
            preferred_element_type=jnp.float32)
        scale = p["gamma"] / jnp.sqrt(p["rvar"] + BN_EPS)
        bias = p["beta"] - p["rmean"] * scale
        y = y * scale[None, :, None, None] + bias[None, :, None, None]
        x = jnp.where(y > 0, y, LEAKY_SLOPE * y)
    return x


if __name__ == "__main__":
    # Module pattern [h*2, h*2*2, h*4*2, h*8*2]; base h=8 keeps the demo small.
    hidden_dims = [8 * 2, 8 * 2 * 2, 8 * 4 * 2, 8 * 8 * 2]     # [16, 32, 64, 128]
    in_channel = 1

    key = jax.random.PRNGKey(0)
    kx, kp = jax.random.split(key)
    x = jax.random.normal(kx, (2, in_channel, 28, 28), jnp.float32)   # NCHW MNIST-like
    params = init_backbone_params(kp, in_channel, hidden_dims)

    arrays, meta = prepare_backbone(params, x.shape)
    forward = make_backbone_forward(meta)
    out = jax.block_until_ready(forward(x, arrays))

    assert out.shape == (2, hidden_dims[-1], 1, 1), out.shape

    # Tight check against a reference using the same arithmetic (bf16 conv operands,
    # f32 accumulation): validates the per-image tap-gather im2col, BN folding,
    # LeakyReLU, batch grid split and all layout plumbing.
    ref_bf16 = _reference_forward(x, params, cast_dtype=jnp.bfloat16)
    assert jnp.allclose(out, ref_bf16, rtol=1e-2, atol=1e-2)

    # Looser sanity check against the full-f32 reference (bf16 MXU inputs).
    ref_f32 = _reference_forward(x, params)
    assert jnp.allclose(out, ref_f32, rtol=5e-2, atol=5e-2)

    print("KERNEL_OK")
</pallas_src>

<mosaic_0001>
module attributes {stable_mosaic.version = 11 : i64} {
  func.func @kernel(%arg0: i32, %arg1: memref<1x256x16xbf16, #tpu.memory_space<vmem>>, %arg2: memref<16x16xbf16, #tpu.memory_space<vmem>>, %arg3: memref<1x16xf32, #tpu.memory_space<vmem>>, %arg4: memref<1x16xf32, #tpu.memory_space<vmem>>, %arg5: memref<1024x256xbf16, #tpu.memory_space<vmem>>, %arg6: memref<256x32xbf16, #tpu.memory_space<vmem>>, %arg7: memref<1x32xf32, #tpu.memory_space<vmem>>, %arg8: memref<1x32xf32, #tpu.memory_space<vmem>>, %arg9: memref<256x64xbf16, #tpu.memory_space<vmem>>, %arg10: memref<512x64xbf16, #tpu.memory_space<vmem>>, %arg11: memref<1x64xf32, #tpu.memory_space<vmem>>, %arg12: memref<1x64xf32, #tpu.memory_space<vmem>>, %arg13: memref<256x16xbf16, #tpu.memory_space<vmem>>, %arg14: memref<1024x128xbf16, #tpu.memory_space<vmem>>, %arg15: memref<1x128xf32, #tpu.memory_space<vmem>>, %arg16: memref<1x128xf32, #tpu.memory_space<vmem>>, %arg17: memref<1x16x128xf32, #tpu.memory_space<vmem>>) attributes {dimension_semantics = [#tpu.dimension_semantics<parallel>], iteration_bounds = array<i64: 2>, scalar_prefetch = 0 : i64, scratch_operands = 0 : i64, tpu.core_type = #tpu.core_type<tc>, window_params = [{transform_indices = @transform_0, window_bounds = array<i64: 1, 256, 16>}, {pipeline_mode = #tpu.pipeline_mode<synchronous>, transform_indices = @transform_1, window_bounds = array<i64: 16, 16>}, {pipeline_mode = #tpu.pipeline_mode<synchronous>, transform_indices = @transform_2, window_bounds = array<i64: 1, 16>}, {pipeline_mode = #tpu.pipeline_mode<synchronous>, transform_indices = @transform_3, window_bounds = array<i64: 1, 16>}, {pipeline_mode = #tpu.pipeline_mode<synchronous>, transform_indices = @transform_4, window_bounds = array<i64: 1024, 256>}, {pipeline_mode = #tpu.pipeline_mode<synchronous>, transform_indices = @transform_5, window_bounds = array<i64: 256, 32>}, {pipeline_mode = #tpu.pipeline_mode<synchronous>, transform_indices = @transform_6, window_bounds = array<i64: 1, 32>}, {pipeline_mode = #tpu.pipeline_mode<synchronous>, transform_indices = @transform_7, window_bounds = array<i64: 1, 32>}, {pipeline_mode = #tpu.pipeline_mode<synchronous>, transform_indices = @transform_8, window_bounds = array<i64: 256, 64>}, {pipeline_mode = #tpu.pipeline_mode<synchronous>, transform_indices = @transform_9, window_bounds = array<i64: 512, 64>}, {pipeline_mode = #tpu.pipeline_mode<synchronous>, transform_indices = @transform_10, window_bounds = array<i64: 1, 64>}, {pipeline_mode = #tpu.pipeline_mode<synchronous>, transform_indices = @transform_11, window_bounds = array<i64: 1, 64>}, {pipeline_mode = #tpu.pipeline_mode<synchronous>, transform_indices = @transform_12, window_bounds = array<i64: 256, 16>}, {pipeline_mode = #tpu.pipeline_mode<synchronous>, transform_indices = @transform_13, window_bounds = array<i64: 1024, 128>}, {pipeline_mode = #tpu.pipeline_mode<synchronous>, transform_indices = @transform_14, window_bounds = array<i64: 1, 128>}, {pipeline_mode = #tpu.pipeline_mode<synchronous>, transform_indices = @transform_15, window_bounds = array<i64: 1, 128>}, {transform_indices = @transform_16, window_bounds = array<i64: 1, 16, 128>}]} {
    %c0 = arith.constant 0 : index
    %c0_0 = arith.constant 0 : index
    %c0_1 = arith.constant 0 : index
    %0 = vector.load %arg1[%c0, %c0_0, %c0_1] : memref<1x256x16xbf16, #tpu.memory_space<vmem>>, vector<1x256x16xbf16>
    %1 = vector.shape_cast %0 : vector<1x256x16xbf16> to vector<256x16xbf16>
    %c0_2 = arith.constant 0 : index
    %c0_3 = arith.constant 0 : index
    %2 = vector.load %arg2[%c0_2, %c0_3] : memref<16x16xbf16, #tpu.memory_space<vmem>>, vector<16x16xbf16>
    %cst = arith.constant dense<0.000000e+00> : vector<256x16xf32>
    %3 = tpu.matmul %1, %2, %cst {dimension_numbers = #tpu.dot_dimension_numbers<[1], [0], [0], [1], [0, 0, 1, 1], [], []>} : vector<256x16xbf16>, vector<16x16xbf16>, vector<256x16xf32> -> vector<256x16xf32>
    %c0_4 = arith.constant 0 : index
    %c0_5 = arith.constant 0 : index
    %4 = vector.load %arg3[%c0_4, %c0_5] : memref<1x16xf32, #tpu.memory_space<vmem>>, vector<1x16xf32>
    %5 = vector.broadcast %4 : vector<1x16xf32> to vector<256x16xf32>
    %6 = arith.mulf %3, %5 : vector<256x16xf32>
    %c0_6 = arith.constant 0 : index
    %c0_7 = arith.constant 0 : index
    %7 = vector.load %arg4[%c0_6, %c0_7] : memref<1x16xf32, #tpu.memory_space<vmem>>, vector<1x16xf32>
    %8 = vector.broadcast %7 : vector<1x16xf32> to vector<256x16xf32>
    %9 = arith.addf %6, %8 : vector<256x16xf32>
    %cst_8 = arith.constant 0.000000e+00 : f32
    %10 = vector.broadcast %cst_8 : f32 to vector<256x16xf32>
    %11 = arith.cmpf ogt, %9, %10 : vector<256x16xf32>
    %cst_9 = arith.constant 0.00999999977 : f32
    %12 = vector.broadcast %cst_9 : f32 to vector<256x16xf32>
    %13 = arith.mulf %12, %9 : vector<256x16xf32>
    %14 = arith.select %11, %9, %13 : vector<256x16xi1>, vector<256x16xf32>
    %c0_10 = arith.constant 0 : index
    %c0_11 = arith.constant 0 : index
    %15 = vector.load %arg5[%c0_10, %c0_11] : memref<1024x256xbf16, #tpu.memory_space<vmem>>, vector<1024x256xbf16>
    %16 = arith.truncf %14 : vector<256x16xf32> to vector<256x16xbf16>
    %cst_12 = arith.constant dense<0.000000e+00> : vector<1024x16xf32>
    %17 = tpu.matmul %15, %16, %cst_12 {dimension_numbers = #tpu.dot_dimension_numbers<[1], [0], [0], [1], [0, 0, 1, 1], [], []>} : vector<1024x256xbf16>, vector<256x16xbf16>, vector<1024x16xf32> -> vector<1024x16xf32>
    %18 = arith.truncf %17 : vector<1024x16xf32> to vector<1024x16xbf16>
    %c0_13 = arith.constant 0 : index
    %c0_14 = arith.constant 0 : index
    %19 = vector.load %arg6[%c0_13, %c0_14] : memref<256x32xbf16, #tpu.memory_space<vmem>>, vector<256x32xbf16>
    %20 = vector.extract_strided_slice %18 {offsets = [0, 0], sizes = [64, 16], strides = [1, 1]} : vector<1024x16xbf16> to vector<64x16xbf16>
    %21 = vector.extract_strided_slice %19 {offsets = [0, 0], sizes = [16, 32], strides = [1, 1]} : vector<256x32xbf16> to vector<16x32xbf16>
    %cst_15 = arith.constant dense<0.000000e+00> : vector<64x32xf32>
    %22 = tpu.matmul %20, %21, %cst_15 {dimension_numbers = #tpu.dot_dimension_numbers<[1], [0], [0], [1], [0, 0, 1, 1], [], []>} : vector<64x16xbf16>, vector<16x32xbf16>, vector<64x32xf32> -> vector<64x32xf32>
    %23 = vector.extract_strided_slice %18 {offsets = [64, 0], sizes = [64, 16], strides = [1, 1]} : vector<1024x16xbf16> to vector<64x16xbf16>
    %24 = vector.extract_strided_slice %19 {offsets = [16, 0], sizes = [16, 32], strides = [1, 1]} : vector<256x32xbf16> to vector<16x32xbf16>
    %cst_16 = arith.constant dense<0.000000e+00> : vector<64x32xf32>
    %25 = tpu.matmul %23, %24, %cst_16 {dimension_numbers = #tpu.dot_dimension_numbers<[1], [0], [0], [1], [0, 0, 1, 1], [], []>} : vector<64x16xbf16>, vector<16x32xbf16>, vector<64x32xf32> -> vector<64x32xf32>
    %26 = arith.addf %22, %25 : vector<64x32xf32>
    %27 = vector.extract_strided_slice %18 {offsets = [128, 0], sizes = [64, 16], strides = [1, 1]} : vector<1024x16xbf16> to vector<64x16xbf16>
    %28 = vector.extract_strided_slice %19 {offsets = [32, 0], sizes = [16, 32], strides = [1, 1]} : vector<256x32xbf16> to vector<16x32xbf16>
    %cst_17 = arith.constant dense<0.000000e+00> : vector<64x32xf32>
    %29 = tpu.matmul %27, %28, %cst_17 {dimension_numbers = #tpu.dot_dimension_numbers<[1], [0], [0], [1], [0, 0, 1, 1], [], []>} : vector<64x16xbf16>, vector<16x32xbf16>, vector<64x32xf32> -> vector<64x32xf32>
    %30 = arith.addf %26, %29 : vector<64x32xf32>
    %31 = vector.extract_strided_slice %18 {offsets = [192, 0], sizes = [64, 16], strides = [1, 1]} : vector<1024x16xbf16> to vector<64x16xbf16>
    %32 = vector.extract_strided_slice %19 {offsets = [48, 0], sizes = [16, 32], strides = [1, 1]} : vector<256x32xbf16> to vector<16x32xbf16>
    %cst_18 = arith.constant dense<0.000000e+00> : vector<64x32xf32>
    %33 = tpu.matmul %31, %32, %cst_18 {dimension_numbers = #tpu.dot_dimension_numbers<[1], [0], [0], [1], [0, 0, 1, 1], [], []>} : vector<64x16xbf16>, vector<16x32xbf16>, vector<64x32xf32> -> vector<64x32xf32>
    %34 = arith.addf %30, %33 : vector<64x32xf32>
    %35 = vector.extract_strided_slice %18 {offsets = [256, 0], sizes = [64, 16], strides = [1, 1]} : vector<1024x16xbf16> to vector<64x16xbf16>
    %36 = vector.extract_strided_slice %19 {offsets = [64, 0], sizes = [16, 32], strides = [1, 1]} : vector<256x32xbf16> to vector<16x32xbf16>
    %cst_19 = arith.constant dense<0.000000e+00> : vector<64x32xf32>
    %37 = tpu.matmul %35, %36, %cst_19 {dimension_numbers = #tpu.dot_dimension_numbers<[1], [0], [0], [1], [0, 0, 1, 1], [], []>} : vector<64x16xbf16>, vector<16x32xbf16>, vector<64x32xf32> -> vector<64x32xf32>
    %38 = arith.addf %34, %37 : vector<64x32xf32>
    %39 = vector.extract_strided_slice %18 {offsets = [320, 0], sizes = [64, 16], strides = [1, 1]} : vector<1024x16xbf16> to vector<64x16xbf16>
    %40 = vector.extract_strided_slice %19 {offsets = [80, 0], sizes = [16, 32], strides = [1, 1]} : vector<256x32xbf16> to vector<16x32xbf16>
    %cst_20 = arith.constant dense<0.000000e+00> : vector<64x32xf32>
    %41 = tpu.matmul %39, %40, %cst_20 {dimension_numbers = #tpu.dot_dimension_numbers<[1], [0], [0], [1], [0, 0, 1, 1], [], []>} : vector<64x16xbf16>, vector<16x32xbf16>, vector<64x32xf32> -> vector<64x32xf32>
    %42 = arith.addf %38, %41 : vector<64x32xf32>
    %43 = vector.extract_strided_slice %18 {offsets = [384, 0], sizes = [64, 16], strides = [1, 1]} : vector<1024x16xbf16> to vector<64x16xbf16>
    %44 = vector.extract_strided_slice %19 {offsets = [96, 0], sizes = [16, 32], strides = [1, 1]} : vector<256x32xbf16> to vector<16x32xbf16>
    %cst_21 = arith.constant dense<0.000000e+00> : vector<64x32xf32>
    %45 = tpu.matmul %43, %44, %cst_21 {dimension_numbers = #tpu.dot_dimension_numbers<[1], [0], [0], [1], [0, 0, 1, 1], [], []>} : vector<64x16xbf16>, vector<16x32xbf16>, vector<64x32xf32> -> vector<64x32xf32>
    %46 = arith.addf %42, %45 : vector<64x32xf32>
    %47 = vector.extract_strided_slice %18 {offsets = [448, 0], sizes = [64, 16], strides = [1, 1]} : vector<1024x16xbf16> to vector<64x16xbf16>
    %48 = vector.extract_strided_slice %19 {offsets = [112, 0], sizes = [16, 32], strides = [1, 1]} : vector<256x32xbf16> to vector<16x32xbf16>
    %cst_22 = arith.constant dense<0.000000e+00> : vector<64x32xf32>
    %49 = tpu.matmul %47, %48, %cst_22 {dimension_numbers = #tpu.dot_dimension_numbers<[1], [0], [0], [1], [0, 0, 1, 1], [], []>} : vector<64x16xbf16>, vector<16x32xbf16>, vector<64x32xf32> -> vector<64x32xf32>
    %50 = arith.addf %46, %49 : vector<64x32xf32>
    %51 = vector.extract_strided_slice %18 {offsets = [512, 0], sizes = [64, 16], strides = [1, 1]} : vector<1024x16xbf16> to vector<64x16xbf16>
    %52 = vector.extract_strided_slice %19 {offsets = [128, 0], sizes = [16, 32], strides = [1, 1]} : vector<256x32xbf16> to vector<16x32xbf16>
    %cst_23 = arith.constant dense<0.000000e+00> : vector<64x32xf32>
    %53 = tpu.matmul %51, %52, %cst_23 {dimension_numbers = #tpu.dot_dimension_numbers<[1], [0], [0], [1], [0, 0, 1, 1], [], []>} : vector<64x16xbf16>, vector<16x32xbf16>, vector<64x32xf32> -> vector<64x32xf32>
    %54 = arith.addf %50, %53 : vector<64x32xf32>
    %55 = vector.extract_strided_slice %18 {offsets = [576, 0], sizes = [64, 16], strides = [1, 1]} : vector<1024x16xbf16> to vector<64x16xbf16>
    %56 = vector.extract_strided_slice %19 {offsets = [144, 0], sizes = [16, 32], strides = [1, 1]} : vector<256x32xbf16> to vector<16x32xbf16>
    %cst_24 = arith.constant dense<0.000000e+00> : vector<64x32xf32>
    %57 = tpu.matmul %55, %56, %cst_24 {dimension_numbers = #tpu.dot_dimension_numbers<[1], [0], [0], [1], [0, 0, 1, 1], [], []>} : vector<64x16xbf16>, vector<16x32xbf16>, vector<64x32xf32> -> vector<64x32xf32>
    %58 = arith.addf %54, %57 : vector<64x32xf32>
    %59 = vector.extract_strided_slice %18 {offsets = [640, 0], sizes = [64, 16], strides = [1, 1]} : vector<1024x16xbf16> to vector<64x16xbf16>
    %60 = vector.extract_strided_slice %19 {offsets = [160, 0], sizes = [16, 32], strides = [1, 1]} : vector<256x32xbf16> to vector<16x32xbf16>
    %cst_25 = arith.constant dense<0.000000e+00> : vector<64x32xf32>
    %61 = tpu.matmul %59, %60, %cst_25 {dimension_numbers = #tpu.dot_dimension_numbers<[1], [0], [0], [1], [0, 0, 1, 1], [], []>} : vector<64x16xbf16>, vector<16x32xbf16>, vector<64x32xf32> -> vector<64x32xf32>
    %62 = arith.addf %58, %61 : vector<64x32xf32>
    %63 = vector.extract_strided_slice %18 {offsets = [704, 0], sizes = [64, 16], strides = [1, 1]} : vector<1024x16xbf16> to vector<64x16xbf16>
    %64 = vector.extract_strided_slice %19 {offsets = [176, 0], sizes = [16, 32], strides = [1, 1]} : vector<256x32xbf16> to vector<16x32xbf16>
    %cst_26 = arith.constant dense<0.000000e+00> : vector<64x32xf32>
    %65 = tpu.matmul %63, %64, %cst_26 {dimension_numbers = #tpu.dot_dimension_numbers<[1], [0], [0], [1], [0, 0, 1, 1], [], []>} : vector<64x16xbf16>, vector<16x32xbf16>, vector<64x32xf32> -> vector<64x32xf32>
    %66 = arith.addf %62, %65 : vector<64x32xf32>
    %67 = vector.extract_strided_slice %18 {offsets = [768, 0], sizes = [64, 16], strides = [1, 1]} : vector<1024x16xbf16> to vector<64x16xbf16>
    %68 = vector.extract_strided_slice %19 {offsets = [192, 0], sizes = [16, 32], strides = [1, 1]} : vector<256x32xbf16> to vector<16x32xbf16>
    %cst_27 = arith.constant dense<0.000000e+00> : vector<64x32xf32>
    %69 = tpu.matmul %67, %68, %cst_27 {dimension_numbers = #tpu.dot_dimension_numbers<[1], [0], [0], [1], [0, 0, 1, 1], [], []>} : vector<64x16xbf16>, vector<16x32xbf16>, vector<64x32xf32> -> vector<64x32xf32>
    %70 = arith.addf %66, %69 : vector<64x32xf32>
    %71 = vector.extract_strided_slice %18 {offsets = [832, 0], sizes = [64, 16], strides = [1, 1]} : vector<1024x16xbf16> to vector<64x16xbf16>
    %72 = vector.extract_strided_slice %19 {offsets = [208, 0], sizes = [16, 32], strides = [1, 1]} : vector<256x32xbf16> to vector<16x32xbf16>
    %cst_28 = arith.constant dense<0.000000e+00> : vector<64x32xf32>
    %73 = tpu.matmul %71, %72, %cst_28 {dimension_numbers = #tpu.dot_dimension_numbers<[1], [0], [0], [1], [0, 0, 1, 1], [], []>} : vector<64x16xbf16>, vector<16x32xbf16>, vector<64x32xf32> -> vector<64x32xf32>
    %74 = arith.addf %70, %73 : vector<64x32xf32>
    %75 = vector.extract_strided_slice %18 {offsets = [896, 0], sizes = [64, 16], strides = [1, 1]} : vector<1024x16xbf16> to vector<64x16xbf16>
    %76 = vector.extract_strided_slice %19 {offsets = [224, 0], sizes = [16, 32], strides = [1, 1]} : vector<256x32xbf16> to vector<16x32xbf16>
    %cst_29 = arith.constant dense<0.000000e+00> : vector<64x32xf32>
    %77 = tpu.matmul %75, %76, %cst_29 {dimension_numbers = #tpu.dot_dimension_numbers<[1], [0], [0], [1], [0, 0, 1, 1], [], []>} : vector<64x16xbf16>, vector<16x32xbf16>, vector<64x32xf32> -> vector<64x32xf32>
    %78 = arith.addf %74, %77 : vector<64x32xf32>
    %79 = vector.extract_strided_slice %18 {offsets = [960, 0], sizes = [64, 16], strides = [1, 1]} : vector<1024x16xbf16> to vector<64x16xbf16>
    %80 = vector.extract_strided_slice %19 {offsets = [240, 0], sizes = [16, 32], strides = [1, 1]} : vector<256x32xbf16> to vector<16x32xbf16>
    %cst_30 = arith.constant dense<0.000000e+00> : vector<64x32xf32>
    %81 = tpu.matmul %79, %80, %cst_30 {dimension_numbers = #tpu.dot_dimension_numbers<[1], [0], [0], [1], [0, 0, 1, 1], [], []>} : vector<64x16xbf16>, vector<16x32xbf16>, vector<64x32xf32> -> vector<64x32xf32>
    %82 = arith.addf %78, %81 : vector<64x32xf32>
    %c0_31 = arith.constant 0 : index
    %c0_32 = arith.constant 0 : index
    %83 = vector.load %arg7[%c0_31, %c0_32] : memref<1x32xf32, #tpu.memory_space<vmem>>, vector<1x32xf32>
    %84 = vector.broadcast %83 : vector<1x32xf32> to vector<64x32xf32>
    %85 = arith.mulf %82, %84 : vector<64x32xf32>
    %c0_33 = arith.constant 0 : index
    %c0_34 = arith.constant 0 : index
    %86 = vector.load %arg8[%c0_33, %c0_34] : memref<1x32xf32, #tpu.memory_space<vmem>>, vector<1x32xf32>
    %87 = vector.broadcast %86 : vector<1x32xf32> to vector<64x32xf32>
    %88 = arith.addf %85, %87 : vector<64x32xf32>
    %cst_35 = arith.constant 0.000000e+00 : f32
    %89 = vector.broadcast %cst_35 : f32 to vector<64x32xf32>
    %90 = arith.cmpf ogt, %88, %89 : vector<64x32xf32>
    %cst_36 = arith.constant 0.00999999977 : f32
    %91 = vector.broadcast %cst_36 : f32 to vector<64x32xf32>
    %92 = arith.mulf %91, %88 : vector<64x32xf32>
    %93 = arith.select %90, %88, %92 : vector<64x32xi1>, vector<64x32xf32>
    %c0_37 = arith.constant 0 : index
    %c0_38 = arith.constant 0 : index
    %94 = vector.load %arg9[%c0_37, %c0_38] : memref<256x64xbf16, #tpu.memory_space<vmem>>, vector<256x64xbf16>
    %95 = arith.truncf %93 : vector<64x32xf32> to vector<64x32xbf16>
    %cst_39 = arith.constant dense<0.000000e+00> : vector<256x32xf32>
    %96 = tpu.matmul %94, %95, %cst_39 {dimension_numbers = #tpu.dot_dimension_numbers<[1], [0], [0], [1], [0, 0, 1, 1], [], []>} : vector<256x64xbf16>, vector<64x32xbf16>, vector<256x32xf32> -> vector<256x32xf32>
    %97 = arith.truncf %96 : vector<256x32xf32> to vector<256x32xbf16>
    %c0_40 = arith.constant 0 : index
    %c0_41 = arith.constant 0 : index
    %98 = vector.load %arg10[%c0_40, %c0_41] : memref<512x64xbf16, #tpu.memory_space<vmem>>, vector<512x64xbf16>
    %99 = vector.extract_strided_slice %97 {offsets = [0, 0], sizes = [16, 32], strides = [1, 1]} : vector<256x32xbf16> to vector<16x32xbf16>
    %100 = vector.extract_strided_slice %98 {offsets = [0, 0], sizes = [32, 64], strides = [1, 1]} : vector<512x64xbf16> to vector<32x64xbf16>
    %cst_42 = arith.constant dense<0.000000e+00> : vector<16x64xf32>
    %101 = tpu.matmul %99, %100, %cst_42 {dimension_numbers = #tpu.dot_dimension_numbers<[1], [0], [0], [1], [0, 0, 1, 1], [], []>} : vector<16x32xbf16>, vector<32x64xbf16>, vector<16x64xf32> -> vector<16x64xf32>
    %102 = vector.extract_strided_slice %97 {offsets = [16, 0], sizes = [16, 32], strides = [1, 1]} : vector<256x32xbf16> to vector<16x32xbf16>
    %103 = vector.extract_strided_slice %98 {offsets = [32, 0], sizes = [32, 64], strides = [1, 1]} : vector<512x64xbf16> to vector<32x64xbf16>
    %cst_43 = arith.constant dense<0.000000e+00> : vector<16x64xf32>
    %104 = tpu.matmul %102, %103, %cst_43 {dimension_numbers = #tpu.dot_dimension_numbers<[1], [0], [0], [1], [0, 0, 1, 1], [], []>} : vector<16x32xbf16>, vector<32x64xbf16>, vector<16x64xf32> -> vector<16x64xf32>
    %105 = arith.addf %101, %104 : vector<16x64xf32>
    %106 = vector.extract_strided_slice %97 {offsets = [32, 0], sizes = [16, 32], strides = [1, 1]} : vector<256x32xbf16> to vector<16x32xbf16>
    %107 = vector.extract_strided_slice %98 {offsets = [64, 0], sizes = [32, 64], strides = [1, 1]} : vector<512x64xbf16> to vector<32x64xbf16>
    %cst_44 = arith.constant dense<0.000000e+00> : vector<16x64xf32>
    %108 = tpu.matmul %106, %107, %cst_44 {dimension_numbers = #tpu.dot_dimension_numbers<[1], [0], [0], [1], [0, 0, 1, 1], [], []>} : vector<16x32xbf16>, vector<32x64xbf16>, vector<16x64xf32> -> vector<16x64xf32>
    %109 = arith.addf %105, %108 : vector<16x64xf32>
    %110 = vector.extract_strided_slice %97 {offsets = [48, 0], sizes = [16, 32], strides = [1, 1]} : vector<256x32xbf16> to vector<16x32xbf16>
    %111 = vector.extract_strided_slice %98 {offsets = [96, 0], sizes = [32, 64], strides = [1, 1]} : vector<512x64xbf16> to vector<32x64xbf16>
    %cst_45 = arith.constant dense<0.000000e+00> : vector<16x64xf32>
    %112 = tpu.matmul %110, %111, %cst_45 {dimension_numbers = #tpu.dot_dimension_numbers<[1], [0], [0], [1], [0, 0, 1, 1], [], []>} : vector<16x32xbf16>, vector<32x64xbf16>, vector<16x64xf32> -> vector<16x64xf32>
    %113 = arith.addf %109, %112 : vector<16x64xf32>
    %114 = vector.extract_strided_slice %97 {offsets = [64, 0], sizes = [16, 32], strides = [1, 1]} : vector<256x32xbf16> to vector<16x32xbf16>
    %115 = vector.extract_strided_slice %98 {offsets = [128, 0], sizes = [32, 64], strides = [1, 1]} : vector<512x64xbf16> to vector<32x64xbf16>
    %cst_46 = arith.constant dense<0.000000e+00> : vector<16x64xf32>
    %116 = tpu.matmul %114, %115, %cst_46 {dimension_numbers = #tpu.dot_dimension_numbers<[1], [0], [0], [1], [0, 0, 1, 1], [], []>} : vector<16x32xbf16>, vector<32x64xbf16>, vector<16x64xf32> -> vector<16x64xf32>
    %117 = arith.addf %113, %116 : vector<16x64xf32>
    %118 = vector.extract_strided_slice %97 {offsets = [80, 0], sizes = [16, 32], strides = [1, 1]} : vector<256x32xbf16> to vector<16x32xbf16>
    %119 = vector.extract_strided_slice %98 {offsets = [160, 0], sizes = [32, 64], strides = [1, 1]} : vector<512x64xbf16> to vector<32x64xbf16>
    %cst_47 = arith.constant dense<0.000000e+00> : vector<16x64xf32>
    %120 = tpu.matmul %118, %119, %cst_47 {dimension_numbers = #tpu.dot_dimension_numbers<[1], [0], [0], [1], [0, 0, 1, 1], [], []>} : vector<16x32xbf16>, vector<32x64xbf16>, vector<16x64xf32> -> vector<16x64xf32>
    %121 = arith.addf %117, %120 : vector<16x64xf32>
    %122 = vector.extract_strided_slice %97 {offsets = [96, 0], sizes = [16, 32], strides = [1, 1]} : vector<256x32xbf16> to vector<16x32xbf16>
    %123 = vector.extract_strided_slice %98 {offsets = [192, 0], sizes = [32, 64], strides = [1, 1]} : vector<512x64xbf16> to vector<32x64xbf16>
    %cst_48 = arith.constant dense<0.000000e+00> : vector<16x64xf32>
    %124 = tpu.matmul %122, %123, %cst_48 {dimension_numbers = #tpu.dot_dimension_numbers<[1], [0], [0], [1], [0, 0, 1, 1], [], []>} : vector<16x32xbf16>, vector<32x64xbf16>, vector<16x64xf32> -> vector<16x64xf32>
    %125 = arith.addf %121, %124 : vector<16x64xf32>
    %126 = vector.extract_strided_slice %97 {offsets = [112, 0], sizes = [16, 32], strides = [1, 1]} : vector<256x32xbf16> to vector<16x32xbf16>
    %127 = vector.extract_strided_slice %98 {offsets = [224, 0], sizes = [32, 64], strides = [1, 1]} : vector<512x64xbf16> to vector<32x64xbf16>
    %cst_49 = arith.constant dense<0.000000e+00> : vector<16x64xf32>
    %128 = tpu.matmul %126, %127, %cst_49 {dimension_numbers = #tpu.dot_dimension_numbers<[1], [0], [0], [1], [0, 0, 1, 1], [], []>} : vector<16x32xbf16>, vector<32x64xbf16>, vector<16x64xf32> -> vector<16x64xf32>
    %129 = arith.addf %125, %128 : vector<16x64xf32>
    %130 = vector.extract_strided_slice %97 {offsets = [128, 0], sizes = [16, 32], strides = [1, 1]} : vector<256x32xbf16> to vector<16x32xbf16>
    %131 = vector.extract_strided_slice %98 {offsets = [256, 0], sizes = [32, 64], strides = [1, 1]} : vector<512x64xbf16> to vector<32x64xbf16>
    %cst_50 = arith.constant dense<0.000000e+00> : vector<16x64xf32>
    %132 = tpu.matmul %130, %131, %cst_50 {dimension_numbers = #tpu.dot_dimension_numbers<[1], [0], [0], [1], [0, 0, 1, 1], [], []>} : vector<16x32xbf16>, vector<32x64xbf16>, vector<16x64xf32> -> vector<16x64xf32>
    %133 = arith.addf %129, %132 : vector<16x64xf32>
    %134 = vector.extract_strided_slice %97 {offsets = [144, 0], sizes = [16, 32], strides = [1, 1]} : vector<256x32xbf16> to vector<16x32xbf16>
    %135 = vector.extract_strided_slice %98 {offsets = [288, 0], sizes = [32, 64], strides = [1, 1]} : vector<512x64xbf16> to vector<32x64xbf16>
    %cst_51 = arith.constant dense<0.000000e+00> : vector<16x64xf32>
    %136 = tpu.matmul %134, %135, %cst_51 {dimension_numbers = #tpu.dot_dimension_numbers<[1], [0], [0], [1], [0, 0, 1, 1], [], []>} : vector<16x32xbf16>, vector<32x64xbf16>, vector<16x64xf32> -> vector<16x64xf32>
    %137 = arith.addf %133, %136 : vector<16x64xf32>
    %138 = vector.extract_strided_slice %97 {offsets = [160, 0], sizes = [16, 32], strides = [1, 1]} : vector<256x32xbf16> to vector<16x32xbf16>
    %139 = vector.extract_strided_slice %98 {offsets = [320, 0], sizes = [32, 64], strides = [1, 1]} : vector<512x64xbf16> to vector<32x64xbf16>
    %cst_52 = arith.constant dense<0.000000e+00> : vector<16x64xf32>
    %140 = tpu.matmul %138, %139, %cst_52 {dimension_numbers = #tpu.dot_dimension_numbers<[1], [0], [0], [1], [0, 0, 1, 1], [], []>} : vector<16x32xbf16>, vector<32x64xbf16>, vector<16x64xf32> -> vector<16x64xf32>
    %141 = arith.addf %137, %140 : vector<16x64xf32>
    %142 = vector.extract_strided_slice %97 {offsets = [176, 0], sizes = [16, 32], strides = [1, 1]} : vector<256x32xbf16> to vector<16x32xbf16>
    %143 = vector.extract_strided_slice %98 {offsets = [352, 0], sizes = [32, 64], strides = [1, 1]} : vector<512x64xbf16> to vector<32x64xbf16>
    %cst_53 = arith.constant dense<0.000000e+00> : vector<16x64xf32>
    %144 = tpu.matmul %142, %143, %cst_53 {dimension_numbers = #tpu.dot_dimension_numbers<[1], [0], [0], [1], [0, 0, 1, 1], [], []>} : vector<16x32xbf16>, vector<32x64xbf16>, vector<16x64xf32> -> vector<16x64xf32>
    %145 = arith.addf %141, %144 : vector<16x64xf32>
    %146 = vector.extract_strided_slice %97 {offsets = [192, 0], sizes = [16, 32], strides = [1, 1]} : vector<256x32xbf16> to vector<16x32xbf16>
    %147 = vector.extract_strided_slice %98 {offsets = [384, 0], sizes = [32, 64], strides = [1, 1]} : vector<512x64xbf16> to vector<32x64xbf16>
    %cst_54 = arith.constant dense<0.000000e+00> : vector<16x64xf32>
    %148 = tpu.matmul %146, %147, %cst_54 {dimension_numbers = #tpu.dot_dimension_numbers<[1], [0], [0], [1], [0, 0, 1, 1], [], []>} : vector<16x32xbf16>, vector<32x64xbf16>, vector<16x64xf32> -> vector<16x64xf32>
    %149 = arith.addf %145, %148 : vector<16x64xf32>
    %150 = vector.extract_strided_slice %97 {offsets = [208, 0], sizes = [16, 32], strides = [1, 1]} : vector<256x32xbf16> to vector<16x32xbf16>
    %151 = vector.extract_strided_slice %98 {offsets = [416, 0], sizes = [32, 64], strides = [1, 1]} : vector<512x64xbf16> to vector<32x64xbf16>
    %cst_55 = arith.constant dense<0.000000e+00> : vector<16x64xf32>
    %152 = tpu.matmul %150, %151, %cst_55 {dimension_numbers = #tpu.dot_dimension_numbers<[1], [0], [0], [1], [0, 0, 1, 1], [], []>} : vector<16x32xbf16>, vector<32x64xbf16>, vector<16x64xf32> -> vector<16x64xf32>
    %153 = arith.addf %149, %152 : vector<16x64xf32>
    %154 = vector.extract_strided_slice %97 {offsets = [224, 0], sizes = [16, 32], strides = [1, 1]} : vector<256x32xbf16> to vector<16x32xbf16>
    %155 = vector.extract_strided_slice %98 {offsets = [448, 0], sizes = [32, 64], strides = [1, 1]} : vector<512x64xbf16> to vector<32x64xbf16>
    %cst_56 = arith.constant dense<0.000000e+00> : vector<16x64xf32>
    %156 = tpu.matmul %154, %155, %cst_56 {dimension_numbers = #tpu.dot_dimension_numbers<[1], [0], [0], [1], [0, 0, 1, 1], [], []>} : vector<16x32xbf16>, vector<32x64xbf16>, vector<16x64xf32> -> vector<16x64xf32>
    %157 = arith.addf %153, %156 : vector<16x64xf32>
    %158 = vector.extract_strided_slice %97 {offsets = [240, 0], sizes = [16, 32], strides = [1, 1]} : vector<256x32xbf16> to vector<16x32xbf16>
    %159 = vector.extract_strided_slice %98 {offsets = [480, 0], sizes = [32, 64], strides = [1, 1]} : vector<512x64xbf16> to vector<32x64xbf16>
    %cst_57 = arith.constant dense<0.000000e+00> : vector<16x64xf32>
    %160 = tpu.matmul %158, %159, %cst_57 {dimension_numbers = #tpu.dot_dimension_numbers<[1], [0], [0], [1], [0, 0, 1, 1], [], []>} : vector<16x32xbf16>, vector<32x64xbf16>, vector<16x64xf32> -> vector<16x64xf32>
    %161 = arith.addf %157, %160 : vector<16x64xf32>
    %c0_58 = arith.constant 0 : index
    %c0_59 = arith.constant 0 : index
    %162 = vector.load %arg11[%c0_58, %c0_59] : memref<1x64xf32, #tpu.memory_space<vmem>>, vector<1x64xf32>
    %163 = vector.broadcast %162 : vector<1x64xf32> to vector<16x64xf32>
    %164 = arith.mulf %161, %163 : vector<16x64xf32>
    %c0_60 = arith.constant 0 : index
    %c0_61 = arith.constant 0 : index
    %165 = vector.load %arg12[%c0_60, %c0_61] : memref<1x64xf32, #tpu.memory_space<vmem>>, vector<1x64xf32>
    %166 = vector.broadcast %165 : vector<1x64xf32> to vector<16x64xf32>
    %167 = arith.addf %164, %166 : vector<16x64xf32>
    %cst_62 = arith.constant 0.000000e+00 : f32
    %168 = vector.broadcast %cst_62 : f32 to vector<16x64xf32>
    %169 = arith.cmpf ogt, %167, %168 : vector<16x64xf32>
    %cst_63 = arith.constant 0.00999999977 : f32
    %170 = vector.broadcast %cst_63 : f32 to vector<16x64xf32>
    %171 = arith.mulf %170, %167 : vector<16x64xf32>
    %172 = arith.select %169, %167, %171 : vector<16x64xi1>, vector<16x64xf32>
    %c0_64 = arith.constant 0 : index
    %c0_65 = arith.constant 0 : index
    %173 = vector.load %arg13[%c0_64, %c0_65] : memref<256x16xbf16, #tpu.memory_space<vmem>>, vector<256x16xbf16>
    %174 = arith.truncf %172 : vector<16x64xf32> to vector<16x64xbf16>
    %cst_66 = arith.constant dense<0.000000e+00> : vector<256x64xf32>
    %175 = tpu.matmul %173, %174, %cst_66 {dimension_numbers = #tpu.dot_dimension_numbers<[1], [0], [0], [1], [0, 0, 1, 1], [], []>} : vector<256x16xbf16>, vector<16x64xbf16>, vector<256x64xf32> -> vector<256x64xf32>
    %176 = arith.truncf %175 : vector<256x64xf32> to vector<256x64xbf16>
    %c0_67 = arith.constant 0 : index
    %c0_68 = arith.constant 0 : index
    %177 = vector.load %arg14[%c0_67, %c0_68] : memref<1024x128xbf16, #tpu.memory_space<vmem>>, vector<1024x128xbf16>
    %178 = vector.extract_strided_slice %176 {offsets = [0, 0], sizes = [16, 64], strides = [1, 1]} : vector<256x64xbf16> to vector<16x64xbf16>
    %179 = vector.extract_strided_slice %177 {offsets = [0, 0], sizes = [64, 128], strides = [1, 1]} : vector<1024x128xbf16> to vector<64x128xbf16>
    %cst_69 = arith.constant dense<0.000000e+00> : vector<16x128xf32>
    %180 = tpu.matmul %178, %179, %cst_69 {dimension_numbers = #tpu.dot_dimension_numbers<[1], [0], [0], [1], [0, 0, 1, 1], [], []>} : vector<16x64xbf16>, vector<64x128xbf16>, vector<16x128xf32> -> vector<16x128xf32>
    %181 = vector.extract_strided_slice %176 {offsets = [16, 0], sizes = [16, 64], strides = [1, 1]} : vector<256x64xbf16> to vector<16x64xbf16>
    %182 = vector.extract_strided_slice %177 {offsets = [64, 0], sizes = [64, 128], strides = [1, 1]} : vector<1024x128xbf16> to vector<64x128xbf16>
    %cst_70 = arith.constant dense<0.000000e+00> : vector<16x128xf32>
    %183 = tpu.matmul %181, %182, %cst_70 {dimension_numbers = #tpu.dot_dimension_numbers<[1], [0], [0], [1], [0, 0, 1, 1], [], []>} : vector<16x64xbf16>, vector<64x128xbf16>, vector<16x128xf32> -> vector<16x128xf32>
    %184 = arith.addf %180, %183 : vector<16x128xf32>
    %185 = vector.extract_strided_slice %176 {offsets = [32, 0], sizes = [16, 64], strides = [1, 1]} : vector<256x64xbf16> to vector<16x64xbf16>
    %186 = vector.extract_strided_slice %177 {offsets = [128, 0], sizes = [64, 128], strides = [1, 1]} : vector<1024x128xbf16> to vector<64x128xbf16>
    %cst_71 = arith.constant dense<0.000000e+00> : vector<16x128xf32>
    %187 = tpu.matmul %185, %186, %cst_71 {dimension_numbers = #tpu.dot_dimension_numbers<[1], [0], [0], [1], [0, 0, 1, 1], [], []>} : vector<16x64xbf16>, vector<64x128xbf16>, vector<16x128xf32> -> vector<16x128xf32>
    %188 = arith.addf %184, %187 : vector<16x128xf32>
    %189 = vector.extract_strided_slice %176 {offsets = [48, 0], sizes = [16, 64], strides = [1, 1]} : vector<256x64xbf16> to vector<16x64xbf16>
    %190 = vector.extract_strided_slice %177 {offsets = [192, 0], sizes = [64, 128], strides = [1, 1]} : vector<1024x128xbf16> to vector<64x128xbf16>
    %cst_72 = arith.constant dense<0.000000e+00> : vector<16x128xf32>
    %191 = tpu.matmul %189, %190, %cst_72 {dimension_numbers = #tpu.dot_dimension_numbers<[1], [0], [0], [1], [0, 0, 1, 1], [], []>} : vector<16x64xbf16>, vector<64x128xbf16>, vector<16x128xf32> -> vector<16x128xf32>
    %192 = arith.addf %188, %191 : vector<16x128xf32>
    %193 = vector.extract_strided_slice %176 {offsets = [64, 0], sizes = [16, 64], strides = [1, 1]} : vector<256x64xbf16> to vector<16x64xbf16>
    %194 = vector.extract_strided_slice %177 {offsets = [256, 0], sizes = [64, 128], strides = [1, 1]} : vector<1024x128xbf16> to vector<64x128xbf16>
    %cst_73 = arith.constant dense<0.000000e+00> : vector<16x128xf32>
    %195 = tpu.matmul %193, %194, %cst_73 {dimension_numbers = #tpu.dot_dimension_numbers<[1], [0], [0], [1], [0, 0, 1, 1], [], []>} : vector<16x64xbf16>, vector<64x128xbf16>, vector<16x128xf32> -> vector<16x128xf32>
    %196 = arith.addf %192, %195 : vector<16x128xf32>
    %197 = vector.extract_strided_slice %176 {offsets = [80, 0], sizes = [16, 64], strides = [1, 1]} : vector<256x64xbf16> to vector<16x64xbf16>
    %198 = vector.extract_strided_slice %177 {offsets = [320, 0], sizes = [64, 128], strides = [1, 1]} : vector<1024x128xbf16> to vector<64x128xbf16>
    %cst_74 = arith.constant dense<0.000000e+00> : vector<16x128xf32>
    %199 = tpu.matmul %197, %198, %cst_74 {dimension_numbers = #tpu.dot_dimension_numbers<[1], [0], [0], [1], [0, 0, 1, 1], [], []>} : vector<16x64xbf16>, vector<64x128xbf16>, vector<16x128xf32> -> vector<16x128xf32>
    %200 = arith.addf %196, %199 : vector<16x128xf32>
    %201 = vector.extract_strided_slice %176 {offsets = [96, 0], sizes = [16, 64], strides = [1, 1]} : vector<256x64xbf16> to vector<16x64xbf16>
    %202 = vector.extract_strided_slice %177 {offsets = [384, 0], sizes = [64, 128], strides = [1, 1]} : vector<1024x128xbf16> to vector<64x128xbf16>
    %cst_75 = arith.constant dense<0.000000e+00> : vector<16x128xf32>
    %203 = tpu.matmul %201, %202, %cst_75 {dimension_numbers = #tpu.dot_dimension_numbers<[1], [0], [0], [1], [0, 0, 1, 1], [], []>} : vector<16x64xbf16>, vector<64x128xbf16>, vector<16x128xf32> -> vector<16x128xf32>
    %204 = arith.addf %200, %203 : vector<16x128xf32>
    %205 = vector.extract_strided_slice %176 {offsets = [112, 0], sizes = [16, 64], strides = [1, 1]} : vector<256x64xbf16> to vector<16x64xbf16>
    %206 = vector.extract_strided_slice %177 {offsets = [448, 0], sizes = [64, 128], strides = [1, 1]} : vector<1024x128xbf16> to vector<64x128xbf16>
    %cst_76 = arith.constant dense<0.000000e+00> : vector<16x128xf32>
    %207 = tpu.matmul %205, %206, %cst_76 {dimension_numbers = #tpu.dot_dimension_numbers<[1], [0], [0], [1], [0, 0, 1, 1], [], []>} : vector<16x64xbf16>, vector<64x128xbf16>, vector<16x128xf32> -> vector<16x128xf32>
    %208 = arith.addf %204, %207 : vector<16x128xf32>
    %209 = vector.extract_strided_slice %176 {offsets = [128, 0], sizes = [16, 64], strides = [1, 1]} : vector<256x64xbf16> to vector<16x64xbf16>
    %210 = vector.extract_strided_slice %177 {offsets = [512, 0], sizes = [64, 128], strides = [1, 1]} : vector<1024x128xbf16> to vector<64x128xbf16>
    %cst_77 = arith.constant dense<0.000000e+00> : vector<16x128xf32>
    %211 = tpu.matmul %209, %210, %cst_77 {dimension_numbers = #tpu.dot_dimension_numbers<[1], [0], [0], [1], [0, 0, 1, 1], [], []>} : vector<16x64xbf16>, vector<64x128xbf16>, vector<16x128xf32> -> vector<16x128xf32>
    %212 = arith.addf %208, %211 : vector<16x128xf32>
    %213 = vector.extract_strided_slice %176 {offsets = [144, 0], sizes = [16, 64], strides = [1, 1]} : vector<256x64xbf16> to vector<16x64xbf16>
    %214 = vector.extract_strided_slice %177 {offsets = [576, 0], sizes = [64, 128], strides = [1, 1]} : vector<1024x128xbf16> to vector<64x128xbf16>
    %cst_78 = arith.constant dense<0.000000e+00> : vector<16x128xf32>
    %215 = tpu.matmul %213, %214, %cst_78 {dimension_numbers = #tpu.dot_dimension_numbers<[1], [0], [0], [1], [0, 0, 1, 1], [], []>} : vector<16x64xbf16>, vector<64x128xbf16>, vector<16x128xf32> -> vector<16x128xf32>
    %216 = arith.addf %212, %215 : vector<16x128xf32>
    %217 = vector.extract_strided_slice %176 {offsets = [160, 0], sizes = [16, 64], strides = [1, 1]} : vector<256x64xbf16> to vector<16x64xbf16>
    %218 = vector.extract_strided_slice %177 {offsets = [640, 0], sizes = [64, 128], strides = [1, 1]} : vector<1024x128xbf16> to vector<64x128xbf16>
    %cst_79 = arith.constant dense<0.000000e+00> : vector<16x128xf32>
    %219 = tpu.matmul %217, %218, %cst_79 {dimension_numbers = #tpu.dot_dimension_numbers<[1], [0], [0], [1], [0, 0, 1, 1], [], []>} : vector<16x64xbf16>, vector<64x128xbf16>, vector<16x128xf32> -> vector<16x128xf32>
    %220 = arith.addf %216, %219 : vector<16x128xf32>
    %221 = vector.extract_strided_slice %176 {offsets = [176, 0], sizes = [16, 64], strides = [1, 1]} : vector<256x64xbf16> to vector<16x64xbf16>
    %222 = vector.extract_strided_slice %177 {offsets = [704, 0], sizes = [64, 128], strides = [1, 1]} : vector<1024x128xbf16> to vector<64x128xbf16>
    %cst_80 = arith.constant dense<0.000000e+00> : vector<16x128xf32>
    %223 = tpu.matmul %221, %222, %cst_80 {dimension_numbers = #tpu.dot_dimension_numbers<[1], [0], [0], [1], [0, 0, 1, 1], [], []>} : vector<16x64xbf16>, vector<64x128xbf16>, vector<16x128xf32> -> vector<16x128xf32>
    %224 = arith.addf %220, %223 : vector<16x128xf32>
    %225 = vector.extract_strided_slice %176 {offsets = [192, 0], sizes = [16, 64], strides = [1, 1]} : vector<256x64xbf16> to vector<16x64xbf16>
    %226 = vector.extract_strided_slice %177 {offsets = [768, 0], sizes = [64, 128], strides = [1, 1]} : vector<1024x128xbf16> to vector<64x128xbf16>
    %cst_81 = arith.constant dense<0.000000e+00> : vector<16x128xf32>
    %227 = tpu.matmul %225, %226, %cst_81 {dimension_numbers = #tpu.dot_dimension_numbers<[1], [0], [0], [1], [0, 0, 1, 1], [], []>} : vector<16x64xbf16>, vector<64x128xbf16>, vector<16x128xf32> -> vector<16x128xf32>
    %228 = arith.addf %224, %227 : vector<16x128xf32>
    %229 = vector.extract_strided_slice %176 {offsets = [208, 0], sizes = [16, 64], strides = [1, 1]} : vector<256x64xbf16> to vector<16x64xbf16>
    %230 = vector.extract_strided_slice %177 {offsets = [832, 0], sizes = [64, 128], strides = [1, 1]} : vector<1024x128xbf16> to vector<64x128xbf16>
    %cst_82 = arith.constant dense<0.000000e+00> : vector<16x128xf32>
    %231 = tpu.matmul %229, %230, %cst_82 {dimension_numbers = #tpu.dot_dimension_numbers<[1], [0], [0], [1], [0, 0, 1, 1], [], []>} : vector<16x64xbf16>, vector<64x128xbf16>, vector<16x128xf32> -> vector<16x128xf32>
    %232 = arith.addf %228, %231 : vector<16x128xf32>
    %233 = vector.extract_strided_slice %176 {offsets = [224, 0], sizes = [16, 64], strides = [1, 1]} : vector<256x64xbf16> to vector<16x64xbf16>
    %234 = vector.extract_strided_slice %177 {offsets = [896, 0], sizes = [64, 128], strides = [1, 1]} : vector<1024x128xbf16> to vector<64x128xbf16>
    %cst_83 = arith.constant dense<0.000000e+00> : vector<16x128xf32>
    %235 = tpu.matmul %233, %234, %cst_83 {dimension_numbers = #tpu.dot_dimension_numbers<[1], [0], [0], [1], [0, 0, 1, 1], [], []>} : vector<16x64xbf16>, vector<64x128xbf16>, vector<16x128xf32> -> vector<16x128xf32>
    %236 = arith.addf %232, %235 : vector<16x128xf32>
    %237 = vector.extract_strided_slice %176 {offsets = [240, 0], sizes = [16, 64], strides = [1, 1]} : vector<256x64xbf16> to vector<16x64xbf16>
    %238 = vector.extract_strided_slice %177 {offsets = [960, 0], sizes = [64, 128], strides = [1, 1]} : vector<1024x128xbf16> to vector<64x128xbf16>
    %cst_84 = arith.constant dense<0.000000e+00> : vector<16x128xf32>
    %239 = tpu.matmul %237, %238, %cst_84 {dimension_numbers = #tpu.dot_dimension_numbers<[1], [0], [0], [1], [0, 0, 1, 1], [], []>} : vector<16x64xbf16>, vector<64x128xbf16>, vector<16x128xf32> -> vector<16x128xf32>
    %240 = arith.addf %236, %239 : vector<16x128xf32>
    %c0_85 = arith.constant 0 : index
    %c0_86 = arith.constant 0 : index
    %241 = vector.load %arg15[%c0_85, %c0_86] : memref<1x128xf32, #tpu.memory_space<vmem>>, vector<1x128xf32>
    %242 = vector.broadcast %241 : vector<1x128xf32> to vector<16x128xf32>
    %243 = arith.mulf %240, %242 : vector<16x128xf32>
    %c0_87 = arith.constant 0 : index
    %c0_88 = arith.constant 0 : index
    %244 = vector.load %arg16[%c0_87, %c0_88] : memref<1x128xf32, #tpu.memory_space<vmem>>, vector<1x128xf32>
    %245 = vector.broadcast %244 : vector<1x128xf32> to vector<16x128xf32>
    %246 = arith.addf %243, %245 : vector<16x128xf32>
    %cst_89 = arith.constant 0.000000e+00 : f32
    %247 = vector.broadcast %cst_89 : f32 to vector<16x128xf32>
    %248 = arith.cmpf ogt, %246, %247 : vector<16x128xf32>
    %cst_90 = arith.constant 0.00999999977 : f32
    %249 = vector.broadcast %cst_90 : f32 to vector<16x128xf32>
    %250 = arith.mulf %249, %246 : vector<16x128xf32>
    %251 = arith.select %248, %246, %250 : vector<16x128xi1>, vector<16x128xf32>
    %252 = tpu.iota {dimensions = array<i32: 0>} : vector<16x128xi32>
    %c1_i32 = arith.constant 1 : i32
    %253 = vector.broadcast %c1_i32 : i32 to vector<16x128xi32>
    %254 = arith.cmpi slt, %252, %253 : vector<16x128xi32>
    %cst_91 = arith.constant 0.000000e+00 : f32
    %255 = vector.broadcast %cst_91 : f32 to vector<16x128xf32>
    %256 = arith.select %254, %251, %255 : vector<16x128xi1>, vector<16x128xf32>
    %c0_92 = arith.constant 0 : index
    %c0_93 = arith.constant 0 : index
    %c0_94 = arith.constant 0 : index
    %257 = vector.load %arg17[%c0_92, %c0_93, %c0_94] : memref<1x16x128xf32, #tpu.memory_space<vmem>>, vector<1x16x128xf32>
    %258 = vector.shape_cast %257 : vector<1x16x128xf32> to vector<16x128xf32>
    %259 = vector.shape_cast %256 : vector<16x128xf32> to vector<1x16x128xf32>
    tpu.vector_store %arg17[%c0_92, %c0_93, %c0_94], %259 {strides = array<i32>} : memref<1x16x128xf32, #tpu.memory_space<vmem>>, vector<1x16x128xf32>,
    return
  }
  func.func @transform_0(%arg0: i32) -> (i32, i32, i32) {
    %c0_i32 = arith.constant 0 : i32
    %c0_i32_0 = arith.constant 0 : i32
    %c0_i32_1 = arith.constant 0 : i32
    return %arg0, %c0_i32, %c0_i32_0 : i32, i32, i32
  }
  func.func @transform_1(%arg0: i32) -> (i32, i32) {
    %c0_i32 = arith.constant 0 : i32
    %c0_i32_0 = arith.constant 0 : i32
    %c0_i32_1 = arith.constant 0 : i32
    return %c0_i32, %c0_i32_0 : i32, i32
  }
  func.func @transform_2(%arg0: i32) -> (i32, i32) {
    %c0_i32 = arith.constant 0 : i32
    %c0_i32_0 = arith.constant 0 : i32
    %c0_i32_1 = arith.constant 0 : i32
    return %c0_i32, %c0_i32_0 : i32, i32
  }
  func.func @transform_3(%arg0: i32) -> (i32, i32) {
    %c0_i32 = arith.constant 0 : i32
    %c0_i32_0 = arith.constant 0 : i32
    %c0_i32_1 = arith.constant 0 : i32
    return %c0_i32, %c0_i32_0 : i32, i32
  }
  func.func @transform_4(%arg0: i32) -> (i32, i32) {
    %c0_i32 = arith.constant 0 : i32
    %c0_i32_0 = arith.constant 0 : i32
    %c0_i32_1 = arith.constant 0 : i32
    return %c0_i32, %c0_i32_0 : i32, i32
  }
  func.func @transform_5(%arg0: i32) -> (i32, i32) {
    %c0_i32 = arith.constant 0 : i32
    %c0_i32_0 = arith.constant 0 : i32
    %c0_i32_1 = arith.constant 0 : i32
    return %c0_i32, %c0_i32_0 : i32, i32
  }
  func.func @transform_6(%arg0: i32) -> (i32, i32) {
    %c0_i32 = arith.constant 0 : i32
    %c0_i32_0 = arith.constant 0 : i32
    %c0_i32_1 = arith.constant 0 : i32
    return %c0_i32, %c0_i32_0 : i32, i32
  }
  func.func @transform_7(%arg0: i32) -> (i32, i32) {
    %c0_i32 = arith.constant 0 : i32
    %c0_i32_0 = arith.constant 0 : i32
    %c0_i32_1 = arith.constant 0 : i32
    return %c0_i32, %c0_i32_0 : i32, i32
  }
  func.func @transform_8(%arg0: i32) -> (i32, i32) {
    %c0_i32 = arith.constant 0 : i32
    %c0_i32_0 = arith.constant 0 : i32
    %c0_i32_1 = arith.constant 0 : i32
    return %c0_i32, %c0_i32_0 : i32, i32
  }
  func.func @transform_9(%arg0: i32) -> (i32, i32) {
    %c0_i32 = arith.constant 0 : i32
    %c0_i32_0 = arith.constant 0 : i32
    %c0_i32_1 = arith.constant 0 : i32
    return %c0_i32, %c0_i32_0 : i32, i32
  }
  func.func @transform_10(%arg0: i32) -> (i32, i32) {
    %c0_i32 = arith.constant 0 : i32
    %c0_i32_0 = arith.constant 0 : i32
    %c0_i32_1 = arith.constant 0 : i32
    return %c0_i32, %c0_i32_0 : i32, i32
  }
  func.func @transform_11(%arg0: i32) -> (i32, i32) {
    %c0_i32 = arith.constant 0 : i32
    %c0_i32_0 = arith.constant 0 : i32
    %c0_i32_1 = arith.constant 0 : i32
    return %c0_i32, %c0_i32_0 : i32, i32
  }
  func.func @transform_12(%arg0: i32) -> (i32, i32) {
    %c0_i32 = arith.constant 0 : i32
    %c0_i32_0 = arith.constant 0 : i32
    %c0_i32_1 = arith.constant 0 : i32
    return %c0_i32, %c0_i32_0 : i32, i32
  }
  func.func @transform_13(%arg0: i32) -> (i32, i32) {
    %c0_i32 = arith.constant 0 : i32
    %c0_i32_0 = arith.constant 0 : i32
    %c0_i32_1 = arith.constant 0 : i32
    return %c0_i32, %c0_i32_0 : i32, i32
  }
  func.func @transform_14(%arg0: i32) -> (i32, i32) {
    %c0_i32 = arith.constant 0 : i32
    %c0_i32_0 = arith.constant 0 : i32
    %c0_i32_1 = arith.constant 0 : i32
    return %c0_i32, %c0_i32_0 : i32, i32
  }
  func.func @transform_15(%arg0: i32) -> (i32, i32) {
    %c0_i32 = arith.constant 0 : i32
    %c0_i32_0 = arith.constant 0 : i32
    %c0_i32_1 = arith.constant 0 : i32
    return %c0_i32, %c0_i32_0 : i32, i32
  }
  func.func @transform_16(%arg0: i32) -> (i32, i32, i32) {
    %c0_i32 = arith.constant 0 : i32
    %c0_i32_0 = arith.constant 0 : i32
    %c0_i32_1 = arith.constant 0 : i32
    return %arg0, %c0_i32, %c0_i32_0 : i32, i32, i32
  }
}

</mosaic_0001>

<bundles_post_ra>
// kernel: forward.1
= control target key start
LH: loop header
LB: loop body
LE: loop exit
PB: predicated region body
PF: predicated region fallthrough
CT: control target
= control target key end

     0   :  { %s8735_s21 = smov 0   ;;  %s10247_s0 = inlined_call_operand.vmem [shape: bf16[2,256,16], index: 0, kind: input, shape index: {}]   ;;  %s10248_s1 = inlined_call_operand.vmem [shape: bf16[16,16], index: 1, kind: input, shape index: {}]   ;;  %s10249_s2 = inlined_call_operand.vmem [shape: f32[1,16], index: 2, kind: input, shape index: {}]   ;;  %s10250_s3 = inlined_call_operand.vmem [shape: f32[1,16], index: 3, kind: input, shape index: {}]   ;;  %s10251_s4 = inlined_call_operand.vmem [shape: bf16[1024,256], index: 4, kind: input, shape index: {}]   ;;  %s10252_s5 = inlined_call_operand.vmem [shape: bf16[256,32], index: 5, kind: input, shape index: {}]   ;;  %s10253_s6 = inlined_call_operand.vmem [shape: f32[1,32], index: 6, kind: input, shape index: {}]   ;;  %s10254_s7 = inlined_call_operand.vmem [shape: f32[1,32], index: 7, kind: input, shape index: {}]   ;;  %s10255_s8 = inlined_call_operand.vmem [shape: bf16[256,64], index: 8, kind: input, shape index: {}]   ;;  %s10256_s9 = inlined_call_operand.vmem [shape: bf16[512,64], index: 9, kind: input, shape index: {}]   ;;  %s10257_s10 = inlined_call_operand.vmem [shape: f32[1,64], index: 10, kind: input, shape index: {}]   ;;  %s10258_s11 = inlined_call_operand.vmem [shape: f32[1,64], index: 11, kind: input, shape index: {}]   ;;  %s10259_s12 = inlined_call_operand.vmem [shape: bf16[256,16], index: 12, kind: input, shape index: {}]   ;;  %s10260_s13 = inlined_call_operand.vmem [shape: bf16[1024,128], index: 13, kind: input, shape index: {}]   ;;  %s10261_s14 = inlined_call_operand.vmem [shape: f32[1,128], index: 14, kind: input, shape index: {}]   ;;  %s10262_s15 = inlined_call_operand.vmem [shape: f32[1,128], index: 15, kind: input, shape index: {}]   ;;  %s10263_s16 = inlined_call_operand.vmem [shape: f32[2,16,128], index: 16, kind: output, shape index: {}]  }
   0x1   :  { %10266 = sst [smem:[#allocation4_spill]] %s10247_s0 }
   0x2 LB: > { %s6971_s22 = sadd.s32 4294967295, %s8645_s21   ;;  %p6975_p0 = scmp.ge.s32.totalorder %s8645_s21, 1  ;;  %s8645_s21 = sphi %s8735_s21, %s26_s21  }
   0x3   : > { %p462_p1 = scmp.lt.s32.totalorder %s8645_s21, 3 }
   0x5   : > { %p463_p2 = pnand %p6975_p0, %p462_p1 }
   0x7   : > { %466 = sbr.rel (%p463_p2) target bundleno = 2289 (0x8f1), region = 84 }
   0xc   : > { %v8286_v0 = vld [vmem:[%s10248_s1] sm:$0xff]   ;;  %p512_p3 = scmp.lt.s32.totalorder %s6971_s22, 1  ;;  %s10267_s28 = sld [smem:[#allocation4_spill]]  ;;  %vm643_vm0 = vcmask 130048   ;;  %v8647_v17 = vmov 0  }
   0xd   : > { %7687 = vmatprep.subr.bf16.mxu0 %v8286_v0  ;;  %1811 = vmatprep.subr.bf16.mxu1 %v8647_v17  ;;  %v8305_v18 = vld [vmem:[%s10251_s4 + $0x4] ss:$8 sps:$4 sm:$0xff]   ;;  %v8803_v31 = vld [vmem:[%s10249_s2] ss:$0 sm:$0xff] }
   0xe   : > { %s10274_s22 = smov (!%p512_p3, %s6971_s22), 1  ;;  %7688 = vmatpush3.bf16.msra.mxu0 %v8286_v0  ;;  %1843 = vmatprep.mubr.bf16.mxu1 %v8305_v18  ;;  %v8809_v34 = vld [vmem:[%s10250_s3] ss:$0 sm:$0xff] }
   0xf   : > { %s7423_s25 = sshll.u32 %s10274_s22, 7  ;;  %s7424_s27 = sshll.u32 %s10274_s22, 4 }
  0x10   : > { %s10233_s30 = scalar_lea.vmem %s10263_s16, %s7424_s27 }
  0x12   : > { %s8752_s29 = scalar_lea.vmem %s10267_s28, %s7423_s25 }
  0x13   : > { %v8287_v1 = vld [vmem:[%s8752_s29] sm:$0xff]   ;;  %v8288_v2 = vld [vmem:[%s8752_s29 + $0x8] sm:$0xff]   ;;  %v8289_v3 = vld [vmem:[%s8752_s29 + $0x10] sm:$0xff]  }
  0x14   : > { %7689 = vmatprep.mubr.msk.bf16.mxu0 %vm643_vm0, %v8287_v1  ;;  %v8290_v4 = vld [vmem:[%s8752_s29 + $0x18] sm:$0xff]   ;;  %v8291_v5 = vld [vmem:[%s8752_s29 + $0x20] sm:$0xff]   ;;  %v8292_v6 = vld [vmem:[%s8752_s29 + $0x28] sm:$0xff]  }
  0x15   : > { %7690 = vmatmul.mubr.msk.bf16.vlgmr.msra.gmra.mxu0 %vm643_vm0, %v8288_v2  ;;  %v8293_v7 = vld [vmem:[%s8752_s29 + $0x30] sm:$0xff]   ;;  %v8294_v8 = vld [vmem:[%s8752_s29 + $0x38] sm:$0xff]   ;;  %v8295_v9 = vld [vmem:[%s8752_s29 + $0x40] sm:$0xff]  }
  0x16   : > { %7693 = vmatprep.mubr.msk.bf16.mxu0 %vm643_vm0, %v8289_v3  ;;  %v8296_v10 = vld [vmem:[%s8752_s29 + $0x48] sm:$0xff]   ;;  %v8297_v11 = vld [vmem:[%s8752_s29 + $0x50] sm:$0xff]   ;;  %v8298_v12 = vld [vmem:[%s8752_s29 + $0x58] sm:$0xff]  }
  0x17   : > { %v8299_v13 = vld [vmem:[%s8752_s29 + $0x60] sm:$0xff]   ;;  %v8300_v14 = vld [vmem:[%s8752_s29 + $0x68] sm:$0xff]   ;;  %v8301_v15 = vld [vmem:[%s8752_s29 + $0x70] sm:$0xff]  }
  0x18   : > { %v8302_v16 = vld [vmem:[%s8752_s29 + $0x78] sm:$0xff]  }
  0x1d   : > { %7694 = vmatmul.mubr.msk.bf16.gmra.mxu0 %vm643_vm0, %v8290_v4 }
  0x1e   : > { %7697 = vmatprep.mubr.msk.bf16.mxu0 %vm643_vm0, %v8291_v5 }
  0x25   : > { %7698 = vmatmul.mubr.msk.bf16.gmra.mxu0 %vm643_vm0, %v8292_v6 }
  0x26   : > { %7701 = vmatprep.mubr.msk.bf16.mxu0 %vm643_vm0, %v8293_v7 }
  0x2d   : > { %7702 = vmatmul.mubr.msk.bf16.gmra.mxu0 %vm643_vm0, %v8294_v8 }
  0x2e   : > { %7705 = vmatprep.mubr.msk.bf16.mxu0 %vm643_vm0, %v8295_v9 }
  0x35   : > { %7706 = vmatmul.mubr.msk.bf16.gmra.mxu0 %vm643_vm0, %v8296_v10 }
  0x36   : > { %7709 = vmatprep.mubr.msk.bf16.mxu0 %vm643_vm0, %v8297_v11 }
  0x3d   : > { %7710 = vmatmul.mubr.msk.bf16.gmra.mxu0 %vm643_vm0, %v8298_v12 }
  0x3e   : > { %7713 = vmatprep.mubr.msk.bf16.mxu0 %vm643_vm0, %v8299_v13 }
  0x45   : > { %7714 = vmatmul.mubr.msk.bf16.gmra.mxu0 %vm643_vm0, %v8300_v14 }
  0x46   : > { %7717 = vmatprep.mubr.msk.bf16.mxu0 %vm643_vm0, %v8301_v15 }
  0x4d   : > { %7718 = vmatmul.mubr.msk.bf16.gmra.mxu0 %vm643_vm0, %v8302_v16 }
  0xd5   : > { %v8790_v19 = vpop.f32.mrf.mxu0 }
  0xd7   : > { %v8792_v20 = vpop.f32.mrf.mxu0 }
  0xd9   : > { %v8794_v21 = vpop.f32.mrf.mxu0 }
  0xdb   : > { %v8796_v22 = vpop.f32.mrf.mxu0 }
  0xdd   : > { %v7695_v23 = vpop.f32.mrf.mxu0 }
  0xde   : > { %v866_v2 = vmul.f32 %v7695_v23, %v8803_v31 }
  0xdf   : > { %v8798_v24 = vpop.f32.mrf.mxu0 }
  0xe0   : > { %v905_v13 = vadd.f32 %v8809_v34, %v866_v2  ;;  %v864_v14 = vmul.f32 %v8803_v31, %v8798_v24  ;;  %v862_v24 = vmul.f32 %v8790_v19, %v8803_v31 }
  0xe1   : > { %v7696_v25 = vpop.f32.mrf.mxu0 }
  0xe2   : > { %v867_v61 = vmul.f32 %v7696_v25, %v8803_v31  ;;  %v863_v25 = vmul.f32 %v8794_v21, %v8803_v31  ;;  %vm937_vm10 = vcmp.gt.f32.partialorder %v905_v13, 0.0  ;;  %v901_v19 = vadd.f32 %v8809_v34, %v862_v24 }
  0xe3   : > { %v745_v26 = vpop.f32.mrf.mxu0 }
  0xe4   : > { %v906_v8 = vadd.f32 %v8809_v34, %v867_v61  ;;  %v865_v9 = vmul.f32 %v8803_v31, %v745_v26  ;;  %vm933_vm14 = vcmp.gt.f32.partialorder %v901_v19, 0.0 }
  0xe5   : > { %v7699_v27 = vpop.f32.mrf.mxu0 }
  0xe6   : > { %v870_v41 = vmul.f32 %v7699_v27, %v8803_v31  ;;  %v970_v26 = vmul.f32 0.01, %v906_v8  ;;  %v904_v27 = vadd.f32 %v8809_v34, %v865_v9  ;;  %vm938_vm9 = vcmp.gt.f32.partialorder %v906_v8, 0.0 }
  0xe7   : > { %v758_v28 = vpop.f32.mrf.mxu0 }
  0xe8   : > { %v909_v52 = vadd.f32 %v8809_v34, %v870_v41  ;;  %v868_v53 = vmul.f32 %v8803_v31, %v758_v28  ;;  %vm936_vm11 = vcmp.gt.f32.partialorder %v904_v27, 0.0  ;;  %v860_v41 = vmul.f32 %v8803_v31, %v8792_v20 }
  0xe9   : > { %v7700_v29 = vpop.f32.mrf.mxu0 }
  0xea   : > { %v871_v38 = vmul.f32 %v7700_v29, %v8803_v31  ;;  %v973_v3 = vmul.f32 0.01, %v909_v52  ;;  %v907_v4 = vadd.f32 %v8809_v34, %v868_v53  ;;  %vm941_vm6 = vcmp.gt.f32.partialorder %v909_v52, 0.0 }
  0xeb   : > { %v761_v30 = vpop.f32.mrf.mxu0 }
  0xec   : > { %v910_v47 = vadd.f32 %v8809_v34, %v871_v38  ;;  %v869_v49 = vmul.f32 %v8803_v31, %v761_v30  ;;  %v971_v15 = vmul.f32 0.01, %v907_v4  ;;  %v1005_v16 = vsel %vm941_vm6, %v909_v52, %v973_v3 }
  0xed   : > { %v7703_v32 = vpop.f32.mrf.mxu0  ;;  %vm939_vm8 = vcmp.gt.f32.partialorder %v907_v4, 0.0  ;;  %v969_v30 = vmul.f32 0.01, %v905_v13  ;;  %v968_v38 = vmul.f32 0.01, %v904_v27 }
  0xee   : > { %v874_v33 = vmul.f32 %v7703_v32, %v8803_v31  ;;  %v974_v62 = vmul.f32 0.01, %v910_v47  ;;  %v908_v63 = vadd.f32 %v8809_v34, %v869_v49  ;;  %vm942_vm5 = vcmp.gt.f32.partialorder %v910_v47, 0.0 }
  0xef   : > { %v774_v35 = vpop.f32.mrf.mxu0  ;;  %v903_v32 = vadd.f32 %v8809_v34, %v864_v14 }
  0xf0   : > { %v913_v36 = vadd.f32 %v8809_v34, %v874_v33  ;;  %v872_v37 = vmul.f32 %v8803_v31, %v774_v35  ;;  %v972_v10 = vmul.f32 0.01, %v908_v63  ;;  %v1006_v11 = vsel %vm942_vm5, %v910_v47, %v974_v62 }
  0xf1   : > { %v7704_v39 = vpop.f32.mrf.mxu0  ;;  %vm940_vm7 = vcmp.gt.f32.partialorder %v908_v63, 0.0  ;;  %v1160_v23 = vpack.c.bf16 %v1006_v11, %v1005_v16  ;;  %v1003_v33 = vsel %vm939_vm8, %v907_v4, %v971_v15  ;;  %vm935_vm12 = vcmp.gt.f32.partialorder %v903_v32, 0.0 }
  0xf2   : > { %v875_v40 = vmul.f32 %v7704_v39, %v8803_v31  ;;  %v911_v43 = vadd.f32 %v8809_v34, %v872_v37  ;;  %v977_v46 = vmul.f32 0.01, %v913_v36  ;;  %vm945_vm1 = vcmp.gt.f32.partialorder %v913_v36, 0.0 }
  0xf3   : > { %v777_v42 = vpop.f32.mrf.mxu0  ;;  %v1004_v28 = vsel %vm940_vm7, %v908_v63, %v972_v10  ;;  %v861_v37 = vmul.f32 %v8803_v31, %v8796_v22  ;;  %v1002_v39 = vsel %vm938_vm9, %v906_v8, %v970_v26  ;;  %v1000_v47 = vsel %vm936_vm11, %v904_v27, %v968_v38 }
  0xf4   : > { %v914_v44 = vadd.f32 %v8809_v34, %v875_v40  ;;  %v873_v45 = vmul.f32 %v8803_v31, %v777_v42  ;;  %v975_v55 = vmul.f32 0.01, %v911_v43  ;;  %v1009_v57 = vsel %vm945_vm1, %v913_v36, %v977_v46 }
  0xf5   : > { %v8820_v48 = vpop.f32.mrf.mxu0  ;;  %vm943_vm3 = vcmp.gt.f32.partialorder %v911_v43, 0.0  ;;  %v1159_v21 = vpack.c.bf16 %v1004_v28, %v1003_v33  ;;  %v902_v36 = vadd.f32 %v8809_v34, %v863_v25  ;;  %v967_v42 = vmul.f32 0.01, %v903_v32 }
  0xf6   : > { %v912_v50 = vadd.f32 %v8809_v34, %v873_v45  ;;  %vm946_vm2 = vcmp.gt.f32.partialorder %v914_v44, 0.0  ;;  %v978_v51 = vmul.f32 0.01, %v914_v44  ;;  %v1007_v5 = vsel %vm943_vm3, %v911_v43, %v975_v55 }
  0xf7   : > { %v8826_v54 = vpop.f32.mrf.mxu0  ;;  %v1001_v43 = vsel %vm937_vm10, %v905_v13, %v969_v30  ;;  %v966_v46 = vmul.f32 0.01, %v902_v36  ;;  %v900_v22 = vadd.f32 %v8809_v34, %v861_v37  ;;  %vm934_vm13 = vcmp.gt.f32.partialorder %v902_v36, 0.0 }
  0xf8   : > { %v976_v56 = vmul.f32 0.01, %v912_v50  ;;  %v1010_v58 = vsel %vm946_vm2, %v914_v44, %v978_v51  ;;  %vm944_vm4 = vcmp.gt.f32.partialorder %v912_v50, 0.0  ;;  %v1158_v45 = vpack.c.bf16 %v1002_v39, %v1001_v43 }
  0xf9   : > { %v8828_v59 = vpop.f32.mrf.mxu0  ;;  %v1162_v60 = vpack.c.bf16 %v1010_v58, %v1009_v57  ;;  %v899_v51 = vadd.f32 %v8809_v34, %v860_v41  ;;  %v999_v20 = vsel %vm935_vm12, %v903_v32, %v967_v42  ;;  %v964_v55 = vmul.f32 0.01, %v900_v22 }
  0xfa   : > { %v1008_v1 = vsel %vm944_vm4, %v912_v50, %v976_v56  ;;  %v965_v50 = vmul.f32 0.01, %v901_v19  ;;  %v1157_v53 = vpack.c.bf16 %v1000_v47, %v999_v20  ;;  %v998_v57 = vsel %vm934_vm13, %v902_v36, %v966_v46 }
  0xfb   : > { %v8832_v0 = vpop.f32.mrf.mxu0  ;;  %1812 = vmatpush1.bf16.msra.mxu1 %v1162_v60  ;;  %v1161_v7 = vpack.c.bf16 %v1008_v1, %v1007_v5  ;;  %vm932_vm15 = vcmp.gt.f32.partialorder %v900_v22, 0.0  ;;  %v963_v60 = vmul.f32 0.01, %v899_v51  ;;  %vm931_vm1 = vcmp.gt.f32.partialorder %v899_v51, 0.0 }
  0xfc   : > { %1813 = vmatprep.subr.bf16.mxu1 %v8647_v17  ;;  %v997_v63 = vsel %vm933_vm14, %v901_v19, %v965_v50  ;;  %v996_v5 = vsel %vm932_vm15, %v900_v22, %v964_v55  ;;  %v879_v50 = vmul.f32 %v8828_v59, %v8803_v31  ;;  %v877_v59 = vmul.f32 %v8803_v31, %v8832_v0 }
  0xfd   : > { %v8837_v6 = vpop.f32.mrf.mxu0  ;;  %v1156_v3 = vpack.c.bf16 %v998_v57, %v997_v63  ;;  %v995_v14 = vsel %vm931_vm1, %v899_v51, %v963_v60 }
  0xfe   : > { %v1155_v16 = vpack.c.bf16 %v996_v5, %v995_v14  ;;  %v882_v39 = vmul.f32 %v8837_v6, %v8803_v31  ;;  %v918_v57 = vadd.f32 %v8809_v34, %v879_v50  ;;  %v8350_v50 = vld [vmem:[%s10251_s4 + $0xf0] ss:$8 sps:$4 sm:$0xff]  }
  0xff   : > { %v8841_v12 = vpop.f32.mrf.mxu0  ;;  %1814 = vmatpush1.bf16.msra.mxu1 %v1161_v7 }
 0x100   : > { %1815 = vmatprep.subr.bf16.mxu1 %v8647_v17  ;;  %v921_v46 = vadd.f32 %v8809_v34, %v882_v39  ;;  %v880_v6 = vmul.f32 %v8803_v31, %v8841_v12  ;;  %vm950_vm14 = vcmp.gt.f32.partialorder %v918_v57, 0.0  ;;  %v8330_v39 = vld [vmem:[%s10251_s4 + $0x94] ss:$8 sps:$4 sm:$0xff]  }
 0x101   : > { %v8847_v18 = vpop.f32.mrf.mxu0 }
 0x102   : > { %v919_v12 = vadd.f32 %v8809_v34, %v880_v6  ;;  %vm953_vm11 = vcmp.gt.f32.partialorder %v921_v46, 0.0  ;;  %v8345_v6 = vld [vmem:[%s10251_s4 + $0xe4] ss:$8 sps:$4 sm:$0xff]  }
 0x103   : > { %v8852_v29 = vpop.f32.mrf.mxu0  ;;  %1816 = vmatpush1.bf16.msra.mxu1 %v1160_v23 }
 0x104   : > { %1817 = vmatprep.subr.bf16.mxu1 %v8647_v17  ;;  %vm951_vm13 = vcmp.gt.f32.partialorder %v919_v12, 0.0 }
 0x105   : > { %v7715_v35 = vpop.f32.mrf.mxu0 }
 0x106   : > { %v886_v7 = vmul.f32 %v7715_v35, %v8803_v31 }
 0x107   : > { %v822_v40 = vpop.f32.mrf.mxu0  ;;  %1818 = vmatpush1.bf16.msra.mxu1 %v1159_v21  ;;  %v883_v21 = vmul.f32 %v8847_v18, %v8803_v31  ;;  %v881_v18 = vmul.f32 %v8803_v31, %v8852_v29 }
 0x108   : > { %1819 = vmatprep.subr.bf16.mxu1 %v8647_v17  ;;  %v925_v27 = vadd.f32 %v8809_v34, %v886_v7  ;;  %v884_v28 = vmul.f32 %v8803_v31, %v822_v40 }
 0x109   : > { %v7716_v44 = vpop.f32.mrf.mxu0  ;;  %v922_v43 = vadd.f32 %v8809_v34, %v883_v21  ;;  %v920_v29 = vadd.f32 %v8809_v34, %v881_v18  ;;  %v8324_v21 = vld [vmem:[%s10251_s4 + $0x74] ss:$8 sps:$4 sm:$0xff]   ;;  %v8339_v18 = vld [vmem:[%s10251_s4 + $0xc4] ss:$8 sps:$4 sm:$0xff]  }
 0x10a   : > { %v887_v1 = vmul.f32 %v7716_v44, %v8803_v31  ;;  %v989_v40 = vmul.f32 0.01, %v925_v27  ;;  %v923_v19 = vadd.f32 %v8809_v34, %v884_v28  ;;  %vm957_vm7 = vcmp.gt.f32.partialorder %v925_v27, 0.0  ;;  %v8315_v28 = vld [vmem:[%s10251_s4 + $0x44] ss:$8 sps:$4 sm:$0xff]  }
 0x10b   : > { %v825_v49 = vpop.f32.mrf.mxu0  ;;  %1820 = vmatpush1.bf16.msra.mxu1 %v1158_v45  ;;  %v986_v51 = vmul.f32 0.01, %v922_v43  ;;  %vm954_vm10 = vcmp.gt.f32.partialorder %v922_v43, 0.0  ;;  %vm952_vm12 = vcmp.gt.f32.partialorder %v920_v29, 0.0 }
 0x10c   : > { %1821 = vmatprep.subr.bf16.mxu1 %v8647_v17  ;;  %v926_v15 = vadd.f32 %v8809_v34, %v887_v1  ;;  %v885_v23 = vmul.f32 %v8803_v31, %v825_v49  ;;  %v987_v22 = vmul.f32 0.01, %v923_v19  ;;  %v1021_v47 = vsel %vm957_vm7, %v925_v27, %v989_v40  ;;  %v8314_v27 = vld [vmem:[%s10251_s4 + $0x30] ss:$8 sps:$4 sm:$0xff]  }
 0x10d   : > { %v7719_v52 = vpop.f32.mrf.mxu0  ;;  %vm955_vm9 = vcmp.gt.f32.partialorder %v923_v19, 0.0  ;;  %v1018_v60 = vsel %vm954_vm10, %v922_v43, %v986_v51  ;;  %v8332_v40 = vld [vmem:[%s10251_s4 + $0x90] ss:$8 sps:$4 sm:$0xff]   ;;  %v8351_v51 = vld [vmem:[%s10251_s4 + $0x104] ss:$8 sps:$4 sm:$0xff]  }
 0x10e   : > { %v890_v56 = vmul.f32 %v7719_v52, %v8803_v31  ;;  %v990_v36 = vmul.f32 0.01, %v926_v15  ;;  %v924_v37 = vadd.f32 %v8809_v34, %v885_v23  ;;  %vm958_vm6 = vcmp.gt.f32.partialorder %v926_v15, 0.0  ;;  %v8308_v23 = vld [vmem:[%s10251_s4 + $0x10] ss:$8 sps:$4 sm:$0xff]  }
 0x10f   : > { %v838_v58 = vpop.f32.mrf.mxu0  ;;  %1822 = vmatpush1.bf16.msra.mxu1 %v1157_v53  ;;  %v878_v52 = vmul.f32 %v8820_v48, %v8803_v31  ;;  %v985_v53 = vmul.f32 0.01, %v921_v46  ;;  %v1019_v55 = vsel %vm955_vm9, %v923_v19, %v987_v22  ;;  %v876_v48 = vmul.f32 %v8803_v31, %v8826_v54  ;;  %v8333_v19 = vld [vmem:[%s10251_s4 + $0xa4] ss:$8 sps:$4 sm:$0xff]   ;;  %v8338_v43 = vld [vmem:[%s10251_s4 + $0xb0] ss:$8 sps:$4 sm:$0xff]  }
 0x110   : > { %v929_v61 = vadd.f32 %v8809_v34, %v890_v56  ;;  %v888_v62 = vmul.f32 %v8803_v31, %v838_v58  ;;  %1823 = vmatprep.subr.bf16.mxu1 %v8647_v17  ;;  %v988_v44 = vmul.f32 0.01, %v924_v37  ;;  %v1022_v45 = vsel %vm958_vm6, %v926_v15, %v990_v36  ;;  %v8303_v15 = vld [vmem:[%s10251_s4] ss:$8 sps:$4 sm:$0xff]   ;;  %v8326_v36 = vld [vmem:[%s10251_s4 + $0x70] ss:$8 sps:$4 sm:$0xff]  }
 0x111   : > { %v7720_v2 = vpop.f32.mrf.mxu0  ;;  %vm956_vm8 = vcmp.gt.f32.partialorder %v924_v37, 0.0  ;;  %v1168_v49 = vpack.c.bf16 %v1022_v45, %v1021_v47  ;;  %v984_v58 = vmul.f32 0.01, %v920_v29  ;;  %v1017_v63 = vsel %vm953_vm11, %v921_v46, %v985_v53  ;;  %v8342_v45 = vld [vmem:[%s10251_s4 + $0xd4] ss:$8 sps:$4 sm:$0xff]   ;;  %v8393_v22 = vld [vmem:[%s10252_s5 + $0x8] sm:$0xff]  }
 0x112   : > { %v891_v4 = vmul.f32 %v7720_v2, %v8803_v31  ;;  %v927_v8 = vadd.f32 %v8809_v34, %v888_v62  ;;  %v993_v10 = vmul.f32 0.01, %v929_v61  ;;  %vm961_vm2 = vcmp.gt.f32.partialorder %v929_v61, 0.0  ;;  %v8344_v46 = vld [vmem:[%s10251_s4 + $0xd0] ss:$8 sps:$4 sm:$0xff]   ;;  %7721 = vmatprep.subr.bf16.mxu0 %v8393_v22 }
 0x113   : > { %v841_v9 = vpop.f32.mrf.mxu0  ;;  %1824 = vmatpush1.bf16.msra.mxu1 %v1156_v3  ;;  %v1020_v20 = vsel %vm956_vm8, %v924_v37, %v988_v44  ;;  %v983_v62 = vmul.f32 0.01, %v919_v12  ;;  %v1166_v1 = vpack.c.bf16 %v1018_v60, %v1017_v63  ;;  %v982_v2 = vmul.f32 0.01, %v918_v57  ;;  %v8327_v37 = vld [vmem:[%s10251_s4 + $0x84] ss:$8 sps:$4 sm:$0xff]   ;;  %7722 = vmatpush3.bf16.msra.mxu0 %v8393_v22 }
 0x114   : > { %v930_v11 = vadd.f32 %v8809_v34, %v891_v4  ;;  %v889_v13 = vmul.f32 %v8803_v31, %v841_v9  ;;  %1825 = vmatprep.subr.bf16.mxu1 %v8647_v17  ;;  %v991_v24 = vmul.f32 0.01, %v927_v8  ;;  %v1025_v32 = vsel %vm961_vm2, %v929_v61, %v993_v10  ;;  %v8341_v44 = vld [vmem:[%s10251_s4 + $0xc0] ss:$8 sps:$4 sm:$0xff]   ;;  %v8356_v53 = vld [vmem:[%s10251_s4 + $0x110] ss:$8 sps:$4 sm:$0xff]  }
 0x115   : > { %vm959_vm5 = vcmp.gt.f32.partialorder %v927_v8, 0.0  ;;  %v1167_v56 = vpack.c.bf16 %v1020_v20, %v1019_v55  ;;  %v917_v61 = vadd.f32 %v8809_v34, %v878_v52  ;;  %v916_v3 = vadd.f32 %v8809_v34, %v877_v59  ;;  %v8347_v47 = vld [vmem:[%s10251_s4 + $0xe0] ss:$8 sps:$4 sm:$0xff]   ;;  %v8354_v20 = vld [vmem:[%s10251_s4 + $0x114] ss:$8 sps:$4 sm:$0xff]  }
 0x116   : > { %vm962_vm3 = vcmp.gt.f32.partialorder %v930_v11, 0.0  ;;  %v994_v25 = vmul.f32 0.01, %v930_v11  ;;  %v928_v26 = vadd.f32 %v8809_v34, %v889_v13  ;;  %v1023_v41 = vsel %vm959_vm5, %v927_v8, %v991_v24  ;;  %v8317_v24 = vld [vmem:[%s10251_s4 + $0x40] ss:$8 sps:$4 sm:$0xff]  }
 0x117   : > { %1826 = vmatpush1.bf16.msra.mxu1 %v1155_v16  ;;  %v1016_v4 = vsel %vm952_vm12, %v920_v29, %v984_v58  ;;  %v981_v0 = vmul.f32 0.01, %v917_v61  ;;  %v915_v5 = vadd.f32 %v8809_v34, %v876_v48  ;;  %v1015_v7 = vsel %vm951_vm13, %v919_v12, %v983_v62  ;;  %v8306_v16 = vld [vmem:[%s10251_s4 + $0x14] ss:$8 sps:$4 sm:$0xff]   ;;  %v8353_v29 = vld [vmem:[%s10251_s4 + $0x100] ss:$8 sps:$4 sm:$0xff]  }
 0x118   : > { %v992_v30 = vmul.f32 0.01, %v928_v26  ;;  %1827 = vmatprep.subr.bf16.mxu1 %v8647_v17  ;;  %v1026_v33 = vsel %vm962_vm3, %v930_v11, %v994_v25  ;;  %vm960_vm4 = vcmp.gt.f32.partialorder %v928_v26, 0.0  ;;  %vm949_vm15 = vcmp.gt.f32.partialorder %v917_v61, 0.0  ;;  %v8311_v25 = vld [vmem:[%s10251_s4 + $0x20] ss:$8 sps:$4 sm:$0xff]  }
 0x119   : > { %v1170_v35 = vpack.c.bf16 %v1026_v33, %v1025_v32  ;;  %v1165_v31 = vpack.c.bf16 %v1016_v4, %v1015_v7  ;;  %v980_v54 = vmul.f32 0.01, %v916_v3  ;;  %v1014_v8 = vsel %vm950_vm14, %v918_v57, %v982_v2  ;;  %v8320_v32 = vld [vmem:[%s10251_s4 + $0x50] ss:$8 sps:$4 sm:$0xff]   ;;  %v8321_v33 = vld [vmem:[%s10251_s4 + $0x64] ss:$8 sps:$4 sm:$0xff]  }
 0x11a   : > { %v1024_v38 = vsel %vm960_vm4, %v928_v26, %v992_v30  ;;  %vm948_vm1 = vcmp.gt.f32.partialorder %v916_v3, 0.0  ;;  %v979_v9 = vmul.f32 0.01, %v915_v5  ;;  %v1013_v10 = vsel %vm949_vm15, %v917_v61, %v981_v0  ;;  %v8312_v26 = vld [vmem:[%s10251_s4 + $0x34] ss:$8 sps:$4 sm:$0xff]   ;;  %v9026_v52 = vld [vmem:[%s10252_s5] sm:$0xff]  }
 0x11b   : > { %1828 = vmatpush2.bf16.msra.mxu1 %v1170_v35  ;;  %v1169_v42 = vpack.c.bf16 %v1024_v38, %v1023_v41  ;;  %vm947_vm2 = vcmp.gt.f32.partialorder %v915_v5, 0.0  ;;  %v1164_v11 = vpack.c.bf16 %v1014_v8, %v1013_v10  ;;  %v1012_v13 = vsel %vm948_vm1, %v916_v3, %v980_v54  ;;  %v8318_v30 = vld [vmem:[%s10251_s4 + $0x54] ss:$8 sps:$4 sm:$0xff]   ;;  %v8323_v35 = vld [vmem:[%s10251_s4 + $0x60] ss:$8 sps:$4 sm:$0xff]   ;;  %7731 = vmatprep.subr.bf16.mxu0 %v9026_v52 }
 0x11c   : > { %1829 = vmatprep.subr.bf16.mxu1 %v8647_v17  ;;  %v1011_v34 = vsel %vm947_vm2, %v915_v5, %v979_v9  ;;  %v8329_v38 = vld [vmem:[%s10251_s4 + $0x80] ss:$8 sps:$4 sm:$0xff]   ;;  %v8357_v12 = vld [vmem:[%s10251_s4 + $0x124] ss:$8 sps:$4 sm:$0xff]   ;;  %v8362_v57 = vld [vmem:[%s10251_s4 + $0x130] ss:$8 sps:$4 sm:$0xff]  }
 0x11d   : > { %v1163_v14 = vpack.c.bf16 %v1012_v13, %v1011_v34  ;;  %v8335_v41 = vld [vmem:[%s10251_s4 + $0xa0] ss:$8 sps:$4 sm:$0xff]   ;;  %v8363_v59 = vld [vmem:[%s10251_s4 + $0x144] ss:$8 sps:$4 sm:$0xff]   ;;  %v8366_v60 = vld [vmem:[%s10251_s4 + $0x154] ss:$8 sps:$4 sm:$0xff]  }
 0x11e   : > { %v8359_v55 = vld [vmem:[%s10251_s4 + $0x120] ss:$8 sps:$4 sm:$0xff]   ;;  %v8368_v61 = vld [vmem:[%s10251_s4 + $0x150] ss:$8 sps:$4 sm:$0xff]   ;;  %v8369_v48 = vld [vmem:[%s10251_s4 + $0x164] ss:$8 sps:$4 sm:$0xff]  }
 0x11f   : > { %1830 = vmatpush2.bf16.msra.mxu1 %v1169_v42  ;;  %v8336_v42 = vld [vmem:[%s10251_s4 + $0xb4] ss:$8 sps:$4 sm:$0xff]   ;;  %v8365_v58 = vld [vmem:[%s10251_s4 + $0x140] ss:$8 sps:$4 sm:$0xff]   ;;  %v8375_v2 = vld [vmem:[%s10251_s4 + $0x184] ss:$8 sps:$4 sm:$0xff]  }
 0x120   : > { %1831 = vmatprep.subr.bf16.mxu1 %v8647_v17  ;;  %v8371_v62 = vld [vmem:[%s10251_s4 + $0x160] ss:$8 sps:$4 sm:$0xff]   ;;  %v8372_v63 = vld [vmem:[%s10251_s4 + $0x174] ss:$8 sps:$4 sm:$0xff]   ;;  %v8381_v54 = vld [vmem:[%s10251_s4 + $0x1a4] ss:$8 sps:$4 sm:$0xff]  }
 0x121   : > { %v8377_v3 = vld [vmem:[%s10251_s4 + $0x180] ss:$8 sps:$4 sm:$0xff]   ;;  %v8378_v4 = vld [vmem:[%s10251_s4 + $0x194] ss:$8 sps:$4 sm:$0xff]   ;;  %vm4062_vm3 = vcmask 523264   ;;  %vm8649_vm12 = vmmov 0  }
 0x122   : > { %v8383_v13 = vld [vmem:[%s10251_s4 + $0x1a0] ss:$8 sps:$4 sm:$0xff]   ;;  %v8384_v34 = vld [vmem:[%s10251_s4 + $0x1b4] ss:$8 sps:$4 sm:$0xff]   ;;  %vm4364_vm13 = vcmask 261120  }
 0x123   : > { %1832 = vmatpush2.bf16.msra.mxu1 %v1168_v49  ;;  %v8348_v49 = vld [vmem:[%s10251_s4 + $0xf4] ss:$8 sps:$4 sm:$0xff]  }
 0x124   : > { %1833 = vmatprep.subr.bf16.mxu1 %v8647_v17 }
 0x127   : > { %1834 = vmatpush2.bf16.msra.mxu1 %v1167_v56  ;;  %v8360_v56 = vld [vmem:[%s10251_s4 + $0x134] ss:$8 sps:$4 sm:$0xff]  }
 0x128   : > { %1835 = vmatprep.subr.bf16.mxu1 %v8647_v17 }
 0x12b   : > { %1836 = vmatpush2.bf16.msra.mxu1 %v1166_v1  ;;  %v8374_v1 = vld [vmem:[%s10251_s4 + $0x170] ss:$8 sps:$4 sm:$0xff]  }
 0x12c   : > { %1837 = vmatprep.subr.bf16.mxu1 %v8647_v17 }
 0x12f   : > { %1838 = vmatpush2.bf16.msra.mxu1 %v1165_v31  ;;  %v8380_v31 = vld [vmem:[%s10251_s4 + $0x190] ss:$8 sps:$4 sm:$0xff]  }
 0x130   : > { %1839 = vmatprep.subr.bf16.mxu1 %v8647_v17 }
 0x133   : > { %1840 = vmatpush2.bf16.msra.mxu1 %v1164_v11 }
 0x134   : > { %1841 = vmatprep.subr.bf16.mxu1 %v8647_v17  ;;  %v8309_v17 = vld [vmem:[%s10251_s4 + $0x24] ss:$8 sps:$4 sm:$0xff]  }
 0x137   : > { %1842 = vmatpush2.bf16.msra.mxu1 %v1163_v14 }
 0x13a   : > { %1844 = vmatmul.mubr.bf16.vlgmr.msra.gmra.mxu1 %v8303_v15 }
 0x13b   : > { %1851 = vmatprep.mubr.bf16.mxu1 %v8306_v16 }
 0x142   : > { %1852 = vmatmul.mubr.bf16.gmra.mxu1 %v8308_v23 }
 0x143   : > { %1859 = vmatprep.mubr.bf16.mxu1 %v8309_v17  ;;  %v8386_v17 = vld [vmem:[%s10251_s4 + $0x1b0] ss:$8 sps:$4 sm:$0xff]  }
 0x14a   : > { %1860 = vmatmul.mubr.bf16.gmra.mxu1 %v8311_v25  ;;  %v8389_v25 = vld [vmem:[%s10251_s4 + $0x1c4] ss:$8 sps:$4 sm:$0xff]  }
 0x14b   : > { %1867 = vmatprep.mubr.bf16.mxu1 %v8312_v26 }
 0x152   : > { %1868 = vmatmul.mubr.bf16.gmra.mxu1 %v8314_v27 }
 0x153   : > { %1875 = vmatprep.mubr.bf16.mxu1 %v8315_v28 }
 0x15a   : > { %1876 = vmatmul.mubr.bf16.gmra.mxu1 %v8317_v24 }
 0x15b   : > { %1883 = vmatprep.mubr.bf16.mxu1 %v8318_v30  ;;  %v8387_v30 = vld [vmem:[%s10251_s4 + $0x1c0] ss:$8 sps:$4 sm:$0xff]  }
 0x162   : > { %1884 = vmatmul.mubr.bf16.gmra.mxu1 %v8320_v32  ;;  %v8392_v32 = vld [vmem:[%s10251_s4 + $0x1d4] ss:$8 sps:$4 sm:$0xff]  }
 0x163   : > { %1891 = vmatprep.mubr.bf16.mxu1 %v8321_v33 }
 0x16a   : > { %1892 = vmatmul.mubr.bf16.gmra.mxu1 %v8323_v35 }
 0x16b   : > { %1899 = vmatprep.mubr.bf16.mxu1 %v8324_v21 }
 0x172   : > { %1900 = vmatmul.mubr.bf16.gmra.mxu1 %v8326_v36 }
 0x173   : > { %1907 = vmatprep.mubr.bf16.mxu1 %v8327_v37  ;;  %v8390_v37 = vld [vmem:[%s10251_s4 + $0x1d0] ss:$8 sps:$4 sm:$0xff]  }
 0x17a   : > { %1908 = vmatmul.mubr.bf16.gmra.mxu1 %v8329_v38 }
 0x17b   : > { %1915 = vmatprep.mubr.bf16.mxu1 %v8330_v39  ;;  %v8396_v39 = vld [vmem:[%s10251_s4 + $0x1e4] ss:$8 sps:$4 sm:$0xff]  }
 0x182   : > { %1916 = vmatmul.mubr.bf16.gmra.mxu1 %v8332_v40 }
 0x183   : > { %1923 = vmatprep.mubr.bf16.mxu1 %v8333_v19 }
 0x18a   : > { %1924 = vmatmul.mubr.bf16.gmra.mxu1 %v8335_v41 }
 0x18b   : > { %1931 = vmatprep.mubr.bf16.mxu1 %v8336_v42 }
 0x192   : > { %1932 = vmatmul.mubr.bf16.gmra.mxu1 %v8338_v43  ;;  %v8394_v43 = vld [vmem:[%s10251_s4 + $0x1e0] ss:$8 sps:$4 sm:$0xff]  }
 0x193   : > { %1939 = vmatprep.mubr.bf16.mxu1 %v8339_v18 }
 0x19a   : > { %1940 = vmatmul.mubr.bf16.gmra.mxu1 %v8341_v44  ;;  %v8399_v44 = vld [vmem:[%s10251_s4 + $0x1f4] ss:$8 sps:$4 sm:$0xff]  }
 0x19b   : > { %1947 = vmatprep.mubr.bf16.mxu1 %v8342_v45  ;;  %v8410_v45 = vld [vmem:[%s10252_s5 + $0x10] sm:$0xff]  }
 0x1a2   : > { %1948 = vmatmul.mubr.bf16.gmra.mxu1 %v8344_v46 }
 0x1a3   : > { %1955 = vmatprep.mubr.bf16.mxu1 %v8345_v6 }
 0x1aa   : > { %1956 = vmatmul.mubr.bf16.gmra.mxu1 %v8347_v47 }
 0x1ab   : > { %1963 = vmatprep.mubr.bf16.mxu1 %v8348_v49  ;;  %v8397_v49 = vld [vmem:[%s10251_s4 + $0x1f0] ss:$8 sps:$4 sm:$0xff]  }
 0x1b2   : > { %1964 = vmatmul.mubr.bf16.gmra.mxu1 %v8350_v50 }
 0x1b3   : > { %1971 = vmatprep.mubr.bf16.mxu1 %v8351_v51  ;;  %v8402_v51 = vld [vmem:[%s10251_s4 + $0x204] ss:$8 sps:$4 sm:$0xff]  }
 0x1ba   : > { %1972 = vmatmul.mubr.bf16.gmra.mxu1 %v8353_v29 }
 0x1bb   : > { %1979 = vmatprep.mubr.bf16.mxu1 %v8354_v20 }
 0x1c2   : > { %1980 = vmatmul.mubr.bf16.gmra.mxu1 %v8356_v53 }
 0x1c3   : > { %1987 = vmatprep.mubr.bf16.mxu1 %v8357_v12  ;;  %v8400_v12 = vld [vmem:[%s10251_s4 + $0x200] ss:$8 sps:$4 sm:$0xff]  }
 0x1ca   : > { %1988 = vmatmul.mubr.bf16.gmra.mxu1 %v8359_v55 }
 0x1cb   : > { %1995 = vmatprep.mubr.bf16.mxu1 %v8360_v56  ;;  %v8406_v56 = vld [vmem:[%s10251_s4 + $0x214] ss:$8 sps:$4 sm:$0xff]  }
 0x1d2   : > { %1996 = vmatmul.mubr.bf16.gmra.mxu1 %v8362_v57 }
 0x1d3   : > { %2003 = vmatprep.mubr.bf16.mxu1 %v8363_v59 }
 0x1da   : > { %2004 = vmatmul.mubr.bf16.gmra.mxu1 %v8365_v58 }
 0x1db   : > { %2011 = vmatprep.mubr.bf16.mxu1 %v8366_v60 }
 0x1e2   : > { %2012 = vmatmul.mubr.bf16.gmra.mxu1 %v8368_v61 }
 0x1e3   : > { %2019 = vmatprep.mubr.bf16.mxu1 %v8369_v48  ;;  %v8404_v48 = vld [vmem:[%s10251_s4 + $0x210] ss:$8 sps:$4 sm:$0xff]  }
 0x1ea   : > { %2020 = vmatmul.mubr.bf16.gmra.mxu1 %v8371_v62 }
 0x1eb   : > { %2027 = vmatprep.mubr.bf16.mxu1 %v8372_v63  ;;  %v8409_v63 = vld [vmem:[%s10251_s4 + $0x224] ss:$8 sps:$4 sm:$0xff]  }
 0x1f2   : > { %2028 = vmatmul.mubr.bf16.gmra.mxu1 %v8374_v1 }
 0x1f3   : > { %2035 = vmatprep.mubr.bf16.mxu1 %v8375_v2 }
 0x1fa   : > { %v9077_v0 = vpop.f32.mrf.mxu1  ;;  %2036 = vmatmul.mubr.bf16.gmra.mxu1 %v8377_v3  ;;  %v8420_v3 = vld [vmem:[%s10252_s5 + $0x18] sm:$0xff]  }
 0x1fb   : > { %2043 = vmatprep.mubr.bf16.mxu1 %v8378_v4 }
 0x1fc   : > { %v1847_v5 = vpop.f32.mrf.mxu1 }
 0x1fe   : > { %v9079_v7 = vpop.f32.mrf.mxu1 }
 0x1ff   : > { %v2356_v57 = vpack.c.bf16 %v9079_v7, %v9077_v0  ;;  %v8407_v7 = vld [vmem:[%s10251_s4 + $0x220] ss:$8 sps:$4 sm:$0xff]  }
 0x200   : > { %v1850_v8 = vpop.f32.mrf.mxu1 }
 0x202   : > { %v9087_v9 = vpop.f32.mrf.mxu1  ;;  %2044 = vmatmul.mubr.bf16.gmra.mxu1 %v8380_v31 }
 0x203   : > { %2051 = vmatprep.mubr.bf16.mxu1 %v8381_v54  ;;  %v8413_v54 = vld [vmem:[%s10251_s4 + $0x234] ss:$8 sps:$4 sm:$0xff]  }
 0x204   : > { %v1855_v10 = vpop.f32.mrf.mxu1 }
 0x206   : > { %v9089_v11 = vpop.f32.mrf.mxu1 }
 0x207   : > { %v2357_v62 = vpack.c.bf16 %v9089_v11, %v9087_v9 }
 0x208   : > { %v1858_v14 = vpop.f32.mrf.mxu1 }
 0x20a   : > { %v9097_v15 = vpop.f32.mrf.mxu1  ;;  %2052 = vmatmul.mubr.bf16.gmra.mxu1 %v8383_v13 }
 0x20b   : > { %2059 = vmatprep.mubr.bf16.mxu1 %v8384_v34  ;;  %v8411_v34 = vld [vmem:[%s10251_s4 + $0x230] ss:$8 sps:$4 sm:$0xff]  }
 0x20c   : > { %v1863_v16 = vpop.f32.mrf.mxu1 }
 0x20d   : > { %v8416_v16 = vld [vmem:[%s10251_s4 + $0x244] ss:$8 sps:$4 sm:$0xff]  }
 0x20e   : > { %v9099_v23 = vpop.f32.mrf.mxu1 }
 0x20f   : > { %v2358_v1 = vpack.c.bf16 %v9099_v23, %v9097_v15 }
 0x210   : > { %v1866_v26 = vpop.f32.mrf.mxu1 }
 0x212   : > { %v9107_v27 = vpop.f32.mrf.mxu1  ;;  %2060 = vmatmul.mubr.bf16.gmra.mxu1 %v8386_v17  ;;  %v8433_v17 = vld [vmem:[%s10252_s5 + $0x20] sm:$0xff]  }
 0x213   : > { %2067 = vmatprep.mubr.bf16.mxu1 %v8389_v25 }
 0x214   : > { %v1871_v28 = vpop.f32.mrf.mxu1 }
 0x215   : > { %v8414_v28 = vld [vmem:[%s10251_s4 + $0x240] ss:$8 sps:$4 sm:$0xff]  }
 0x216   : > { %v9109_v24 = vpop.f32.mrf.mxu1 }
 0x217   : > { %v2359_v31 = vpack.c.bf16 %v9109_v24, %v9107_v27 }
 0x218   : > { %v1874_v33 = vpop.f32.mrf.mxu1 }
 0x21a   : > { %v1877_v35 = vpop.f32.mrf.mxu1  ;;  %2068 = vmatmul.mubr.bf16.gmra.mxu1 %v8387_v30  ;;  %v8419_v30 = vld [vmem:[%s10251_s4 + $0x254] ss:$8 sps:$4 sm:$0xff]  }
 0x21b   : > { %2075 = vmatprep.mubr.bf16.mxu1 %v8392_v32 }
 0x21c   : > { %v1879_v21 = vpop.f32.mrf.mxu1 }
 0x21e   : > { %v1880_v36 = vpop.f32.mrf.mxu1 }
 0x21f   : > { %v2360_v38 = vpack.c.bf16 %v1880_v36, %v1877_v35  ;;  %v8417_v36 = vld [vmem:[%s10251_s4 + $0x250] ss:$8 sps:$4 sm:$0xff]  }
 0x220   : > { %v1882_v40 = vpop.f32.mrf.mxu1 }
 0x221   : > { %7723 = vmatprep.mubr.msk.bf16.mxu0 %vm643_vm0, %v2360_v38  ;;  %v8423_v38 = vld [vmem:[%s10251_s4 + $0x264] ss:$8 sps:$4 sm:$0xff]  }
 0x222   : > { %v1885_v19 = vpop.f32.mrf.mxu1  ;;  %2076 = vmatmul.mubr.bf16.gmra.mxu1 %v8390_v37 }
 0x223   : > { %2083 = vmatprep.mubr.bf16.mxu1 %v8396_v39 }
 0x224   : > { %v1887_v41 = vpop.f32.mrf.mxu1 }
 0x226   : > { %v1888_v42 = vpop.f32.mrf.mxu1 }
 0x227   : > { %v2361_v18 = vpack.c.bf16 %v1888_v42, %v1885_v19  ;;  %v8421_v42 = vld [vmem:[%s10251_s4 + $0x260] ss:$8 sps:$4 sm:$0xff]  }
 0x228   : > { %v1890_v46 = vpop.f32.mrf.mxu1 }
 0x229   : > { %7724 = vmatmul.mubr.msk.bf16.vlgmr.msra.gmra.mxu0 %vm643_vm0, %v2361_v18  ;;  %v8426_v18 = vld [vmem:[%s10251_s4 + $0x274] ss:$8 sps:$4 sm:$0xff]  }
 0x22a   : > { %v1893_v6 = vpop.f32.mrf.mxu1  ;;  %2084 = vmatmul.mubr.bf16.gmra.mxu1 %v8394_v43  ;;  %7732 = vmatpush3.bf16.msra.mxu0 %v9026_v52 }
 0x22b   : > { %2091 = vmatprep.mubr.bf16.mxu1 %v8399_v44  ;;  %7741 = vmatprep.subr.bf16.mxu0 %v8410_v45  ;;  %v8446_v44 = vld [vmem:[%s10252_s5 + $0x28] sm:$0xff]  }
 0x22c   : > { %v1895_v22 = vpop.f32.mrf.mxu1 }
 0x22e   : > { %v1896_v47 = vpop.f32.mrf.mxu1 }
 0x22f   : > { %v2362_v50 = vpack.c.bf16 %v1896_v47, %v1893_v6  ;;  %v8424_v47 = vld [vmem:[%s10251_s4 + $0x270] ss:$8 sps:$4 sm:$0xff]  }
 0x230   : > { %v1898_v29 = vpop.f32.mrf.mxu1 }
 0x231   : > { %7727 = vmatprep.mubr.msk.bf16.mxu0 %vm643_vm0, %v2362_v50  ;;  %v8429_v50 = vld [vmem:[%s10251_s4 + $0x284] ss:$8 sps:$4 sm:$0xff]  }
 0x232   : > { %v1901_v20 = vpop.f32.mrf.mxu1  ;;  %2092 = vmatmul.mubr.bf16.gmra.mxu1 %v8397_v49 }
 0x233   : > { %2099 = vmatprep.mubr.bf16.mxu1 %v8402_v51 }
 0x234   : > { %v1903_v52 = vpop.f32.mrf.mxu1 }
 0x236   : > { %v1904_v53 = vpop.f32.mrf.mxu1 }
 0x237   : > { %v2363_v55 = vpack.c.bf16 %v1904_v53, %v1901_v20  ;;  %v8427_v53 = vld [vmem:[%s10251_s4 + $0x280] ss:$8 sps:$4 sm:$0xff]  }
 0x238   : > { %v1906_v59 = vpop.f32.mrf.mxu1 }
 0x239   : > { %7728 = vmatmul.mubr.msk.bf16.gmra.mxu0 %vm643_vm0, %v2363_v55  ;;  %v8432_v55 = vld [vmem:[%s10251_s4 + $0x294] ss:$8 sps:$4 sm:$0xff]  }
 0x23a   : > { %v1909_v58 = vpop.f32.mrf.mxu1  ;;  %2100 = vmatmul.mubr.bf16.gmra.mxu1 %v8400_v12  ;;  %7733 = vmatprep.mubr.msk.bf16.mxu0 %vm643_vm0, %v2356_v57 }
 0x23b   : > { %2107 = vmatprep.mubr.bf16.mxu1 %v8406_v56 }
 0x23c   : > { %v1911_v60 = vpop.f32.mrf.mxu1 }
 0x23d   : > { %v8430_v60 = vld [vmem:[%s10251_s4 + $0x290] ss:$8 sps:$4 sm:$0xff]  }
 0x23e   : > { %v1912_v61 = vpop.f32.mrf.mxu1 }
 0x23f   : > { %v2364_v8 = vpack.c.bf16 %v1912_v61, %v1909_v58 }
 0x240   : > { %v1914_v2 = vpop.f32.mrf.mxu1 }
 0x241   : > { %7734 = vmatmul.mubr.msk.bf16.vlgmr.msra.gmra.mxu0 %vm643_vm0, %v2357_v62 }
 0x242   : > { %v1917_v4 = vpop.f32.mrf.mxu1  ;;  %2108 = vmatmul.mubr.bf16.gmra.mxu1 %v8404_v48  ;;  %7737 = vmatprep.mubr.msk.bf16.mxu0 %vm643_vm0, %v2358_v1  ;;  %v8436_v48 = vld [vmem:[%s10251_s4 + $0x2a4] ss:$8 sps:$4 sm:$0xff]  }
 0x243   : > { %2115 = vmatprep.mubr.bf16.mxu1 %v8409_v63  ;;  %7742 = vmatpush3.bf16.msra.mxu0 %v8410_v45 }
 0x244   : > { %v1919_v0 = vpop.f32.mrf.mxu1  ;;  %7751 = vmatprep.subr.bf16.mxu0 %v8420_v3 }
 0x245   : > { %v8439_v0 = vld [vmem:[%s10251_s4 + $0x2b4] ss:$8 sps:$4 sm:$0xff]  }
 0x246   : > { %v1920_v5 = vpop.f32.mrf.mxu1 }
 0x247   : > { %v2365_v14 = vpack.c.bf16 %v1920_v5, %v1917_v4  ;;  %v8459_v5 = vld [vmem:[%s10252_s5 + $0x30] sm:$0xff]  }
 0x248   : > { %v1922_v9 = vpop.f32.mrf.mxu1 }
 0x249   : > { %7738 = vmatmul.mubr.msk.bf16.gmra.mxu0 %vm643_vm0, %v2359_v31  ;;  %v8437_v9 = vld [vmem:[%s10251_s4 + $0x2b0] ss:$8 sps:$4 sm:$0xff]  }
 0x24a   : > { %v1925_v10 = vpop.f32.mrf.mxu1  ;;  %2116 = vmatmul.mubr.bf16.gmra.mxu1 %v8407_v7  ;;  %7743 = vmatprep.mubr.msk.bf16.mxu0 %vm643_vm0, %v2364_v8 }
 0x24b   : > { %2123 = vmatprep.mubr.bf16.mxu1 %v8413_v54 }
 0x24c   : > { %v1927_v11 = vpop.f32.mrf.mxu1 }
 0x24d   : > { %v8442_v11 = vld [vmem:[%s10251_s4 + $0x2c4] ss:$8 sps:$4 sm:$0xff]  }
 0x24e   : > { %v1928_v13 = vpop.f32.mrf.mxu1 }
 0x24f   : > { %v2366_v15 = vpack.c.bf16 %v1928_v13, %v1925_v10 }
 0x250   : > { %v1930_v23 = vpop.f32.mrf.mxu1 }
 0x251   : > { %7744 = vmatmul.mubr.msk.bf16.vlgmr.msra.gmra.mxu0 %vm643_vm0, %v2365_v14 }
 0x252   : > { %v1933_v25 = vpop.f32.mrf.mxu1  ;;  %2124 = vmatmul.mubr.bf16.gmra.mxu1 %v8411_v34  ;;  %7747 = vmatprep.mubr.msk.bf16.mxu0 %vm643_vm0, %v2366_v15 }
 0x253   : > { %2131 = vmatprep.mubr.bf16.mxu1 %v8416_v16  ;;  %7752 = vmatpush3.bf16.msra.mxu0 %v8420_v3  ;;  %v8434_v3 = vld [vmem:[%s10251_s4 + $0x2a0] ss:$8 sps:$4 sm:$0xff]  }
 0x254   : > { %v1935_v26 = vpop.f32.mrf.mxu1  ;;  %7761 = vmatprep.subr.bf16.mxu0 %v8433_v17  ;;  %v8440_v16 = vld [vmem:[%s10251_s4 + $0x2c0] ss:$8 sps:$4 sm:$0xff]  }
 0x256   : > { %v1936_v27 = vpop.f32.mrf.mxu1 }
 0x257   : > { %v2367_v24 = vpack.c.bf16 %v1936_v27, %v1933_v25 }
 0x258   : > { %v1938_v32 = vpop.f32.mrf.mxu1 }
 0x259   : > { %7748 = vmatmul.mubr.msk.bf16.gmra.mxu0 %vm643_vm0, %v2367_v24  ;;  %v8443_v24 = vld [vmem:[%s10251_s4 + $0x2d0] ss:$8 sps:$4 sm:$0xff]   ;;  %v8449_v32 = vld [vmem:[%s10251_s4 + $0x2e4] ss:$8 sps:$4 sm:$0xff]  }
 0x25a   : > { %v1941_v33 = vpop.f32.mrf.mxu1  ;;  %2132 = vmatmul.mubr.bf16.gmra.mxu1 %v8414_v28 }
 0x25b   : > { %2139 = vmatprep.mubr.bf16.mxu1 %v8419_v30 }
 0x25c   : > { %v1943_v35 = vpop.f32.mrf.mxu1 }
 0x25e   : > { %v1944_v21 = vpop.f32.mrf.mxu1 }
 0x25f   : > { %v2368_v37 = vpack.c.bf16 %v1944_v21, %v1941_v33 }
 0x260   : > { %v1946_v39 = vpop.f32.mrf.mxu1 }
 0x261   : > { %7753 = vmatprep.mubr.msk.bf16.mxu0 %vm643_vm0, %v2368_v37  ;;  %v8447_v37 = vld [vmem:[%s10251_s4 + $0x2e0] ss:$8 sps:$4 sm:$0xff]   ;;  %v8452_v39 = vld [vmem:[%s10251_s4 + $0x2f4] ss:$8 sps:$4 sm:$0xff]  }
 0x262   : > { %v1949_v40 = vpop.f32.mrf.mxu1  ;;  %2140 = vmatmul.mubr.bf16.gmra.mxu1 %v8417_v36 }
 0x263   : > { %2147 = vmatprep.mubr.bf16.mxu1 %v8423_v38 }
 0x264   : > { %v1951_v19 = vpop.f32.mrf.mxu1 }
 0x266   : > { %v1952_v41 = vpop.f32.mrf.mxu1 }
 0x267   : > { %v2369_v43 = vpack.c.bf16 %v1952_v41, %v1949_v40  ;;  %v8472_v40 = vld [vmem:[%s10252_s5 + $0x38] sm:$0xff]  }
 0x268   : > { %v1954_v45 = vpop.f32.mrf.mxu1 }
 0x269   : > { %7754 = vmatmul.mubr.msk.bf16.vlgmr.msra.gmra.mxu0 %vm643_vm0, %v2369_v43  ;;  %v8455_v45 = vld [vmem:[%s10251_s4 + $0x304] ss:$8 sps:$4 sm:$0xff]  }
 0x26a   : > { %v1957_v46 = vpop.f32.mrf.mxu1  ;;  %2148 = vmatmul.mubr.bf16.gmra.mxu1 %v8421_v42  ;;  %7762 = vmatpush3.bf16.msra.mxu0 %v8433_v17  ;;  %v8445_v17 = vld [vmem:[%s10251_s4 + $0x2d4] ss:$8 sps:$4 sm:$0xff]  }
 0x26b   : > { %2155 = vmatprep.mubr.bf16.mxu1 %v8426_v18  ;;  %7771 = vmatprep.subr.bf16.mxu0 %v8446_v44  ;;  %v8450_v18 = vld [vmem:[%s10251_s4 + $0x2f0] ss:$8 sps:$4 sm:$0xff]  }
 0x26c   : > { %v1959_v6 = vpop.f32.mrf.mxu1 }
 0x26e   : > { %v1960_v22 = vpop.f32.mrf.mxu1 }
 0x26f   : > { %v2370_v49 = vpack.c.bf16 %v1960_v22, %v1957_v46 }
 0x270   : > { %v1962_v51 = vpop.f32.mrf.mxu1 }
 0x271   : > { %7757 = vmatprep.mubr.msk.bf16.mxu0 %vm643_vm0, %v2370_v49  ;;  %v8453_v49 = vld [vmem:[%s10251_s4 + $0x300] ss:$8 sps:$4 sm:$0xff]   ;;  %v8458_v51 = vld [vmem:[%s10251_s4 + $0x314] ss:$8 sps:$4 sm:$0xff]  }
 0x272   : > { %v1965_v29 = vpop.f32.mrf.mxu1  ;;  %2156 = vmatmul.mubr.bf16.gmra.mxu1 %v8424_v47 }
 0x273   : > { %2163 = vmatprep.mubr.bf16.mxu1 %v8429_v50 }
 0x274   : > { %v1967_v20 = vpop.f32.mrf.mxu1 }
 0x276   : > { %v1968_v52 = vpop.f32.mrf.mxu1 }
 0x277   : > { %v2371_v12 = vpack.c.bf16 %v1968_v52, %v1965_v29 }
 0x278   : > { %v1970_v56 = vpop.f32.mrf.mxu1 }
 0x279   : > { %7758 = vmatmul.mubr.msk.bf16.gmra.mxu0 %vm643_vm0, %v2371_v12  ;;  %v8456_v12 = vld [vmem:[%s10251_s4 + $0x310] ss:$8 sps:$4 sm:$0xff]   ;;  %v8462_v56 = vld [vmem:[%s10251_s4 + $0x324] ss:$8 sps:$4 sm:$0xff]  }
 0x27a   : > { %v1973_v57 = vpop.f32.mrf.mxu1  ;;  %2164 = vmatmul.mubr.bf16.gmra.mxu1 %v8427_v53 }
 0x27b   : > { %2171 = vmatprep.mubr.bf16.mxu1 %v8432_v55 }
 0x27c   : > { %v1975_v59 = vpop.f32.mrf.mxu1 }
 0x27e   : > { %v1976_v58 = vpop.f32.mrf.mxu1 }
 0x27f   : > { %v2372_v61 = vpack.c.bf16 %v1976_v58, %v1973_v57 }
 0x280   : > { %v1978_v62 = vpop.f32.mrf.mxu1 }
 0x281   : > { %7763 = vmatprep.mubr.msk.bf16.mxu0 %vm643_vm0, %v2372_v61  ;;  %v8460_v61 = vld [vmem:[%s10251_s4 + $0x320] ss:$8 sps:$4 sm:$0xff]   ;;  %v8465_v62 = vld [vmem:[%s10251_s4 + $0x334] ss:$8 sps:$4 sm:$0xff]  }
 0x282   : > { %v1981_v63 = vpop.f32.mrf.mxu1  ;;  %2172 = vmatmul.mubr.bf16.gmra.mxu1 %v8430_v60 }
 0x283   : > { %2179 = vmatprep.mubr.bf16.mxu1 %v8436_v48 }
 0x284   : > { %v1983_v1 = vpop.f32.mrf.mxu1 }
 0x286   : > { %v1984_v2 = vpop.f32.mrf.mxu1 }
 0x287   : > { %v2373_v4 = vpack.c.bf16 %v1984_v2, %v1981_v63  ;;  %v8485_v63 = vld [vmem:[%s10252_s5 + $0x40] sm:$0xff]  }
 0x288   : > { %v1986_v7 = vpop.f32.mrf.mxu1 }
 0x289   : > { %7764 = vmatmul.mubr.msk.bf16.vlgmr.msra.gmra.mxu0 %vm643_vm0, %v2373_v4  ;;  %v8468_v7 = vld [vmem:[%s10251_s4 + $0x344] ss:$8 sps:$4 sm:$0xff]  }
 0x28a   : > { %v1989_v31 = vpop.f32.mrf.mxu1  ;;  %2180 = vmatmul.mubr.bf16.gmra.mxu1 %v8434_v3  ;;  %7772 = vmatpush3.bf16.msra.mxu0 %v8446_v44 }
 0x28b   : > { %2187 = vmatprep.mubr.bf16.mxu1 %v8439_v0  ;;  %7781 = vmatprep.subr.bf16.mxu0 %v8459_v5  ;;  %v8463_v0 = vld [vmem:[%s10251_s4 + $0x330] ss:$8 sps:$4 sm:$0xff]  }
 0x28c   : > { %v1991_v54 = vpop.f32.mrf.mxu1 }
 0x28e   : > { %v1992_v8 = vpop.f32.mrf.mxu1 }
 0x28f   : > { %v2374_v10 = vpack.c.bf16 %v1992_v8, %v1989_v31 }
 0x290   : > { %v1994_v13 = vpop.f32.mrf.mxu1 }
 0x291   : > { %7767 = vmatprep.mubr.msk.bf16.mxu0 %vm643_vm0, %v2374_v10  ;;  %v8466_v10 = vld [vmem:[%s10251_s4 + $0x340] ss:$8 sps:$4 sm:$0xff]   ;;  %v8471_v13 = vld [vmem:[%s10251_s4 + $0x354] ss:$8 sps:$4 sm:$0xff]  }
 0x292   : > { %v1997_v34 = vpop.f32.mrf.mxu1  ;;  %2188 = vmatmul.mubr.bf16.gmra.mxu1 %v8437_v9 }
 0x293   : > { %2195 = vmatprep.mubr.bf16.mxu1 %v8442_v11 }
 0x294   : > { %v1999_v14 = vpop.f32.mrf.mxu1 }
 0x296   : > { %v2000_v15 = vpop.f32.mrf.mxu1 }
 0x297   : > { %v2375_v23 = vpack.c.bf16 %v2000_v15, %v1997_v34 }
 0x298   : > { %v2002_v25 = vpop.f32.mrf.mxu1 }
 0x299   : > { %7768 = vmatmul.mubr.msk.bf16.gmra.mxu0 %vm643_vm0, %v2375_v23  ;;  %v8469_v23 = vld [vmem:[%s10251_s4 + $0x350] ss:$8 sps:$4 sm:$0xff]   ;;  %v8475_v25 = vld [vmem:[%s10251_s4 + $0x364] ss:$8 sps:$4 sm:$0xff]  }
 0x29a   : > { %v2005_v26 = vpop.f32.mrf.mxu1  ;;  %2196 = vmatmul.mubr.bf16.gmra.mxu1 %v8440_v16 }
 0x29b   : > { %2203 = vmatprep.mubr.bf16.mxu1 %v8445_v17 }
 0x29c   : > { %v2007_v27 = vpop.f32.mrf.mxu1 }
 0x29e   : > { %v2008_v28 = vpop.f32.mrf.mxu1 }
 0x29f   : > { %v2376_v30 = vpack.c.bf16 %v2008_v28, %v2005_v26 }
 0x2a0   : > { %v2010_v33 = vpop.f32.mrf.mxu1 }
 0x2a1   : > { %7773 = vmatprep.mubr.msk.bf16.mxu0 %vm643_vm0, %v2376_v30  ;;  %v8473_v30 = vld [vmem:[%s10251_s4 + $0x360] ss:$8 sps:$4 sm:$0xff]   ;;  %v8478_v33 = vld [vmem:[%s10251_s4 + $0x374] ss:$8 sps:$4 sm:$0xff]  }
 0x2a2   : > { %v2013_v35 = vpop.f32.mrf.mxu1  ;;  %2204 = vmatmul.mubr.bf16.gmra.mxu1 %v8443_v24 }
 0x2a3   : > { %2211 = vmatprep.mubr.bf16.mxu1 %v8449_v32 }
 0x2a4   : > { %v2015_v21 = vpop.f32.mrf.mxu1 }
 0x2a6   : > { %v2016_v36 = vpop.f32.mrf.mxu1 }
 0x2a7   : > { %v2377_v38 = vpack.c.bf16 %v2016_v36, %v2013_v35  ;;  %v9335_v35 = vld [vmem:[%s10252_s5 + $0x48] sm:$0xff]  }
 0x2a8   : > { %v2018_v19 = vpop.f32.mrf.mxu1 }
 0x2a9   : > { %7774 = vmatmul.mubr.msk.bf16.vlgmr.msra.gmra.mxu0 %vm643_vm0, %v2377_v38 }
 0x2aa   : > { %v2021_v41 = vpop.f32.mrf.mxu1  ;;  %2212 = vmatmul.mubr.bf16.gmra.mxu1 %v8447_v37  ;;  %7782 = vmatpush3.bf16.msra.mxu0 %v8459_v5 }
 0x2ab   : > { %2219 = vmatprep.mubr.bf16.mxu1 %v8452_v39  ;;  %7791 = vmatprep.subr.bf16.mxu0 %v8472_v40 }
 0x2ac   : > { %v2023_v42 = vpop.f32.mrf.mxu1 }
 0x2ad   : > { %v8481_v42 = vld [vmem:[%s10251_s4 + $0x384] ss:$8 sps:$4 sm:$0xff]  }
 0x2ae   : > { %v2024_v43 = vpop.f32.mrf.mxu1 }
 0x2af   : > { %v2378_v44 = vpack.c.bf16 %v2024_v43, %v2021_v41 }
 0x2b0   : > { %v2026_v46 = vpop.f32.mrf.mxu1 }
 0x2b1   : > { %7777 = vmatprep.mubr.msk.bf16.mxu0 %vm643_vm0, %v2378_v44 }
 0x2b2   : > { %v2029_v6 = vpop.f32.mrf.mxu1  ;;  %2220 = vmatmul.mubr.bf16.gmra.mxu1 %v8450_v18 }
 0x2b3   : > { %2227 = vmatprep.mubr.bf16.mxu1 %v8455_v45 }
 0x2b4   : > { %v2031_v22 = vpop.f32.mrf.mxu1 }
 0x2b6   : > { %v2032_v47 = vpop.f32.mrf.mxu1 }
 0x2b7   : > { %v2379_v50 = vpack.c.bf16 %v2032_v47, %v2029_v6  ;;  %v8479_v6 = vld [vmem:[%s10251_s4 + $0x380] ss:$8 sps:$4 sm:$0xff]  }
 0x2b8   : > { %v2034_v29 = vpop.f32.mrf.mxu1 }
 0x2b9   : > { %7778 = vmatmul.mubr.msk.bf16.gmra.mxu0 %vm643_vm0, %v2379_v50 }
 0x2ba   : > { %v2037_v20 = vpop.f32.mrf.mxu1  ;;  %2228 = vmatmul.mubr.bf16.gmra.mxu1 %v8453_v49  ;;  %v8484_v49 = vld [vmem:[%s10251_s4 + $0x394] ss:$8 sps:$4 sm:$0xff]  }
 0x2bb   : > { %2235 = vmatprep.mubr.bf16.mxu1 %v8458_v51 }
 0x2bc   : > { %v2039_v52 = vpop.f32.mrf.mxu1 }
 0x2be   : > { %v2040_v53 = vpop.f32.mrf.mxu1 }
 0x2bf   : > { %v2380_v55 = vpack.c.bf16 %v2040_v53, %v2037_v20 }
 0x2c0   : > { %v2042_v57 = vpop.f32.mrf.mxu1 }
 0x2c1   : > { %7783 = vmatprep.mubr.msk.bf16.mxu0 %vm643_vm0, %v2380_v55  ;;  %v8482_v55 = vld [vmem:[%s10251_s4 + $0x390] ss:$8 sps:$4 sm:$0xff]  }
 0x2c2   : > { %v2045_v59 = vpop.f32.mrf.mxu1  ;;  %2236 = vmatmul.mubr.bf16.gmra.mxu1 %v8456_v12 }
 0x2c3   : > { %2243 = vmatprep.mubr.bf16.mxu1 %v8462_v56 }
 0x2c4   : > { %v2047_v58 = vpop.f32.mrf.mxu1 }
 0x2c6   : > { %v2048_v60 = vpop.f32.mrf.mxu1 }
 0x2c7   : > { %v2381_v48 = vpack.c.bf16 %v2048_v60, %v2045_v59  ;;  %v8488_v59 = vld [vmem:[%s10251_s4 + $0x3a4] ss:$8 sps:$4 sm:$0xff]  }
 0x2c8   : > { %v2050_v1 = vpop.f32.mrf.mxu1 }
 0x2c9   : > { %7784 = vmatmul.mubr.msk.bf16.vlgmr.msra.gmra.mxu0 %vm643_vm0, %v2381_v48 }
 0x2ca   : > { %v2053_v2 = vpop.f32.mrf.mxu1  ;;  %2244 = vmatmul.mubr.bf16.gmra.mxu1 %v8460_v61  ;;  %7792 = vmatpush3.bf16.msra.mxu0 %v8472_v40  ;;  %v8476_v40 = vld [vmem:[%s10251_s4 + $0x370] ss:$8 sps:$4 sm:$0xff]  }
 0x2cb   : > { %2251 = vmatprep.mubr.bf16.mxu1 %v8465_v62  ;;  %7801 = vmatprep.subr.bf16.mxu0 %v8485_v63 }
 0x2cc   : > { %v2055_v3 = vpop.f32.mrf.mxu1 }
 0x2ce   : > { %v2056_v4 = vpop.f32.mrf.mxu1 }
 0x2cf   : > { %v2382_v5 = vpack.c.bf16 %v2056_v4, %v2053_v2 }
 0x2d0   : > { %v2058_v31 = vpop.f32.mrf.mxu1 }
 0x2d1   : > { %7787 = vmatprep.mubr.msk.bf16.mxu0 %vm643_vm0, %v2382_v5  ;;  %v8491_v31 = vld [vmem:[%s10251_s4 + $0x3b4] ss:$8 sps:$4 sm:$0xff]  }
 0x2d2   : > { %v2061_v54 = vpop.f32.mrf.mxu1  ;;  %2252 = vmatmul.mubr.bf16.gmra.mxu1 %v8463_v0  ;;  %v8486_v0 = vld [vmem:[%s10251_s4 + $0x3a0] ss:$8 sps:$4 sm:$0xff]  }
 0x2d3   : > { %2259 = vmatprep.mubr.bf16.mxu1 %v8468_v7 }
 0x2d4   : > { %v2063_v8 = vpop.f32.mrf.mxu1 }
 0x2d6   : > { %v2064_v9 = vpop.f32.mrf.mxu1 }
 0x2d7   : > { %v2383_v11 = vpack.c.bf16 %v2064_v9, %v2061_v54  ;;  %v9375_v54 = vld [vmem:[%s10252_s5 + $0x50] sm:$0xff]  }
 0x2d8   : > { %v2066_v34 = vpop.f32.mrf.mxu1 }
 0x2d9   : > { %7788 = vmatmul.mubr.msk.bf16.gmra.mxu0 %vm643_vm0, %v2383_v11 }
 0x2da   : > { %v2069_v14 = vpop.f32.mrf.mxu1  ;;  %2260 = vmatmul.mubr.bf16.gmra.mxu1 %v8466_v10 }
 0x2db   : > { %2267 = vmatprep.mubr.bf16.mxu1 %v8471_v13 }
 0x2dc   : > { %v2071_v15 = vpop.f32.mrf.mxu1 }
 0x2de   : > { %v2072_v16 = vpop.f32.mrf.mxu1 }
 0x2df   : > { %v2384_v17 = vpack.c.bf16 %v2072_v16, %v2069_v14 }
 0x2e0   : > { %v2074_v26 = vpop.f32.mrf.mxu1 }
 0x2e1   : > { %7793 = vmatprep.mubr.msk.bf16.mxu0 %vm643_vm0, %v2384_v17  ;;  %v8489_v17 = vld [vmem:[%s10251_s4 + $0x3b0] ss:$8 sps:$4 sm:$0xff]  }
 0x2e2   : > { %v2077_v27 = vpop.f32.mrf.mxu1  ;;  %2268 = vmatmul.mubr.bf16.gmra.mxu1 %v8469_v23 }
 0x2e3   : > { %2275 = vmatprep.mubr.bf16.mxu1 %v8475_v25 }
 0x2e4   : > { %v2079_v28 = vpop.f32.mrf.mxu1 }
 0x2e6   : > { %v2080_v24 = vpop.f32.mrf.mxu1 }
 0x2e7   : > { %v2385_v32 = vpack.c.bf16 %v2080_v24, %v2077_v27  ;;  %v8494_v27 = vld [vmem:[%s10251_s4 + $0x3c4] ss:$8 sps:$4 sm:$0xff]  }
 0x2e8   : > { %v2082_v21 = vpop.f32.mrf.mxu1 }
 0x2e9   : > { %7794 = vmatmul.mubr.msk.bf16.vlgmr.msra.gmra.mxu0 %vm643_vm0, %v2385_v32  ;;  %v7725_v37 = vpop.f32.mrf.mxu0 }
 0x2ea   : > { %v2085_v36 = vpop.f32.mrf.mxu1  ;;  %2276 = vmatmul.mubr.bf16.gmra.mxu1 %v8473_v30  ;;  %7802 = vmatpush3.bf16.msra.mxu0 %v8485_v63 }
 0x2eb   : > { %2283 = vmatprep.mubr.bf16.mxu1 %v8478_v33  ;;  %7811 = vmatprep.subr.bf16.mxu0 %v9335_v35  ;;  %v2504_v19 = vpop.f32.mrf.mxu0 }
 0x2ec   : > { %v2087_v38 = vpop.f32.mrf.mxu1 }
 0x2ed   : > { %v7726_v44 = vpop.f32.mrf.mxu0 }
 0x2ee   : > { %v2088_v39 = vpop.f32.mrf.mxu1 }
 0x2ef   : > { %v2386_v41 = vpack.c.bf16 %v2088_v39, %v2085_v36  ;;  %v9349_v22 = vpop.f32.mrf.mxu0  ;;  %v8492_v39 = vld [vmem:[%s10251_s4 + $0x3c0] ss:$8 sps:$4 sm:$0xff]  }
 0x2f0   : > { %v2090_v43 = vpop.f32.mrf.mxu1 }
 0x2f1   : > { %7797 = vmatprep.mubr.msk.bf16.mxu0 %vm643_vm0, %v2386_v41  ;;  %v8497_v41 = vld [vmem:[%s10251_s4 + $0x3d4] ss:$8 sps:$4 sm:$0xff]  }
 0x2f2   : > { %v2093_v18 = vpop.f32.mrf.mxu1  ;;  %2284 = vmatmul.mubr.bf16.gmra.mxu1 %v8476_v40 }
 0x2f3   : > { %2291 = vmatprep.mubr.bf16.mxu1 %v8481_v42 }
 0x2f4   : > { %v2095_v45 = vpop.f32.mrf.mxu1 }
 0x2f6   : > { %v2096_v46 = vpop.f32.mrf.mxu1 }
 0x2f7   : > { %v2387_v47 = vpack.c.bf16 %v2096_v46, %v2093_v18 }
 0x2f8   : > { %v2098_v50 = vpop.f32.mrf.mxu1 }
 0x2f9   : > { %v7729_v51 = vpop.f32.mrf.mxu0  ;;  %7798 = vmatmul.mubr.msk.bf16.gmra.mxu0 %vm643_vm0, %v2387_v47 }
 0x2fa   : > { %v2101_v29 = vpop.f32.mrf.mxu1  ;;  %2292 = vmatmul.mubr.bf16.gmra.mxu1 %v8479_v6 }
 0x2fb   : > { %v2520_v20 = vpop.f32.mrf.mxu0  ;;  %2299 = vmatprep.mubr.bf16.mxu1 %v8484_v49 }
 0x2fc   : > { %v2103_v52 = vpop.f32.mrf.mxu1 }
 0x2fd   : > { %v7730_v53 = vpop.f32.mrf.mxu0 }
 0x2fe   : > { %v2104_v12 = vpop.f32.mrf.mxu1 }
 0x2ff   : > { %v2388_v56 = vpack.c.bf16 %v2104_v12, %v2101_v29  ;;  %v9358_v57 = vpop.f32.mrf.mxu0 }
 0x300   : > { %v2106_v58 = vpop.f32.mrf.mxu1 }
 0x301   : > { %v7735_v60 = vpop.f32.mrf.mxu0  ;;  %7803 = vmatprep.mubr.msk.bf16.mxu0 %vm643_vm0, %v2388_v56  ;;  %v8499_v56 = vld [vmem:[%s10251_s4 + $0x3e0] ss:$8 sps:$4 sm:$0xff]  }
 0x302   : > { %v2596_v61 = vadd.f32 %v7735_v60, %v7725_v37  ;;  %v2109_v48 = vpop.f32.mrf.mxu1  ;;  %2300 = vmatmul.mubr.bf16.gmra.mxu1 %v8482_v55  ;;  %v8504_v60 = vld [vmem:[%s10251_s4 + $0x3f4] ss:$8 sps:$4 sm:$0xff]  }
 0x303   : > { %v2587_v62 = vpop.f32.mrf.mxu0  ;;  %2307 = vmatprep.mubr.bf16.mxu1 %v8488_v59 }
 0x304   : > { %v2588_v63 = vadd.f32 %v2587_v62, %v2504_v19  ;;  %v2111_v1 = vpop.f32.mrf.mxu1 }
 0x305   : > { %v7736_v2 = vpop.f32.mrf.mxu0 }
 0x306   : > { %v2599_v3 = vadd.f32 %v7736_v2, %v7726_v44  ;;  %v2112_v4 = vpop.f32.mrf.mxu1 }
 0x307   : > { %v2389_v5 = vpack.c.bf16 %v2112_v4, %v2109_v48  ;;  %v9367_v7 = vpop.f32.mrf.mxu0 }
 0x308   : > { %v2114_v8 = vpop.f32.mrf.mxu1 }
 0x309   : > { %v7739_v9 = vpop.f32.mrf.mxu0  ;;  %7804 = vmatmul.mubr.msk.bf16.vlgmr.msra.gmra.mxu0 %vm643_vm0, %v2389_v5  ;;  %v8502_v8 = vld [vmem:[%s10251_s4 + $0x3f0] ss:$8 sps:$4 sm:$0xff]  }
 0x30a   : > { %v2612_v10 = vadd.f32 %v7739_v9, %v7729_v51  ;;  %v2117_v11 = vpop.f32.mrf.mxu1  ;;  %2308 = vmatmul.mubr.bf16.gmra.mxu1 %v8486_v0  ;;  %7812 = vmatpush3.bf16.msra.mxu0 %v9335_v35  ;;  %v8495_v51 = vld [vmem:[%s10251_s4 + $0x3d0] ss:$8 sps:$4 sm:$0xff]  }
 0x30b   : > { %v2603_v13 = vpop.f32.mrf.mxu0  ;;  %2315 = vmatprep.mubr.bf16.mxu1 %v8491_v31  ;;  %7821 = vmatprep.subr.bf16.mxu0 %v9375_v54 }
 0x30c   : > { %v2604_v34 = vadd.f32 %v2603_v13, %v2520_v20  ;;  %v2119_v14 = vpop.f32.mrf.mxu1  ;;  %v8501_v20 = vld [vmem:[%s10251_s4 + $0x3e4] ss:$8 sps:$4 sm:$0xff]  }
 0x30d   : > { %v7740_v15 = vpop.f32.mrf.mxu0 }
 0x30e   : > { %v2615_v16 = vadd.f32 %v7740_v15, %v7730_v53  ;;  %v2120_v23 = vpop.f32.mrf.mxu1 }
 0x30f   : > { %v2390_v25 = vpack.c.bf16 %v2120_v23, %v2117_v11  ;;  %v9383_v26 = vpop.f32.mrf.mxu0 }
 0x310   : > { %v2122_v28 = vpop.f32.mrf.mxu1 }
 0x311   : > { %v7745_v24 = vpop.f32.mrf.mxu0  ;;  %7807 = vmatprep.mubr.msk.bf16.mxu0 %vm643_vm0, %v2390_v25 }
 0x312   : > { %v2703_v30 = vadd.f32 %v7745_v24, %v2596_v61  ;;  %v2125_v32 = vpop.f32.mrf.mxu1  ;;  %2316 = vmatmul.mubr.bf16.gmra.mxu1 %v8489_v17  ;;  %v8506_v61 = vld [vmem:[%s10252_s5 + $0x58] sm:$0xff]  }
 0x313   : > { %v2670_v33 = vpop.f32.mrf.mxu0  ;;  %2323 = vmatprep.mubr.bf16.mxu1 %v8494_v27 }
 0x314   : > { %v2701_v35 = vadd.f32 %v2670_v33, %v2588_v63  ;;  %v2127_v21 = vpop.f32.mrf.mxu1 }
 0x315   : > { %v7746_v36 = vpop.f32.mrf.mxu0 }
 0x316   : > { %v2704_v37 = vadd.f32 %v7746_v36, %v2599_v3  ;;  %v2128_v38 = vpop.f32.mrf.mxu1 }
 0x317   : > { %v2391_v40 = vpack.c.bf16 %v2128_v38, %v2125_v32  ;;  %v9392_v19 = vpop.f32.mrf.mxu0 }
 0x318   : > { %v2130_v42 = vpop.f32.mrf.mxu1 }
 0x319   : > { %v7749_v43 = vpop.f32.mrf.mxu0  ;;  %7808 = vmatmul.mubr.msk.bf16.gmra.mxu0 %vm643_vm0, %v2391_v40  ;;  %v8507_v40 = vld [vmem:[%s10252_s5 + $0x60] sm:$0xff]  }
 0x31a   : > { %v2707_v18 = vadd.f32 %v7749_v43, %v2612_v10  ;;  %v2133_v44 = vpop.f32.mrf.mxu1  ;;  %2324 = vmatmul.mubr.bf16.gmra.mxu1 %v8492_v39 }
 0x31b   : > { %v2686_v45 = vpop.f32.mrf.mxu0  ;;  %2331 = vmatprep.mubr.bf16.mxu1 %v8497_v41 }
 0x31c   : > { %v2705_v46 = vadd.f32 %v2686_v45, %v2604_v34  ;;  %v2135_v6 = vpop.f32.mrf.mxu1 }
 0x31d   : > { %v7750_v47 = vpop.f32.mrf.mxu0 }
 0x31e   : > { %v2708_v49 = vadd.f32 %v7750_v47, %v2615_v16  ;;  %v2136_v50 = vpop.f32.mrf.mxu1 }
 0x31f   : > { %v2392_v29 = vpack.c.bf16 %v2136_v50, %v2133_v44  ;;  %v9408_v59 = vpop.f32.mrf.mxu0 }
 0x320   : > { %v2138_v52 = vpop.f32.mrf.mxu1 }
 0x321   : > { %7813 = vmatprep.mubr.msk.bf16.mxu0 %vm643_vm0, %v2392_v29 }
 0x322   : > { %v2141_v53 = vpop.f32.mrf.mxu1  ;;  %2332 = vmatmul.mubr.bf16.gmra.mxu1 %v8495_v51 }
 0x323   : > { %2339 = vmatprep.mubr.bf16.mxu1 %v8501_v20 }
 0x324   : > { %v2143_v12 = vpop.f32.mrf.mxu1 }
 0x326   : > { %v2144_v55 = vpop.f32.mrf.mxu1 }
 0x327   : > { %v2393_v58 = vpack.c.bf16 %v2144_v55, %v2141_v53 }
 0x328   : > { %v2146_v48 = vpop.f32.mrf.mxu1 }
 0x329   : > { %v7755_v62 = vpop.f32.mrf.mxu0  ;;  %7814 = vmatmul.mubr.msk.bf16.vlgmr.msra.gmra.mxu0 %vm643_vm0, %v2393_v58 }
 0x32a   : > { %v2794_v63 = vadd.f32 %v7755_v62, %v2703_v30  ;;  %v2149_v1 = vpop.f32.mrf.mxu1  ;;  %2340 = vmatmul.mubr.bf16.gmra.mxu1 %v8499_v56  ;;  %7822 = vmatpush3.bf16.msra.mxu0 %v9375_v54 }
 0x32b   : > { %v2761_v2 = vpop.f32.mrf.mxu0  ;;  %2347 = vmatprep.mubr.bf16.mxu1 %v8504_v60  ;;  %7831 = vmatprep.subr.bf16.mxu0 %v8506_v61 }
 0x32c   : > { %v2792_v3 = vadd.f32 %v2761_v2, %v2701_v35  ;;  %v2151_v4 = vpop.f32.mrf.mxu1 }
 0x32d   : > { %v7756_v0 = vpop.f32.mrf.mxu0 }
 0x32e   : > { %v2795_v5 = vadd.f32 %v7756_v0, %v2704_v37  ;;  %v2152_v31 = vpop.f32.mrf.mxu1 }
 0x32f   : > { %v2394_v9 = vpack.c.bf16 %v2152_v31, %v2149_v1  ;;  %v9422_v34 = vpop.f32.mrf.mxu0 }
 0x330   : > { %v2154_v10 = vpop.f32.mrf.mxu1 }
 0x331   : > { %7817 = vmatprep.mubr.msk.bf16.mxu0 %vm643_vm0, %v2394_v9  ;;  %v8508_v10 = vld [vmem:[%s10252_s5 + $0x68] sm:$0xff]  }
 0x332   : > { %v2157_v11 = vpop.f32.mrf.mxu1  ;;  %2348 = vmatmul.mubr.bf16.gmra.mxu1 %v8502_v8 }
 0x334   : > { %v2159_v13 = vpop.f32.mrf.mxu1 }
 0x336   : > { %v2160_v54 = vpop.f32.mrf.mxu1 }
 0x337   : > { %v2395_v14 = vpack.c.bf16 %v2160_v54, %v2157_v11 }
 0x338   : > { %v2162_v15 = vpop.f32.mrf.mxu1 }
 0x339   : > { %v7759_v16 = vpop.f32.mrf.mxu0  ;;  %7818 = vmatmul.mubr.msk.bf16.gmra.mxu0 %vm643_vm0, %v2395_v14 }
 0x33a   : > { %v2798_v23 = vadd.f32 %v7759_v16, %v2707_v18  ;;  %v2165_v17 = vpop.f32.mrf.mxu1 }
 0x33b   : > { %v2777_v25 = vpop.f32.mrf.mxu0 }
 0x33c   : > { %v2796_v27 = vadd.f32 %v2777_v25, %v2705_v46  ;;  %v2167_v28 = vpop.f32.mrf.mxu1 }
 0x33d   : > { %v7760_v24 = vpop.f32.mrf.mxu0 }
 0x33e   : > { %v2799_v30 = vadd.f32 %v7760_v24, %v2708_v49  ;;  %v2168_v32 = vpop.f32.mrf.mxu1 }
 0x33f   : > { %v2396_v33 = vpack.c.bf16 %v2168_v32, %v2165_v17  ;;  %v9426_v38 = vpop.f32.mrf.mxu0 }
 0x340   : > { %v2170_v35 = vpop.f32.mrf.mxu1 }
 0x341   : > { %7823 = vmatprep.mubr.msk.bf16.mxu0 %vm643_vm0, %v2396_v33 }
 0x342   : > { %v2173_v21 = vpop.f32.mrf.mxu1 }
 0x344   : > { %v2175_v36 = vpop.f32.mrf.mxu1 }
 0x346   : > { %v2176_v37 = vpop.f32.mrf.mxu1 }
 0x347   : > { %v2397_v39 = vpack.c.bf16 %v2176_v37, %v2173_v21 }
 0x348   : > { %v2178_v41 = vpop.f32.mrf.mxu1 }
 0x349   : > { %v7765_v42 = vpop.f32.mrf.mxu0  ;;  %7824 = vmatmul.mubr.msk.bf16.vlgmr.msra.gmra.mxu0 %vm643_vm0, %v2397_v39 }
 0x34a   : > { %v2885_v43 = vadd.f32 %v7765_v42, %v2794_v63  ;;  %v2181_v18 = vpop.f32.mrf.mxu1  ;;  %7832 = vmatpush3.bf16.msra.mxu0 %v8506_v61 }
 0x34b   : > { %v2852_v44 = vpop.f32.mrf.mxu0  ;;  %7841 = vmatprep.subr.bf16.mxu0 %v8507_v40 }
 0x34c   : > { %v2883_v45 = vadd.f32 %v2852_v44, %v2792_v3  ;;  %v2183_v46 = vpop.f32.mrf.mxu1 }
 0x34d   : > { %v7766_v6 = vpop.f32.mrf.mxu0 }
 0x34e   : > { %v2886_v47 = vadd.f32 %v7766_v6, %v2795_v5  ;;  %v2184_v49 = vpop.f32.mrf.mxu1 }
 0x34f   : > { %v2398_v50 = vpack.c.bf16 %v2184_v49, %v2181_v18  ;;  %v9433_v53 = vpop.f32.mrf.mxu0 }
 0x350   : > { %v2186_v51 = vpop.f32.mrf.mxu1 }
 0x351   : > { %7827 = vmatprep.mubr.msk.bf16.mxu0 %vm643_vm0, %v2398_v50 }
 0x352   : > { %v2189_v29 = vpop.f32.mrf.mxu1 }
 0x354   : > { %v2191_v20 = vpop.f32.mrf.mxu1 }
 0x355   : > { %v8509_v20 = vld [vmem:[%s10252_s5 + $0x70] sm:$0xff]  }
 0x356   : > { %v2192_v52 = vpop.f32.mrf.mxu1 }
 0x357   : > { %v2399_v12 = vpack.c.bf16 %v2192_v52, %v2189_v29 }
 0x358   : > { %v2194_v55 = vpop.f32.mrf.mxu1 }
 0x359   : > { %v7769_v56 = vpop.f32.mrf.mxu0  ;;  %7828 = vmatmul.mubr.msk.bf16.gmra.mxu0 %vm643_vm0, %v2399_v12 }
 0x35a   : > { %v2889_v58 = vadd.f32 %v7769_v56, %v2798_v23  ;;  %v2197_v60 = vpop.f32.mrf.mxu1 }
 0x35b   : > { %v2868_v61 = vpop.f32.mrf.mxu0 }
 0x35c   : > { %v2887_v48 = vadd.f32 %v2868_v61, %v2796_v27  ;;  %v2199_v62 = vpop.f32.mrf.mxu1 }
 0x35d   : > { %v7770_v63 = vpop.f32.mrf.mxu0 }
 0x35e   : > { %v2890_v1 = vadd.f32 %v7770_v63, %v2799_v30  ;;  %v2200_v2 = vpop.f32.mrf.mxu1 }
 0x35f   : > { %v2400_v3 = vpack.c.bf16 %v2200_v2, %v2197_v60  ;;  %v9437_v8 = vpop.f32.mrf.mxu0 }
 0x360   : > { %v2202_v4 = vpop.f32.mrf.mxu1 }
 0x361   : > { %7833 = vmatprep.mubr.msk.bf16.mxu0 %vm643_vm0, %v2400_v3 }
 0x362   : > { %v2205_v0 = vpop.f32.mrf.mxu1 }
 0x364   : > { %v2207_v5 = vpop.f32.mrf.mxu1 }
 0x366   : > { %v2208_v31 = vpop.f32.mrf.mxu1 }
 0x367   : > { %v2401_v9 = vpack.c.bf16 %v2208_v31, %v2205_v0 }
 0x368   : > { %v2210_v11 = vpop.f32.mrf.mxu1 }
 0x369   : > { %v7775_v13 = vpop.f32.mrf.mxu0  ;;  %7834 = vmatmul.mubr.msk.bf16.vlgmr.msra.gmra.mxu0 %vm643_vm0, %v2401_v9 }
 0x36a   : > { %v2976_v54 = vadd.f32 %v7775_v13, %v2885_v43  ;;  %v2213_v14 = vpop.f32.mrf.mxu1  ;;  %7842 = vmatpush3.bf16.msra.mxu0 %v8507_v40 }
 0x36b   : > { %v2943_v15 = vpop.f32.mrf.mxu0  ;;  %7851 = vmatprep.subr.bf16.mxu0 %v8508_v10 }
 0x36c   : > { %v2974_v16 = vadd.f32 %v2943_v15, %v2883_v45  ;;  %v2215_v23 = vpop.f32.mrf.mxu1 }
 0x36d   : > { %v7776_v17 = vpop.f32.mrf.mxu0 }
 0x36e   : > { %v2977_v25 = vadd.f32 %v7776_v17, %v2886_v47  ;;  %v2216_v27 = vpop.f32.mrf.mxu1 }
 0x36f   : > { %v2402_v28 = vpack.c.bf16 %v2216_v27, %v2213_v14  ;;  %v9444_v35 = vpop.f32.mrf.mxu0 }
 0x370   : > { %v2218_v24 = vpop.f32.mrf.mxu1 }
 0x371   : > { %7837 = vmatprep.mubr.msk.bf16.mxu0 %vm643_vm0, %v2402_v28 }
 0x372   : > { %v2221_v30 = vpop.f32.mrf.mxu1 }
 0x374   : > { %v2223_v32 = vpop.f32.mrf.mxu1 }
 0x376   : > { %v2224_v33 = vpop.f32.mrf.mxu1 }
 0x377   : > { %v2403_v21 = vpack.c.bf16 %v2224_v33, %v2221_v30 }
 0x378   : > { %v2226_v36 = vpop.f32.mrf.mxu1 }
 0x379   : > { %v7779_v37 = vpop.f32.mrf.mxu0  ;;  %7838 = vmatmul.mubr.msk.bf16.gmra.mxu0 %vm643_vm0, %v2403_v21  ;;  %v8510_v21 = vld [vmem:[%s10252_s5 + $0x78] sm:$0xff]  }
 0x37a   : > { %v2980_v39 = vadd.f32 %v7779_v37, %v2889_v58  ;;  %v2229_v40 = vpop.f32.mrf.mxu1 }
 0x37b   : > { %v2959_v41 = vpop.f32.mrf.mxu0 }
 0x37c   : > { %v2978_v42 = vadd.f32 %v2959_v41, %v2887_v48  ;;  %v2231_v43 = vpop.f32.mrf.mxu1 }
 0x37d   : > { %v7780_v18 = vpop.f32.mrf.mxu0 }
 0x37e   : > { %v2981_v44 = vadd.f32 %v7780_v18, %v2890_v1  ;;  %v2232_v45 = vpop.f32.mrf.mxu1 }
 0x37f   : > { %v2404_v46 = vpack.c.bf16 %v2232_v45, %v2229_v40  ;;  %v9448_v51 = vpop.f32.mrf.mxu0 }
 0x380   : > { %v2234_v6 = vpop.f32.mrf.mxu1 }
 0x381   : > { %7843 = vmatprep.mubr.msk.bf16.mxu0 %vm643_vm0, %v2404_v46 }
 0x382   : > { %v2237_v47 = vpop.f32.mrf.mxu1 }
 0x384   : > { %v2239_v49 = vpop.f32.mrf.mxu1 }
 0x386   : > { %v2240_v50 = vpop.f32.mrf.mxu1 }
 0x387   : > { %v2405_v29 = vpack.c.bf16 %v2240_v50, %v2237_v47 }
 0x388   : > { %v2242_v52 = vpop.f32.mrf.mxu1 }
 0x389   : > { %v7785_v12 = vpop.f32.mrf.mxu0  ;;  %7844 = vmatmul.mubr.msk.bf16.vlgmr.msra.gmra.mxu0 %vm643_vm0, %v2405_v29 }
 0x38a   : > { %v3067_v55 = vadd.f32 %v7785_v12, %v2976_v54  ;;  %v2245_v56 = vpop.f32.mrf.mxu1  ;;  %7852 = vmatpush3.bf16.msra.mxu0 %v8508_v10 }
 0x38b   : > { %v3034_v58 = vpop.f32.mrf.mxu0  ;;  %7861 = vmatprep.subr.bf16.mxu0 %v8509_v20 }
 0x38c   : > { %v3065_v60 = vadd.f32 %v3034_v58, %v2974_v16  ;;  %v2247_v61 = vpop.f32.mrf.mxu1 }
 0x38d   : > { %v7786_v48 = vpop.f32.mrf.mxu0 }
 0x38e   : > { %v3068_v62 = vadd.f32 %v7786_v48, %v2977_v25  ;;  %v2248_v63 = vpop.f32.mrf.mxu1 }
 0x38f   : > { %v2406_v1 = vpack.c.bf16 %v2248_v63, %v2245_v56  ;;  %v9455_v5 = vpop.f32.mrf.mxu0 }
 0x390   : > { %v2250_v2 = vpop.f32.mrf.mxu1 }
 0x391   : > { %7847 = vmatprep.mubr.msk.bf16.mxu0 %vm643_vm0, %v2406_v1 }
 0x392   : > { %v2253_v3 = vpop.f32.mrf.mxu1 }
 0x394   : > { %v2255_v4 = vpop.f32.mrf.mxu1 }
 0x396   : > { %v2256_v0 = vpop.f32.mrf.mxu1 }
 0x397   : > { %v2407_v31 = vpack.c.bf16 %v2256_v0, %v2253_v3 }
 0x398   : > { %v2258_v9 = vpop.f32.mrf.mxu1 }
 0x399   : > { %v7789_v11 = vpop.f32.mrf.mxu0  ;;  %7848 = vmatmul.mubr.msk.bf16.gmra.mxu0 %vm643_vm0, %v2407_v31 }
 0x39a   : > { %v3071_v10 = vadd.f32 %v7789_v11, %v2980_v39  ;;  %v2261_v13 = vpop.f32.mrf.mxu1 }
 0x39b   : > { %v3050_v54 = vpop.f32.mrf.mxu0 }
 0x39c   : > { %v3069_v14 = vadd.f32 %v3050_v54, %v2978_v42  ;;  %v2263_v15 = vpop.f32.mrf.mxu1 }
 0x39d   : > { %v7790_v16 = vpop.f32.mrf.mxu0 }
 0x39e   : > { %v3072_v23 = vadd.f32 %v7790_v16, %v2981_v44  ;;  %v2264_v17 = vpop.f32.mrf.mxu1 }
 0x39f   : > { %v2408_v25 = vpack.c.bf16 %v2264_v17, %v2261_v13  ;;  %v9459_v32 = vpop.f32.mrf.mxu0 }
 0x3a0   : > { %v2266_v27 = vpop.f32.mrf.mxu1 }
 0x3a1   : > { %7853 = vmatprep.mubr.msk.bf16.mxu0 %vm643_vm0, %v2408_v25 }
 0x3a2   : > { %v2269_v28 = vpop.f32.mrf.mxu1 }
 0x3a4   : > { %v2271_v24 = vpop.f32.mrf.mxu1 }
 0x3a6   : > { %v2272_v30 = vpop.f32.mrf.mxu1 }
 0x3a7   : > { %v2409_v33 = vpack.c.bf16 %v2272_v30, %v2269_v28 }
 0x3a8   : > { %v2274_v36 = vpop.f32.mrf.mxu1 }
 0x3a9   : > { %v7795_v37 = vpop.f32.mrf.mxu0  ;;  %7854 = vmatmul.mubr.msk.bf16.vlgmr.msra.gmra.mxu0 %vm643_vm0, %v2409_v33 }
 0x3aa   : > { %v3158_v39 = vadd.f32 %v7795_v37, %v3067_v55  ;;  %v2277_v40 = vpop.f32.mrf.mxu1  ;;  %7862 = vmatpush3.bf16.msra.mxu0 %v8509_v20 }
 0x3ab   : > { %v3125_v41 = vpop.f32.mrf.mxu0  ;;  %7871 = vmatprep.subr.bf16.mxu0 %v8510_v21 }
 0x3ac   : > { %v3156_v42 = vadd.f32 %v3125_v41, %v3065_v60  ;;  %v2279_v43 = vpop.f32.mrf.mxu1 }
 0x3ad   : > { %v7796_v18 = vpop.f32.mrf.mxu0 }
 0x3ae   : > { %v3159_v44 = vadd.f32 %v7796_v18, %v3068_v62  ;;  %v2280_v45 = vpop.f32.mrf.mxu1 }
 0x3af   : > { %v2410_v46 = vpack.c.bf16 %v2280_v45, %v2277_v40  ;;  %v9466_v29 = vpop.f32.mrf.mxu0 }
 0x3b0   : > { %v2282_v6 = vpop.f32.mrf.mxu1 }
 0x3b1   : > { %7857 = vmatprep.mubr.msk.bf16.mxu0 %vm643_vm0, %v2410_v46 }
 0x3b2   : > { %v2285_v47 = vpop.f32.mrf.mxu1 }
 0x3b4   : > { %v2287_v49 = vpop.f32.mrf.mxu1 }
 0x3b6   : > { %v2288_v50 = vpop.f32.mrf.mxu1 }
 0x3b7   : > { %v2411_v52 = vpack.c.bf16 %v2288_v50, %v2285_v47 }
 0x3b8   : > { %v2290_v12 = vpop.f32.mrf.mxu1 }
 0x3b9   : > { %v7799_v55 = vpop.f32.mrf.mxu0  ;;  %7858 = vmatmul.mubr.msk.bf16.gmra.mxu0 %vm643_vm0, %v2411_v52 }
 0x3ba   : > { %v3162_v20 = vadd.f32 %v7799_v55, %v3071_v10  ;;  %v2293_v56 = vpop.f32.mrf.mxu1 }
 0x3bb   : > { %v3141_v58 = vpop.f32.mrf.mxu0 }
 0x3bc   : > { %v3160_v60 = vadd.f32 %v3141_v58, %v3069_v14  ;;  %v2295_v61 = vpop.f32.mrf.mxu1 }
 0x3bd   : > { %v7800_v48 = vpop.f32.mrf.mxu0 }
 0x3be   : > { %v3163_v62 = vadd.f32 %v7800_v48, %v3072_v23  ;;  %v2296_v63 = vpop.f32.mrf.mxu1 }
 0x3bf   : > { %v2412_v1 = vpack.c.bf16 %v2296_v63, %v2293_v56  ;;  %v9470_v31 = vpop.f32.mrf.mxu0 }
 0x3c0   : > { %v2298_v2 = vpop.f32.mrf.mxu1 }
 0x3c1   : > { %7863 = vmatprep.mubr.msk.bf16.mxu0 %vm643_vm0, %v2412_v1 }
 0x3c2   : > { %v2301_v3 = vpop.f32.mrf.mxu1 }
 0x3c4   : > { %v2303_v4 = vpop.f32.mrf.mxu1 }
 0x3c6   : > { %v2304_v0 = vpop.f32.mrf.mxu1 }
 0x3c7   : > { %v2413_v9 = vpack.c.bf16 %v2304_v0, %v2301_v3 }
 0x3c8   : > { %v2306_v11 = vpop.f32.mrf.mxu1 }
 0x3c9   : > { %v7805_v13 = vpop.f32.mrf.mxu0  ;;  %7864 = vmatmul.mubr.msk.bf16.vlgmr.msra.gmra.mxu0 %vm643_vm0, %v2413_v9 }
 0x3ca   : > { %v3249_v10 = vadd.f32 %v7805_v13, %v3158_v39  ;;  %v2309_v54 = vpop.f32.mrf.mxu1  ;;  %7872 = vmatpush3.bf16.msra.mxu0 %v8510_v21 }
 0x3cb   : > { %v3216_v14 = vpop.f32.mrf.mxu0 }
 0x3cc   : > { %v3247_v15 = vadd.f32 %v3216_v14, %v3156_v42  ;;  %v2311_v16 = vpop.f32.mrf.mxu1 }
 0x3cd   : > { %v7806_v23 = vpop.f32.mrf.mxu0 }
 0x3ce   : > { %v3250_v17 = vadd.f32 %v7806_v23, %v3159_v44  ;;  %v2312_v25 = vpop.f32.mrf.mxu1 }
 0x3cf   : > { %v2414_v27 = vpack.c.bf16 %v2312_v25, %v2309_v54  ;;  %v9474_v36 = vpop.f32.mrf.mxu0 }
 0x3d0   : > { %v2314_v28 = vpop.f32.mrf.mxu1 }
 0x3d1   : > { %7867 = vmatprep.mubr.msk.bf16.mxu0 %vm643_vm0, %v2414_v27 }
 0x3d2   : > { %v2317_v24 = vpop.f32.mrf.mxu1 }
 0x3d4   : > { %v2319_v30 = vpop.f32.mrf.mxu1 }
 0x3d6   : > { %v2320_v33 = vpop.f32.mrf.mxu1 }
 0x3d7   : > { %v2415_v37 = vpack.c.bf16 %v2320_v33, %v2317_v24 }
 0x3d8   : > { %v2322_v40 = vpop.f32.mrf.mxu1 }
 0x3d9   : > { %v7809_v39 = vpop.f32.mrf.mxu0  ;;  %7868 = vmatmul.mubr.msk.bf16.gmra.mxu0 %vm643_vm0, %v2415_v37 }
 0x3da   : > { %v3253_v21 = vadd.f32 %v7809_v39, %v3162_v20  ;;  %v2325_v41 = vpop.f32.mrf.mxu1 }
 0x3db   : > { %v3232_v42 = vpop.f32.mrf.mxu0 }
 0x3dc   : > { %v3251_v43 = vadd.f32 %v3232_v42, %v3160_v60  ;;  %v2327_v18 = vpop.f32.mrf.mxu1 }
 0x3dd   : > { %v7810_v44 = vpop.f32.mrf.mxu0 }
 0x3de   : > { %v3254_v45 = vadd.f32 %v7810_v44, %v3163_v62  ;;  %v2328_v46 = vpop.f32.mrf.mxu1 }
 0x3df   : > { %v2416_v6 = vpack.c.bf16 %v2328_v46, %v2325_v41  ;;  %v9478_v12 = vpop.f32.mrf.mxu0 }
 0x3e0   : > { %v2330_v47 = vpop.f32.mrf.mxu1 }
 0x3e1   : > { %7873 = vmatprep.mubr.msk.bf16.mxu0 %vm643_vm0, %v2416_v6 }
 0x3e2   : > { %v2333_v49 = vpop.f32.mrf.mxu1 }
 0x3e4   : > { %v2335_v50 = vpop.f32.mrf.mxu1 }
 0x3e6   : > { %v2336_v52 = vpop.f32.mrf.mxu1 }
 0x3e7   : > { %v2417_v55 = vpack.c.bf16 %v2336_v52, %v2333_v49 }
 0x3e8   : > { %v2338_v56 = vpop.f32.mrf.mxu1 }
 0x3e9   : > { %v7815_v58 = vpop.f32.mrf.mxu0  ;;  %7874 = vmatmul.mubr.msk.bf16.vlgmr.msra.gmra.mxu0 %vm643_vm0, %v2417_v55 }
 0x3ea   : > { %v3340_v20 = vadd.f32 %v7815_v58, %v3249_v10  ;;  %v2341_v60 = vpop.f32.mrf.mxu1 }
 0x3eb   : > { %v3307_v61 = vpop.f32.mrf.mxu0 }
 0x3ec   : > { %v3338_v48 = vadd.f32 %v3307_v61, %v3247_v15  ;;  %v2343_v62 = vpop.f32.mrf.mxu1 }
 0x3ed   : > { %v7816_v63 = vpop.f32.mrf.mxu0 }
 0x3ee   : > { %v3341_v1 = vadd.f32 %v7816_v63, %v3250_v17  ;;  %v2344_v2 = vpop.f32.mrf.mxu1 }
 0x3ef   : > { %v2418_v3 = vpack.c.bf16 %v2344_v2, %v2341_v60  ;;  %v9482_v13 = vpop.f32.mrf.mxu0 }
 0x3f0   : > { %v2346_v4 = vpop.f32.mrf.mxu1 }
 0x3f1   : > { %7877 = vmatprep.mubr.msk.bf16.mxu0 %vm643_vm0, %v2418_v3 }
 0x3f2   : > { %v2349_v0 = vpop.f32.mrf.mxu1 }
 0x3f4   : > { %v2351_v9 = vpop.f32.mrf.mxu1 }
 0x3f6   : > { %v2352_v11 = vpop.f32.mrf.mxu1 }
 0x3f7   : > { %v2419_v54 = vpack.c.bf16 %v2352_v11, %v2349_v0 }
 0x3f8   : > { %v2354_v14 = vpop.f32.mrf.mxu1 }
 0x3f9   : > { %v7819_v16 = vpop.f32.mrf.mxu0  ;;  %7878 = vmatmul.mubr.msk.bf16.gmra.mxu0 %vm643_vm0, %v2419_v54 }
 0x3fa   : > { %v3344_v10 = vadd.f32 %v7819_v16, %v3253_v21 }
 0x3fb   : > { %v3323_v15 = vpop.f32.mrf.mxu0 }
 0x3fc   : > { %v3342_v23 = vadd.f32 %v3323_v15, %v3251_v43 }
 0x3fd   : > { %v7820_v25 = vpop.f32.mrf.mxu0 }
 0x3fe   : > { %v3345_v17 = vadd.f32 %v7820_v25, %v3254_v45 }
 0x3ff   : > { %v9485_v27 = vpop.f32.mrf.mxu0 }
 0x409   : > { %v7825_v28 = vpop.f32.mrf.mxu0 }
 0x40a   : > { %v3431_v24 = vadd.f32 %v7825_v28, %v3340_v20  ;;  %v10264_v28 = vmov 0.0  }
 0x40b   : > { %v3398_v30 = vpop.f32.mrf.mxu0  ;;  %8083 = vmatprep.subr.bf16.mxu1 %v10264_v28 }
 0x40c   : > { %v3429_v33 = vadd.f32 %v3398_v30, %v3338_v48  ;;  %v8511_v48 = vld [vmem:[%s10255_s8] sm:$0xff]  }
 0x40d   : > { %v7826_v37 = vpop.f32.mrf.mxu0  ;;  %7889 = vmatprep.mubr.msk.bf16.mxu0 %vm4062_vm3, %v8511_v48 }
 0x40e   : > { %v3432_v40 = vadd.f32 %v7826_v37, %v3341_v1 }
 0x40f   : > { %v9487_v39 = vpop.f32.mrf.mxu0 }
 0x419   : > { %v7829_v41 = vpop.f32.mrf.mxu0 }
 0x41a   : > { %v9489_v42 = vadd.f32 %v7829_v41, %v3344_v10  ;;  %v2607_v41 = vadd.f32 %v9383_v26, %v9358_v57 }
 0x41b   : > { %v3414_v18 = vpop.f32.mrf.mxu0 }
 0x41c   : > { %v9491_v44 = vadd.f32 %v3414_v18, %v3342_v23 }
 0x41d   : > { %v7830_v21 = vpop.f32.mrf.mxu0 }
 0x41e   : > { %v9493_v43 = vadd.f32 %v7830_v21, %v3345_v17 }
 0x41f   : > { %v9495_v45 = vpop.f32.mrf.mxu0 }
 0x429   : > { %v7835_v46 = vpop.f32.mrf.mxu0 }
 0x42a   : > { %v3522_v6 = vadd.f32 %v7835_v46, %v3431_v24 }
 0x42b   : > { %v3489_v47 = vpop.f32.mrf.mxu0 }
 0x42c   : > { %v9497_v49 = vadd.f32 %v3489_v47, %v3429_v33  ;;  %v2706_v47 = vadd.f32 %v9408_v59, %v2607_v41  ;;  %v9558_v59 = vld [vmem:[%s10253_s6] ss:$0 sm:$0xff] }
 0x42d   : > { %v7836_v50 = vpop.f32.mrf.mxu0 }
 0x42e   : > { %v3523_v52 = vadd.f32 %v7836_v50, %v3432_v40  ;;  %v2591_v40 = vadd.f32 %v9367_v7, %v9349_v22  ;;  %v2797_v28 = vadd.f32 %v9426_v38, %v2706_v47 }
 0x42f   : > { %v9499_v55 = vpop.f32.mrf.mxu0 }
 0x430   : > { %v2702_v18 = vadd.f32 %v9392_v19, %v2591_v40  ;;  %v2888_v57 = vadd.f32 %v9437_v8, %v2797_v28 }
 0x432   : > { %v2793_v50 = vadd.f32 %v9422_v34, %v2702_v18  ;;  %v2979_v38 = vadd.f32 %v9448_v51, %v2888_v57 }
 0x439   : > { %v9501_v56 = vpop.f32.mrf.mxu0 }
 0x43a   : > { %v3526_v41 = vadd.f32 %v9501_v56, %v9489_v42 }
 0x43b   : > { %v9503_v58 = vpop.f32.mrf.mxu0 }
 0x43d   : > { %v9505_v20 = vpop.f32.mrf.mxu0 }
 0x43e   : > { %v3527_v42 = vadd.f32 %v9505_v20, %v9493_v43 }
 0x43f   : > { %v9507_v60 = vpop.f32.mrf.mxu0 }
 0x449   : > { %v7845_v61 = vpop.f32.mrf.mxu0 }
 0x44a   : > { %v3613_v46 = vadd.f32 %v7845_v61, %v3522_v6 }
 0x44b   : > { %v9513_v62 = vpop.f32.mrf.mxu0 }
 0x44c   : > { %v3611_v43 = vadd.f32 %v9513_v62, %v9497_v49 }
 0x44d   : > { %v7846_v63 = vpop.f32.mrf.mxu0 }
 0x44e   : > { %v3614_v22 = vadd.f32 %v7846_v63, %v3523_v52  ;;  %v9565_v52 = vld [vmem:[%s10254_s7] ss:$0 sm:$0xff]  ;;  %v3070_v63 = vadd.f32 %v9459_v32, %v2979_v38 }
 0x44f   : > { %v9515_v1 = vpop.f32.mrf.mxu0 }
 0x450   : > { %v3161_v51 = vadd.f32 %v9470_v31, %v3070_v63  ;;  %v3524_v31 = vadd.f32 %v9503_v58, %v9491_v44 }
 0x452   : > { %v3252_v40 = vadd.f32 %v9478_v12, %v3161_v51 }
 0x454   : > { %v3343_v18 = vadd.f32 %v9485_v27, %v3252_v40 }
 0x456   : > { %v3434_v12 = vadd.f32 %v9495_v45, %v3343_v18 }
 0x458   : > { %v3525_v44 = vadd.f32 %v9507_v60, %v3434_v12 }
 0x459   : > { %v7849_v2 = vpop.f32.mrf.mxu0 }
 0x45b   : > { %v9517_v3 = vpop.f32.mrf.mxu0 }
 0x45c   : > { %v3615_v56 = vadd.f32 %v9517_v3, %v3524_v31 }
 0x45d   : > { %v9519_v4 = vpop.f32.mrf.mxu0 }
 0x45e   : > { %v3618_v58 = vadd.f32 %v9519_v4, %v3527_v42  ;;  %v8527_v42 = vld [vmem:[%s10256_s9 + $0x18] sm:$0xff]  }
 0x45f   : > { %v9521_v0 = vpop.f32.mrf.mxu0 }
 0x460   : > { %v3616_v3 = vadd.f32 %v9521_v0, %v3525_v44  ;;  %v8519_v44 = vld [vmem:[%s10255_s8 + $0x40] sm:$0xff]  }
 0x469   : > { %v7855_v9 = vpop.f32.mrf.mxu0 }
 0x46a   : > { %v3704_v48 = vadd.f32 %v7855_v9, %v3613_v46 }
 0x46b   : > { %v9523_v11 = vpop.f32.mrf.mxu0 }
 0x46c   : > { %v3702_v60 = vadd.f32 %v9523_v11, %v3611_v43  ;;  %v8523_v43 = vld [vmem:[%s10255_s8 + $0x60] sm:$0xff]  }
 0x46d   : > { %v7856_v54 = vpop.f32.mrf.mxu0 }
 0x46e   : > { %v3705_v34 = vadd.f32 %v7856_v54, %v3614_v22 }
 0x46f   : > { %v9525_v14 = vpop.f32.mrf.mxu0 }
 0x479   : > { %v7859_v16 = vpop.f32.mrf.mxu0 }
 0x47b   : > { %v9527_v10 = vpop.f32.mrf.mxu0 }
 0x47c   : > { %v3706_v45 = vadd.f32 %v9527_v10, %v3615_v56  ;;  %v10272_v56 = vmov 0.0  }
 0x47d   : > { %v9529_v15 = vpop.f32.mrf.mxu0  ;;  %8091 = vmatprep.mubr.msk.bf16.mxu1 %vm8649_vm12, %v10272_v56  ;;  %6915 = vst [vmem:[%s10233_s30 + $0x8] sm:$0xff] %v10272_v56 }
 0x47f   : > { %v9531_v23 = vpop.f32.mrf.mxu0 }
 0x480   : > { %10268 = vst [vmem:[#allocation2_spill] sm:$0xff] %v9531_v23 }
 0x487   : > { %v10270_v10 = vld [vmem:[#allocation2_spill] sm:$0xff] }
 0x489   : > { %v7865_v25 = vpop.f32.mrf.mxu0 }
 0x48a   : > { %v3795_v7 = vadd.f32 %v7865_v25, %v3704_v48 }
 0x48b   : > { %v9533_v17 = vpop.f32.mrf.mxu0 }
 0x48c   : > { %10269 = vst [vmem:[#allocation3_spill] sm:$0xff] %v9533_v17  ;;  %v2884_v17 = vadd.f32 %v9433_v53, %v2793_v50 }
 0x48d   : > { %v7866_v24 = vpop.f32.mrf.mxu0 }
 0x48e   : > { %v2975_v26 = vadd.f32 %v9444_v35, %v2884_v17  ;;  %v3796_v61 = vadd.f32 %v7866_v24, %v3705_v34 }
 0x48f   : > { %v9536_v30 = vpop.f32.mrf.mxu0 }
 0x490   : > { %v3066_v53 = vadd.f32 %v9455_v5, %v2975_v26 }
 0x492   : > { %v3157_v9 = vadd.f32 %v9466_v29, %v3066_v53 }
 0x494   : > { %v3248_v5 = vadd.f32 %v9474_v36, %v3157_v9  ;;  %v3617_v36 = vadd.f32 %v7849_v2, %v3526_v41 }
 0x496   : > { %v3339_v24 = vadd.f32 %v9482_v13, %v3248_v5  ;;  %v3708_v50 = vadd.f32 %v7859_v16, %v3617_v36 }
 0x498   : > { %v3430_v46 = vadd.f32 %v9487_v39, %v3339_v24 }
 0x499   : > { %v7869_v33 = vpop.f32.mrf.mxu0 }
 0x49a   : > { %v3521_v13 = vadd.f32 %v9499_v55, %v3430_v46  ;;  %v3799_v55 = vadd.f32 %v7869_v33, %v3708_v50  ;;  %v3707_v33 = vadd.f32 %v10270_v10, %v3616_v3  ;;  %v8528_v50 = vld [vmem:[%s10256_s9 + $0x10] sm:$0xff]   ;;  %v8526_v3 = vld [vmem:[%s10255_s8 + $0x78] sm:$0xff]  }
 0x49b   : > { %v9538_v37 = vpop.f32.mrf.mxu0 }
 0x49c   : > { %v3612_v39 = vadd.f32 %v9515_v1, %v3521_v13  ;;  %v3709_v1 = vadd.f32 %v9529_v15, %v3618_v58  ;;  %v3797_v16 = vadd.f32 %v9538_v37, %v3706_v45  ;;  %v8513_v13 = vld [vmem:[%s10255_s8 + $0x10] sm:$0xff]   ;;  %v8520_v58 = vld [vmem:[%s10255_s8 + $0x48] sm:$0xff]  }
 0x49d   : > { %v9545_v21 = vpop.f32.mrf.mxu0  ;;  %v8521_v45 = vld [vmem:[%s10255_s8 + $0x50] sm:$0xff]  }
 0x49e   : > { %v3703_v20 = vadd.f32 %v9525_v14, %v3612_v39  ;;  %v10271_v14 = vld [vmem:[#allocation3_spill] sm:$0xff] }
 0x49f   : > { %v9551_v23 = vpop.f32.mrf.mxu0  ;;  %v3793_v34 = vadd.f32 %v10271_v14, %v3702_v60  ;;  %v8516_v39 = vld [vmem:[%s10255_s8 + $0x28] sm:$0xff]  }
 0x4a0   : > { %v3794_v4 = vadd.f32 %v9536_v30, %v3703_v20  ;;  %v3798_v15 = vadd.f32 %v9551_v23, %v3707_v33  ;;  %v8524_v20 = vld [vmem:[%s10255_s8 + $0x68] sm:$0xff]  }
 0x4a1   : > { %v8531_v14 = vld [vmem:[%s10256_s9 + $0x28] sm:$0xff]  }
 0x4a9   : > { %v7875_v19 = vpop.f32.mrf.mxu0 }
 0x4aa   : > { %v3886_v6 = vadd.f32 %v7875_v19, %v3795_v7  ;;  %v3800_v19 = vadd.f32 %v9545_v21, %v3709_v1  ;;  %v8535_v1 = vld [vmem:[%s10260_s13 + $0x38] sm:$0xff]  }
 0x4ab   : > { %v3853_v8 = vpop.f32.mrf.mxu0  ;;  %8084 = vmatpush3.bf16.msra.mxu1 %v8535_v1 }
 0x4ac   : > { %v3901_v35 = vmul.f32 %v9558_v59, %v3886_v6  ;;  %v3884_v30 = vadd.f32 %v3853_v8, %v3793_v34  ;;  %8085 = vmatprep.subr.bf16.mxu1 %v10272_v56 }
 0x4ad   : > { %v7876_v25 = vpop.f32.mrf.mxu0 }
 0x4ae   : > { %v3916_v54 = vadd.f32 %v9565_v52, %v3901_v35  ;;  %v3887_v17 = vadd.f32 %v7876_v25, %v3796_v61  ;;  %v3899_v23 = vmul.f32 %v9558_v59, %v3884_v30  ;;  %v8534_v30 = vld [vmem:[%s10256_s9 + $0x30] sm:$0xff]  }
 0x4af   : > { %v3856_v22 = vpop.f32.mrf.mxu0 }
 0x4b0   : > { %v3902_v28 = vmul.f32 %v9558_v59, %v3887_v17  ;;  %v3932_v32 = vmul.f32 0.01, %v3916_v54  ;;  %vm3924_vm4 = vcmp.gt.f32.partialorder %v3916_v54, 0.0  ;;  %v3885_v0 = vadd.f32 %v3856_v22, %v3794_v4  ;;  %v8517_v22 = vld [vmem:[%s10255_s8 + $0x30] sm:$0xff]  }
 0x4b2   : > { %v3917_v29 = vadd.f32 %v9565_v52, %v3902_v28  ;;  %v3940_v27 = vsel %vm3924_vm4, %v3916_v54, %v3932_v32  ;;  %v3900_v63 = vmul.f32 %v9558_v59, %v3885_v0  ;;  %v3914_v32 = vadd.f32 %v9565_v52, %v3899_v23 }
 0x4b4   : > { %v3933_v47 = vmul.f32 0.01, %v3917_v29  ;;  %vm3925_vm5 = vcmp.gt.f32.partialorder %v3917_v29, 0.0  ;;  %v3915_v5 = vadd.f32 %v9565_v52, %v3900_v63  ;;  %v3930_v31 = vmul.f32 0.01, %v3914_v32  ;;  %v8537_v63 = vld [vmem:[%s10256_s9 + $0x40] sm:$0xff]  }
 0x4b5   : > { %vm3922_vm11 = vcmp.gt.f32.partialorder %v3914_v32, 0.0 }
 0x4b6   : > { %v3941_v48 = vsel %vm3925_vm5, %v3917_v29, %v3933_v47  ;;  %v3931_v46 = vmul.f32 0.01, %v3915_v5  ;;  %vm3923_vm10 = vcmp.gt.f32.partialorder %v3915_v5, 0.0  ;;  %v3938_v47 = vsel %vm3922_vm11, %v3914_v32, %v3930_v31 }
 0x4b7   : > { %v9589_v7 = vpack.c.bf16 %v3941_v48, %v3940_v27  ;;  %v8514_v27 = vld [vmem:[%s10255_s8 + $0x18] sm:$0xff]   ;;  %v8515_v48 = vld [vmem:[%s10255_s8 + $0x20] sm:$0xff]  }
 0x4b8   : > { %v3939_v36 = vsel %vm3923_vm10, %v3915_v5, %v3931_v46  ;;  %v8544_v46 = vld [vmem:[%s10256_s9 + $0x88] sm:$0xff]  }
 0x4b9   : > { %v7879_v2 = vpop.f32.mrf.mxu0  ;;  %v3978_v12 = vpack.c.bf16 %v3939_v36, %v3938_v47  ;;  %v8545_v47 = vld [vmem:[%s10256_s9 + $0x80] sm:$0xff]  }
 0x4ba   : > { %v3890_v57 = vadd.f32 %v7879_v2, %v3799_v55  ;;  %v8522_v55 = vld [vmem:[%s10255_s8 + $0x58] sm:$0xff]   ;;  %v8525_v2 = vld [vmem:[%s10255_s8 + $0x70] sm:$0xff]  }
 0x4bb   : > { %v3869_v26 = vpop.f32.mrf.mxu0 }
 0x4bc   : > { %v3905_v49 = vmul.f32 %v9558_v59, %v3890_v57  ;;  %v3888_v62 = vadd.f32 %v3869_v26, %v3797_v16  ;;  %v8560_v16 = vld [vmem:[%s10260_s13 + $0x30] sm:$0xff]   ;;  %v8529_v26 = vld [vmem:[%s10256_s9 + $0x8] sm:$0xff]  }
 0x4bd   : > { %v7880_v6 = vpop.f32.mrf.mxu0  ;;  %8086 = vmatpush3.bf16.msra.mxu1 %v8560_v16  ;;  %v8553_v16 = vld [vmem:[%s10256_s9 + $0xc0] sm:$0xff]  }
 0x4be   : > { %v3920_v37 = vadd.f32 %v9565_v52, %v3905_v49  ;;  %v3903_v11 = vmul.f32 %v9558_v59, %v3888_v62  ;;  %v3891_v38 = vadd.f32 %v7880_v6, %v3800_v19  ;;  %8087 = vmatprep.subr.bf16.mxu1 %v10272_v56  ;;  %v8530_v49 = vld [vmem:[%s10256_s9] sm:$0xff]  }
 0x4bf   : > { %v3872_v53 = vpop.f32.mrf.mxu0  ;;  %v8532_v6 = vld [vmem:[%s10256_s9 + $0x20] sm:$0xff]  }
 0x4c0   : > { %v3918_v61 = vadd.f32 %v9565_v52, %v3903_v11  ;;  %v3906_v21 = vmul.f32 %v9558_v59, %v3891_v38  ;;  %v3889_v35 = vadd.f32 %v3872_v53, %v3798_v15  ;;  %v3936_v9 = vmul.f32 0.01, %v3920_v37 }
 0x4c1   : > { %vm3928_vm6 = vcmp.gt.f32.partialorder %v3920_v37, 0.0 }
 0x4c2   : > { %v3921_v25 = vadd.f32 %v9565_v52, %v3906_v21  ;;  %v3904_v54 = vmul.f32 %v9558_v59, %v3889_v35  ;;  %v3934_v17 = vmul.f32 0.01, %v3918_v61  ;;  %vm3926_vm8 = vcmp.gt.f32.partialorder %v3918_v61, 0.0 }
 0x4c3   : > { %v3944_v28 = vsel %vm3928_vm6, %v3920_v37, %v3936_v9  ;;  %v8533_v37 = vld [vmem:[%s10256_s9 + $0x38] sm:$0xff]  }
 0x4c4   : > { %v3937_v51 = vmul.f32 0.01, %v3921_v25  ;;  %v3919_v8 = vadd.f32 %v9565_v52, %v3904_v54  ;;  %vm3929_vm7 = vcmp.gt.f32.partialorder %v3921_v25, 0.0  ;;  %v3942_v29 = vsel %vm3926_vm8, %v3918_v61, %v3934_v17  ;;  %v8512_v52 = vld [vmem:[%s10255_s8 + $0x8] sm:$0xff]   ;;  %v8539_v17 = vld [vmem:[%s10256_s9 + $0x50] sm:$0xff]  }
 0x4c5   : > { %v8536_v61 = vld [vmem:[%s10256_s9 + $0x48] sm:$0xff]  }
 0x4c6   : > { %v3945_v40 = vsel %vm3929_vm7, %v3921_v25, %v3937_v51  ;;  %vm3927_vm9 = vcmp.gt.f32.partialorder %v3919_v8, 0.0  ;;  %v3935_v24 = vmul.f32 0.01, %v3919_v8  ;;  %v8538_v25 = vld [vmem:[%s10256_s9 + $0x58] sm:$0xff]  }
 0x4c7   : > { %v3981_v41 = vpack.c.bf16 %v3945_v40, %v3944_v28  ;;  %v8541_v40 = vld [vmem:[%s10256_s9 + $0x60] sm:$0xff]  }
 0x4c8   : > { %v3943_v18 = vsel %vm3927_vm9, %v3919_v8, %v3935_v24  ;;  %v8540_v8 = vld [vmem:[%s10256_s9 + $0x68] sm:$0xff]  }
 0x4c9   : > { %7881 = vmatprep.subr.bf16.mxu0 %v3981_v41  ;;  %v3980_v59 = vpack.c.bf16 %v3943_v18, %v3942_v29  ;;  %v8543_v18 = vld [vmem:[%s10256_s9 + $0x70] sm:$0xff]  }
 0x4ca   : > { %7882 = vmatpush3.bf16.msra.mxu0 %v3981_v41  ;;  %v8542_v41 = vld [vmem:[%s10256_s9 + $0x78] sm:$0xff]  }
 0x4cb   : > { %7883 = vmatprep.subr.bf16.mxu0 %v3980_v59 }
 0x4ce   : > { %7884 = vmatpush3.bf16.msra.mxu0 %v3980_v59 }
 0x4cf   : > { %7885 = vmatprep.subr.bf16.mxu0 %v9589_v7 }
 0x4d2   : > { %7886 = vmatpush3.bf16.msra.mxu0 %v9589_v7  ;;  %v8518_v7 = vld [vmem:[%s10255_s8 + $0x38] sm:$0xff]  }
 0x4d3   : > { %7887 = vmatprep.subr.bf16.mxu0 %v3978_v12 }
 0x4d6   : > { %7888 = vmatpush3.bf16.msra.mxu0 %v3978_v12 }
 0x4d7   : > { %7921 = vmatprep.subr.bf16.mxu0 %v10272_v56 }
 0x4d9   : > { %7890 = vmatmul.mubr.msk.bf16.vlgmr.msra.gmra.mxu0 %vm4062_vm3, %v8512_v52  ;;  %v8546_v52 = vld [vmem:[%s10256_s9 + $0x98] sm:$0xff]  }
 0x4da   : > { %7893 = vmatprep.mubr.msk.bf16.mxu0 %vm4062_vm3, %v8513_v13  ;;  %7922 = vmatpush3.bf16.msra.mxu0 %v8527_v42 }
 0x4db   : > { %7923 = vmatprep.subr.bf16.mxu0 %v10272_v56 }
 0x4de   : > { %7924 = vmatpush3.bf16.msra.mxu0 %v8528_v50  ;;  %v8547_v50 = vld [vmem:[%s10256_s9 + $0x90] sm:$0xff]  }
 0x4df   : > { %7929 = vmatprep.subr.bf16.mxu0 %v10272_v56 }
 0x4e1   : > { %7894 = vmatmul.mubr.msk.bf16.gmra.mxu0 %vm4062_vm3, %v8514_v27 }
 0x4e2   : > { %7897 = vmatprep.mubr.msk.bf16.mxu0 %vm4062_vm3, %v8515_v48  ;;  %v8548_v48 = vld [vmem:[%s10256_s9 + $0xa8] sm:$0xff]  }
 0x4e9   : > { %7898 = vmatmul.mubr.msk.bf16.gmra.mxu0 %vm4062_vm3, %v8516_v39 }
 0x4ea   : > { %7901 = vmatprep.mubr.msk.bf16.mxu0 %vm4062_vm3, %v8517_v22 }
 0x4f1   : > { %7902 = vmatmul.mubr.msk.bf16.gmra.mxu0 %vm4062_vm3, %v8518_v7  ;;  %v8549_v7 = vld [vmem:[%s10256_s9 + $0xa0] sm:$0xff]  }
 0x4f2   : > { %7905 = vmatprep.mubr.msk.bf16.mxu0 %vm4062_vm3, %v8519_v44 }
 0x4f9   : > { %7906 = vmatmul.mubr.msk.bf16.gmra.mxu0 %vm4062_vm3, %v8520_v58  ;;  %v8550_v58 = vld [vmem:[%s10256_s9 + $0xb8] sm:$0xff]  }
 0x4fa   : > { %7909 = vmatprep.mubr.msk.bf16.mxu0 %vm4062_vm3, %v8521_v45 }
 0x501   : > { %7910 = vmatmul.mubr.msk.bf16.gmra.mxu0 %vm4062_vm3, %v8522_v55 }
 0x502   : > { %7913 = vmatprep.mubr.msk.bf16.mxu0 %vm4062_vm3, %v8523_v43  ;;  %v8551_v43 = vld [vmem:[%s10256_s9 + $0xb0] sm:$0xff]  }
 0x509   : > { %7914 = vmatmul.mubr.msk.bf16.gmra.mxu0 %vm4062_vm3, %v8524_v20 }
 0x50a   : > { %7917 = vmatprep.mubr.msk.bf16.mxu0 %vm4062_vm3, %v8525_v2  ;;  %v8552_v2 = vld [vmem:[%s10256_s9 + $0xc8] sm:$0xff]  }
 0x511   : > { %7918 = vmatmul.mubr.msk.bf16.gmra.mxu0 %vm4062_vm3, %v8526_v3 }
 0x512   : > { %7925 = vmatprep.mubr.msk.bf16.mxu0 %vm8649_vm12, %v10272_v56 }
 0x599   : > { %v7891_v57 = vpop.f32.mrf.mxu0 }
 0x59b   : > { %v4145_v60 = vpop.f32.mrf.mxu0 }
 0x59d   : > { %v7892_v4 = vpop.f32.mrf.mxu0 }
 0x59e   : > { %v4273_v10 = vpack.c.bf16 %v7892_v4, %v7891_v57 }
 0x59f   : > { %v4148_v33 = vpop.f32.mrf.mxu0 }
 0x5a0   : > { %7926 = vmatmul.mubr.msk.bf16.vlgmr.msra.gmra.mxu0 %vm4364_vm13, %v4273_v10  ;;  %v4272_v34 = vpack.c.bf16 %v4148_v33, %v4145_v60  ;;  %v8554_v60 = vld [vmem:[%s10256_s9 + $0xd8] sm:$0xff]   ;;  %v8555_v10 = vld [vmem:[%s10256_s9 + $0xd0] sm:$0xff]  }
 0x5a1   : > { %v7895_v19 = vpop.f32.mrf.mxu0  ;;  %7930 = vmatpush3.bf16.msra.mxu0 %v8529_v26  ;;  %7933 = vmatprep.mubr.msk.bf16.mxu0 %vm8649_vm12, %v10272_v56 }
 0x5a2   : > { %7931 = vmatprep.subr.bf16.mxu0 %v10272_v56 }
 0x5a3   : > { %v4161_v62 = vpop.f32.mrf.mxu0 }
 0x5a5   : > { %7932 = vmatpush3.bf16.msra.mxu0 %v8530_v49  ;;  %v7896_v0 = vpop.f32.mrf.mxu0 }
 0x5a6   : > { %7937 = vmatprep.subr.bf16.mxu0 %v10272_v56  ;;  %v4275_v21 = vpack.c.bf16 %v7896_v0, %v7895_v19  ;;  %v8556_v19 = vld [vmem:[%s10256_s9 + $0xe8] sm:$0xff]   ;;  %v8558_v0 = vld [vmem:[%s10256_s9 + $0xf8] sm:$0xff]  }
 0x5a7   : > { %v4164_v15 = vpop.f32.mrf.mxu0 }
 0x5a8   : > { %7934 = vmatmul.mubr.msk.bf16.vlgmr.msra.gmra.mxu0 %vm4364_vm13, %v4272_v34  ;;  %v4274_v11 = vpack.c.bf16 %v4164_v15, %v4161_v62  ;;  %v8559_v15 = vld [vmem:[%s10256_s9 + $0xf0] sm:$0xff]  }
 0x5a9   : > { %7938 = vmatpush3.bf16.msra.mxu0 %v8531_v14  ;;  %7941 = vmatprep.mubr.msk.bf16.mxu0 %vm8649_vm12, %v10272_v56  ;;  %v7899_v38 = vpop.f32.mrf.mxu0  ;;  %v8557_v14 = vld [vmem:[%s10256_s9 + $0xe0] sm:$0xff]  }
 0x5aa   : > { %7939 = vmatprep.subr.bf16.mxu0 %v10272_v56 }
 0x5ab   : > { %v4177_v53 = vpop.f32.mrf.mxu0 }
 0x5ad   : > { %7940 = vmatpush3.bf16.msra.mxu0 %v8532_v6  ;;  %v7900_v35 = vpop.f32.mrf.mxu0 }
 0x5ae   : > { %7945 = vmatprep.subr.bf16.mxu0 %v10272_v56  ;;  %v4277_v5 = vpack.c.bf16 %v7900_v35, %v7899_v38 }
 0x5af   : > { %v4180_v9 = vpop.f32.mrf.mxu0 }
 0x5b0   : > { %7942 = vmatmul.mubr.msk.bf16.vlgmr.msra.gmra.mxu0 %vm4364_vm13, %v4274_v11  ;;  %v4276_v54 = vpack.c.bf16 %v4180_v9, %v4177_v53  ;;  %v8561_v11 = vld [vmem:[%s10260_s13 + $0x28] sm:$0xff]  }
 0x5b1   : > { %7946 = vmatpush3.bf16.msra.mxu0 %v8533_v37  ;;  %7949 = vmatprep.mubr.msk.bf16.mxu0 %vm8649_vm12, %v10272_v56  ;;  %v7903_v23 = vpop.f32.mrf.mxu0 }
 0x5b2   : > { %7947 = vmatprep.subr.bf16.mxu0 %v10272_v56  ;;  %8088 = vmatpush3.bf16.msra.mxu1 %v8561_v11 }
 0x5b3   : > { %v4193_v51 = vpop.f32.mrf.mxu0  ;;  %8089 = vmatprep.subr.bf16.mxu1 %v10272_v56 }
 0x5b5   : > { %7948 = vmatpush3.bf16.msra.mxu0 %v8534_v30  ;;  %v7904_v28 = vpop.f32.mrf.mxu0 }
 0x5b6   : > { %7953 = vmatprep.subr.bf16.mxu0 %v10272_v56  ;;  %v4279_v31 = vpack.c.bf16 %v7904_v28, %v7903_v23 }
 0x5b7   : > { %v4196_v24 = vpop.f32.mrf.mxu0 }
 0x5b8   : > { %7950 = vmatmul.mubr.msk.bf16.vlgmr.msra.gmra.mxu0 %vm4364_vm13, %v4275_v21  ;;  %v4278_v32 = vpack.c.bf16 %v4196_v24, %v4193_v51 }
 0x5b9   : > { %7954 = vmatpush3.bf16.msra.mxu0 %v8536_v61  ;;  %7957 = vmatprep.mubr.msk.bf16.mxu0 %vm8649_vm12, %v10272_v56  ;;  %v7907_v29 = vpop.f32.mrf.mxu0 }
 0x5ba   : > { %7955 = vmatprep.subr.bf16.mxu0 %v10272_v56 }
 0x5bb   : > { %v4209_v59 = vpop.f32.mrf.mxu0 }
 0x5bd   : > { %7956 = vmatpush3.bf16.msra.mxu0 %v8537_v63  ;;  %v7908_v36 = vpop.f32.mrf.mxu0  ;;  %v8562_v63 = vld [vmem:[%s10259_s12] sm:$0xff]  }
 0x5be   : > { %7961 = vmatprep.subr.bf16.mxu0 %v10272_v56  ;;  %v4281_v39 = vpack.c.bf16 %v7908_v36, %v7907_v29 }
 0x5bf   : > { %v4212_v12 = vpop.f32.mrf.mxu0 }
 0x5c0   : > { %7958 = vmatmul.mubr.msk.bf16.vlgmr.msra.gmra.mxu0 %vm4364_vm13, %v4276_v54  ;;  %v4280_v13 = vpack.c.bf16 %v4212_v12, %v4209_v59 }
 0x5c1   : > { %7962 = vmatpush3.bf16.msra.mxu0 %v8538_v25  ;;  %7965 = vmatprep.mubr.msk.bf16.mxu0 %vm8649_vm12, %v10272_v56  ;;  %v7911_v42 = vpop.f32.mrf.mxu0 }
 0x5c2   : > { %7963 = vmatprep.subr.bf16.mxu0 %v10272_v56 }
 0x5c3   : > { %v4225_v27 = vpop.f32.mrf.mxu0 }
 0x5c5   : > { %7964 = vmatpush3.bf16.msra.mxu0 %v8539_v17  ;;  %v7912_v22 = vpop.f32.mrf.mxu0 }
 0x5c6   : > { %7969 = vmatprep.subr.bf16.mxu0 %v10272_v56  ;;  %v4283_v3 = vpack.c.bf16 %v7912_v22, %v7911_v42 }
 0x5c7   : > { %v4228_v44 = vpop.f32.mrf.mxu0 }
 0x5c8   : > { %7966 = vmatmul.mubr.msk.bf16.vlgmr.msra.gmra.mxu0 %vm4364_vm13, %v4277_v5  ;;  %v4282_v45 = vpack.c.bf16 %v4228_v44, %v4225_v27 }
 0x5c9   : > { %7970 = vmatpush3.bf16.msra.mxu0 %v8540_v8  ;;  %7973 = vmatprep.mubr.msk.bf16.mxu0 %vm8649_vm12, %v10272_v56  ;;  %v7915_v55 = vpop.f32.mrf.mxu0 }
 0x5ca   : > { %7971 = vmatprep.subr.bf16.mxu0 %v10272_v56 }
 0x5cb   : > { %v4241_v20 = vpop.f32.mrf.mxu0 }
 0x5cd   : > { %7972 = vmatpush3.bf16.msra.mxu0 %v8541_v40  ;;  %v7916_v1 = vpop.f32.mrf.mxu0 }
 0x5ce   : > { %7977 = vmatprep.subr.bf16.mxu0 %v10272_v56  ;;  %v4285_v49 = vpack.c.bf16 %v7916_v1, %v7915_v55 }
 0x5cf   : > { %v4244_v57 = vpop.f32.mrf.mxu0 }
 0x5d0   : > { %7974 = vmatmul.mubr.msk.bf16.vlgmr.msra.gmra.mxu0 %vm4364_vm13, %v4278_v32  ;;  %v4284_v4 = vpack.c.bf16 %v4244_v57, %v4241_v20 }
 0x5d1   : > { %7978 = vmatpush3.bf16.msra.mxu0 %v8542_v41  ;;  %7981 = vmatprep.mubr.msk.bf16.mxu0 %vm8649_vm12, %v10272_v56  ;;  %v7919_v26 = vpop.f32.mrf.mxu0 }
 0x5d2   : > { %7979 = vmatprep.subr.bf16.mxu0 %v10272_v56 }
 0x5d3   : > { %v4257_v33 = vpop.f32.mrf.mxu0 }
 0x5d5   : > { %7980 = vmatpush3.bf16.msra.mxu0 %v8543_v18  ;;  %v7920_v62 = vpop.f32.mrf.mxu0 }
 0x5d6   : > { %7985 = vmatprep.subr.bf16.mxu0 %v10272_v56  ;;  %v4287_v37 = vpack.c.bf16 %v7920_v62, %v7919_v26 }
 0x5d7   : > { %v4260_v34 = vpop.f32.mrf.mxu0 }
 0x5d8   : > { %7982 = vmatmul.mubr.msk.bf16.vlgmr.msra.gmra.mxu0 %vm4364_vm13, %v4279_v31  ;;  %v4286_v6 = vpack.c.bf16 %v4260_v34, %v4257_v33 }
 0x5d9   : > { %7986 = vmatpush3.bf16.msra.mxu0 %v8544_v46  ;;  %7989 = vmatprep.mubr.msk.bf16.mxu0 %vm8649_vm12, %v10272_v56 }
 0x5da   : > { %7987 = vmatprep.subr.bf16.mxu0 %v10272_v56 }
 0x5dd   : > { %7988 = vmatpush3.bf16.msra.mxu0 %v8545_v47 }
 0x5de   : > { %7993 = vmatprep.subr.bf16.mxu0 %v10272_v56 }
 0x5e0   : > { %7990 = vmatmul.mubr.msk.bf16.vlgmr.msra.gmra.mxu0 %vm4364_vm13, %v4280_v13 }
 0x5e1   : > { %7994 = vmatpush3.bf16.msra.mxu0 %v8546_v52  ;;  %7997 = vmatprep.mubr.msk.bf16.mxu0 %vm8649_vm12, %v10272_v56 }
 0x5e2   : > { %7995 = vmatprep.subr.bf16.mxu0 %v10272_v56 }
 0x5e5   : > { %7996 = vmatpush3.bf16.msra.mxu0 %v8547_v50 }
 0x5e6   : > { %8001 = vmatprep.subr.bf16.mxu0 %v10272_v56 }
 0x5e8   : > { %7998 = vmatmul.mubr.msk.bf16.vlgmr.msra.gmra.mxu0 %vm4364_vm13, %v4281_v39 }
 0x5e9   : > { %8002 = vmatpush3.bf16.msra.mxu0 %v8548_v48  ;;  %8005 = vmatprep.mubr.msk.bf16.mxu0 %vm8649_vm12, %v10272_v56  ;;  %v8573_v48 = vld [vmem:[%s10260_s13 + $0x20] sm:$0xff]  }
 0x5ea   : > { %8003 = vmatprep.subr.bf16.mxu0 %v10272_v56  ;;  %8090 = vmatpush3.bf16.msra.mxu1 %v8573_v48 }
 0x5eb   : > { %8107 = vmatprep.subr.bf16.mxu1 %v10272_v56 }
 0x5ed   : > { %8004 = vmatpush3.bf16.msra.mxu0 %v8549_v7 }
 0x5ee   : > { %8009 = vmatprep.subr.bf16.mxu0 %v10272_v56 }
 0x5f0   : > { %8006 = vmatmul.mubr.msk.bf16.vlgmr.msra.gmra.mxu0 %vm4364_vm13, %v4282_v45 }
 0x5f1   : > { %8010 = vmatpush3.bf16.msra.mxu0 %v8550_v58  ;;  %8013 = vmatprep.mubr.msk.bf16.mxu0 %vm8649_vm12, %v10272_v56 }
 0x5f2   : > { %8011 = vmatprep.subr.bf16.mxu0 %v10272_v56 }
 0x5f5   : > { %8012 = vmatpush3.bf16.msra.mxu0 %v8551_v43 }
 0x5f6   : > { %8017 = vmatprep.subr.bf16.mxu0 %v10272_v56 }
 0x5f8   : > { %8014 = vmatmul.mubr.msk.bf16.vlgmr.msra.gmra.mxu0 %vm4364_vm13, %v4283_v3 }
 0x5f9   : > { %8018 = vmatpush3.bf16.msra.mxu0 %v8552_v2  ;;  %8021 = vmatprep.mubr.msk.bf16.mxu0 %vm8649_vm12, %v10272_v56 }
 0x5fa   : > { %8019 = vmatprep.subr.bf16.mxu0 %v10272_v56 }
 0x5fd   : > { %8020 = vmatpush3.bf16.msra.mxu0 %v8553_v16 }
 0x5fe   : > { %8025 = vmatprep.subr.bf16.mxu0 %v10272_v56 }
 0x600   : > { %8022 = vmatmul.mubr.msk.bf16.vlgmr.msra.gmra.mxu0 %vm4364_vm13, %v4284_v4 }
 0x601   : > { %8026 = vmatpush3.bf16.msra.mxu0 %v8554_v60  ;;  %8029 = vmatprep.mubr.msk.bf16.mxu0 %vm8649_vm12, %v10272_v56 }
 0x602   : > { %8027 = vmatprep.subr.bf16.mxu0 %v10272_v56 }
 0x605   : > { %8028 = vmatpush3.bf16.msra.mxu0 %v8555_v10 }
 0x606   : > { %8033 = vmatprep.subr.bf16.mxu0 %v10272_v56 }
 0x608   : > { %8030 = vmatmul.mubr.msk.bf16.vlgmr.msra.gmra.mxu0 %vm4364_vm13, %v4285_v49 }
 0x609   : > { %8034 = vmatpush3.bf16.msra.mxu0 %v8556_v19  ;;  %8037 = vmatprep.mubr.msk.bf16.mxu0 %vm8649_vm12, %v10272_v56 }
 0x60a   : > { %8035 = vmatprep.subr.bf16.mxu0 %v10272_v56 }
 0x60d   : > { %8036 = vmatpush3.bf16.msra.mxu0 %v8557_v14 }
 0x60e   : > { %8041 = vmatprep.subr.bf16.mxu0 %v10272_v56 }
 0x610   : > { %8038 = vmatmul.mubr.msk.bf16.vlgmr.msra.gmra.mxu0 %vm4364_vm13, %v4286_v6 }
 0x611   : > { %8042 = vmatpush3.bf16.msra.mxu0 %v8558_v0  ;;  %8045 = vmatprep.mubr.msk.bf16.mxu0 %vm8649_vm12, %v10272_v56 }
 0x612   : > { %8043 = vmatprep.subr.bf16.mxu0 %v10272_v56 }
 0x615   : > { %8044 = vmatpush3.bf16.msra.mxu0 %v8559_v15 }
 0x618   : > { %8046 = vmatmul.mubr.msk.bf16.vlgmr.msra.gmra.mxu0 %vm4364_vm13, %v4287_v37 }
 0x619   : > { %8051 = vmatprep.mubr.msk.bf16.mxu0 %vm643_vm0, %v8562_v63 }
 0x660   : > { %v4402_v38 = vpop.f32.mrf.mxu0 }
 0x662   : > { %v7927_v30 = vpop.f32.mrf.mxu0 }
 0x664   : > { %v4405_v53 = vpop.f32.mrf.mxu0 }
 0x666   : > { %v7928_v61 = vpop.f32.mrf.mxu0 }
 0x668   : > { %v4458_v21 = vpop.f32.mrf.mxu0 }
 0x669   : > { %v4459_v35 = vadd.f32 %v4458_v21, %v4402_v38 }
 0x66a   : > { %v7935_v9 = vpop.f32.mrf.mxu0 }
 0x66c   : > { %v4461_v25 = vpop.f32.mrf.mxu0 }
 0x66d   : > { %v4462_v54 = vadd.f32 %v4461_v25, %v4405_v53 }
 0x66e   : > { %v7936_v23 = vpop.f32.mrf.mxu0 }
 0x670   : > { %v4514_v17 = vpop.f32.mrf.mxu0 }
 0x671   : > { %v4521_v51 = vadd.f32 %v4514_v17, %v4459_v35 }
 0x672   : > { %v7943_v8 = vpop.f32.mrf.mxu0 }
 0x674   : > { %v4517_v5 = vpop.f32.mrf.mxu0 }
 0x675   : > { %v4522_v28 = vadd.f32 %v4517_v5, %v4462_v54 }
 0x676   : > { %v7944_v40 = vpop.f32.mrf.mxu0 }
 0x678   : > { %v4572_v24 = vpop.f32.mrf.mxu0 }
 0x679   : > { %v4579_v41 = vadd.f32 %v4572_v24, %v4521_v51 }
 0x67a   : > { %v7951_v32 = vpop.f32.mrf.mxu0 }
 0x67c   : > { %v4575_v29 = vpop.f32.mrf.mxu0 }
 0x67d   : > { %v4580_v18 = vadd.f32 %v4575_v29, %v4522_v28 }
 0x67e   : > { %v7952_v59 = vpop.f32.mrf.mxu0 }
 0x680   : > { %v4630_v46 = vpop.f32.mrf.mxu0 }
 0x681   : > { %v4637_v31 = vadd.f32 %v4630_v46, %v4579_v41 }
 0x682   : > { %v7959_v36 = vpop.f32.mrf.mxu0 }
 0x684   : > { %v4633_v47 = vpop.f32.mrf.mxu0 }
 0x685   : > { %v4638_v12 = vadd.f32 %v4633_v47, %v4580_v18  ;;  %v7305_v47 = vld [vmem:[%s10257_s10] ss:$0 sm:$0xff] }
 0x686   : > { %v7960_v52 = vpop.f32.mrf.mxu0 }
 0x688   : > { %v4688_v13 = vpop.f32.mrf.mxu0 }
 0x689   : > { %v4695_v42 = vadd.f32 %v4688_v13, %v4637_v31  ;;  %v7306_v13 = vld [vmem:[%s10258_s11] ss:$0 sm:$0xff] }
 0x68a   : > { %v7967_v50 = vpop.f32.mrf.mxu0 }
 0x68c   : > { %v4691_v27 = vpop.f32.mrf.mxu0 }
 0x68d   : > { %v4696_v53 = vadd.f32 %v4691_v27, %v4638_v12 }
 0x68e   : > { %v7968_v39 = vpop.f32.mrf.mxu0 }
 0x690   : > { %v4746_v22 = vpop.f32.mrf.mxu0 }
 0x691   : > { %v4753_v38 = vadd.f32 %v4746_v22, %v4695_v42 }
 0x692   : > { %v7975_v7 = vpop.f32.mrf.mxu0 }
 0x694   : > { %v4749_v44 = vpop.f32.mrf.mxu0 }
 0x695   : > { %v4754_v35 = vadd.f32 %v4749_v44, %v4696_v53 }
 0x696   : > { %v7976_v58 = vpop.f32.mrf.mxu0 }
 0x698   : > { %v4804_v45 = vpop.f32.mrf.mxu0 }
 0x699   : > { %v4811_v61 = vadd.f32 %v4804_v45, %v4753_v38 }
 0x69a   : > { %v7983_v55 = vpop.f32.mrf.mxu0 }
 0x69c   : > { %v4807_v43 = vpop.f32.mrf.mxu0 }
 0x69d   : > { %v4812_v25 = vadd.f32 %v4807_v43, %v4754_v35 }
 0x69e   : > { %v7984_v20 = vpop.f32.mrf.mxu0 }
 0x6a0   : > { %v4862_v2 = vpop.f32.mrf.mxu0 }
 0x6a1   : > { %v4869_v63 = vadd.f32 %v4862_v2, %v4811_v61  ;;  %v8583_v61 = vld [vmem:[%s10260_s13 + $0x58] sm:$0xff]  }
 0x6a2   : > { %v7991_v3 = vpop.f32.mrf.mxu0 }
 0x6a3   : > { %v8563_v3 = vld [vmem:[%s10259_s12 + $0x8] sm:$0xff]  }
 0x6a4   : > { %v4865_v1 = vpop.f32.mrf.mxu0 }
 0x6a5   : > { %v4870_v17 = vadd.f32 %v4865_v1, %v4812_v25  ;;  %v8564_v1 = vld [vmem:[%s10259_s12 + $0x10] sm:$0xff]  }
 0x6a6   : > { %v7992_v16 = vpop.f32.mrf.mxu0  ;;  %v8585_v25 = vld [vmem:[%s10260_s13 + $0x50] sm:$0xff]  }
 0x6a7   : > { %v8579_v16 = vld [vmem:[%s10260_s13 + $0x18] sm:$0xff]  }
 0x6a8   : > { %v4920_v57 = vpop.f32.mrf.mxu0 }
 0x6a9   : > { %v4927_v54 = vadd.f32 %v4920_v57, %v4869_v63  ;;  %v8580_v57 = vld [vmem:[%s10260_s13 + $0x10] sm:$0xff]   ;;  %v8584_v63 = vld [vmem:[%s10260_s13 + $0x78] sm:$0xff]  }
 0x6aa   : > { %v7999_v60 = vpop.f32.mrf.mxu0 }
 0x6ab   : > { %v8565_v60 = vld [vmem:[%s10259_s12 + $0x18] sm:$0xff]  }
 0x6ac   : > { %v4923_v4 = vpop.f32.mrf.mxu0 }
 0x6ad   : > { %v4928_v5 = vadd.f32 %v4923_v4, %v4870_v17  ;;  %v8566_v4 = vld [vmem:[%s10259_s12 + $0x20] sm:$0xff]  }
 0x6ae   : > { %v8000_v26 = vpop.f32.mrf.mxu0 }
 0x6af   : > { %v8581_v26 = vld [vmem:[%s10260_s13 + $0x8] sm:$0xff]  }
 0x6b0   : > { %v4978_v10 = vpop.f32.mrf.mxu0 }
 0x6b1   : > { %v4985_v51 = vadd.f32 %v4978_v10, %v4927_v54  ;;  %v8582_v10 = vld [vmem:[%s10260_s13] sm:$0xff]  }
 0x6b2   : > { %v8007_v33 = vpop.f32.mrf.mxu0 }
 0x6b3   : > { %v8567_v33 = vld [vmem:[%s10259_s12 + $0x28] sm:$0xff]  }
 0x6b4   : > { %v4981_v19 = vpop.f32.mrf.mxu0 }
 0x6b5   : > { %v4986_v24 = vadd.f32 %v4981_v19, %v4928_v5  ;;  %v8568_v19 = vld [vmem:[%s10259_s12 + $0x30] sm:$0xff]   ;;  %v8588_v5 = vld [vmem:[%s10260_s13 + $0x68] sm:$0xff]  }
 0x6b6   : > { %v8008_v49 = vpop.f32.mrf.mxu0 }
 0x6b7   : > { %v8569_v49 = vld [vmem:[%s10259_s12 + $0x38] sm:$0xff]  }
 0x6b8   : > { %v5036_v62 = vpop.f32.mrf.mxu0 }
 0x6b9   : > { %v5043_v28 = vadd.f32 %v5036_v62, %v4985_v51  ;;  %v8570_v62 = vld [vmem:[%s10259_s12 + $0x40] sm:$0xff]   ;;  %v8587_v51 = vld [vmem:[%s10260_s13 + $0x48] sm:$0xff]  }
 0x6ba   : > { %v8015_v14 = vpop.f32.mrf.mxu0 }
 0x6bb   : > { %v8571_v14 = vld [vmem:[%s10259_s12 + $0x48] sm:$0xff]  }
 0x6bc   : > { %v5039_v34 = vpop.f32.mrf.mxu0 }
 0x6bd   : > { %v5044_v29 = vadd.f32 %v5039_v34, %v4986_v24  ;;  %v8572_v34 = vld [vmem:[%s10259_s12 + $0x50] sm:$0xff]   ;;  %v8590_v24 = vld [vmem:[%s10260_s13 + $0x60] sm:$0xff]  }
 0x6be   : > { %v8016_v0 = vpop.f32.mrf.mxu0 }
 0x6bf   : > { %v8574_v0 = vld [vmem:[%s10259_s12 + $0x58] sm:$0xff]  }
 0x6c0   : > { %v5094_v6 = vpop.f32.mrf.mxu0 }
 0x6c1   : > { %v5101_v41 = vadd.f32 %v5094_v6, %v5043_v28  ;;  %v8575_v6 = vld [vmem:[%s10259_s12 + $0x60] sm:$0xff]  }
 0x6c2   : > { %v8023_v15 = vpop.f32.mrf.mxu0  ;;  %v8589_v28 = vld [vmem:[%s10260_s13 + $0x40] sm:$0xff]  }
 0x6c3   : > { %v8576_v15 = vld [vmem:[%s10259_s12 + $0x68] sm:$0xff]  }
 0x6c4   : > { %v5097_v37 = vpop.f32.mrf.mxu0 }
 0x6c5   : > { %v5102_v46 = vadd.f32 %v5097_v37, %v5044_v29  ;;  %v8577_v37 = vld [vmem:[%s10259_s12 + $0x70] sm:$0xff]   ;;  %v8592_v29 = vld [vmem:[%s10260_s13 + $0xb8] sm:$0xff]  }
 0x6c6   : > { %v8024_v11 = vpop.f32.mrf.mxu0 }
 0x6c7   : > { %v8578_v11 = vld [vmem:[%s10259_s12 + $0x78] sm:$0xff]  }
 0x6c8   : > { %v5152_v30 = vpop.f32.mrf.mxu0 }
 0x6c9   : > { %v5159_v18 = vadd.f32 %v5152_v30, %v5101_v41  ;;  %v8591_v41 = vld [vmem:[%s10260_s13 + $0x98] sm:$0xff]  }
 0x6ca   : > { %v8031_v21 = vpop.f32.mrf.mxu0 }
 0x6cc   : > { %v5155_v9 = vpop.f32.mrf.mxu0 }
 0x6cd   : > { %v5160_v12 = vadd.f32 %v5155_v9, %v5102_v46  ;;  %v8593_v46 = vld [vmem:[%s10260_s13 + $0x90] sm:$0xff]  }
 0x6ce   : > { %v8032_v23 = vpop.f32.mrf.mxu0 }
 0x6cf   : > { %v8586_v23 = vld [vmem:[%s10260_s13 + $0x70] sm:$0xff]  }
 0x6d0   : > { %v5210_v8 = vpop.f32.mrf.mxu0 }
 0x6d1   : > { %v5217_v31 = vadd.f32 %v5210_v8, %v5159_v18 }
 0x6d2   : > { %v8039_v40 = vpop.f32.mrf.mxu0 }
 0x6d4   : > { %v5213_v32 = vpop.f32.mrf.mxu0 }
 0x6d5   : > { %v5218_v50 = vadd.f32 %v5213_v32, %v5160_v12 }
 0x6d6   : > { %v8040_v59 = vpop.f32.mrf.mxu0 }
 0x6d8   : > { %v5268_v36 = vpop.f32.mrf.mxu0 }
 0x6d9   : > { %v5275_v52 = vadd.f32 %v5268_v36, %v5217_v31  ;;  %v8594_v31 = vld [vmem:[%s10260_s13 + $0xb0] sm:$0xff]  }
 0x6da   : > { %v8047_v42 = vpop.f32.mrf.mxu0 }
 0x6db   : > { %v5284_v27 = vmul.f32 %v7305_v47, %v5275_v52  ;;  %v8596_v52 = vld [vmem:[%s10260_s13 + $0xa8] sm:$0xff]  }
 0x6dc   : > { %v5271_v48 = vpop.f32.mrf.mxu0 }
 0x6dd   : > { %v5293_v39 = vadd.f32 %v7306_v13, %v5284_v27  ;;  %v5276_v22 = vadd.f32 %v5271_v48, %v5218_v50  ;;  %v8598_v50 = vld [vmem:[%s10260_s13 + $0xa0] sm:$0xff]   ;;  %v8599_v27 = vld [vmem:[%s10260_s13 + $0xd8] sm:$0xff]  }
 0x6de   : > { %v8048_v7 = vpop.f32.mrf.mxu0 }
 0x6df   : > { %v5285_v44 = vmul.f32 %v7305_v47, %v5276_v22  ;;  %v5297_v58 = vmul.f32 0.01, %v5293_v39  ;;  %vm5295_vm14 = vcmp.gt.f32.partialorder %v5293_v39, 0.0  ;;  %v8595_v47 = vld [vmem:[%s10260_s13 + $0x88] sm:$0xff]  }
 0x6e1   : > { %v5294_v45 = vadd.f32 %v7306_v13, %v5285_v44  ;;  %v5299_v43 = vsel %vm5295_vm14, %v5293_v39, %v5297_v58  ;;  %v8597_v13 = vld [vmem:[%s10260_s13 + $0x80] sm:$0xff]   ;;  %v8600_v39 = vld [vmem:[%s10260_s13 + $0xf8] sm:$0xff]   ;;  %v8601_v44 = vld [vmem:[%s10260_s13 + $0xd0] sm:$0xff]  }
 0x6e2   : > { %v8602_v58 = vld [vmem:[%s10260_s13 + $0xf0] sm:$0xff]  }
 0x6e3   : > { %v5298_v55 = vmul.f32 0.01, %v5294_v45  ;;  %vm5296_vm15 = vcmp.gt.f32.partialorder %v5294_v45, 0.0 }
 0x6e5   : > { %v5300_v20 = vsel %vm5296_vm15, %v5294_v45, %v5298_v55  ;;  %v8603_v55 = vld [vmem:[%s10260_s13 + $0xc8] sm:$0xff]  }
 0x6e6   : > { %v5333_v2 = vpack.c.bf16 %v5300_v20, %v5299_v43  ;;  %v8604_v20 = vld [vmem:[%s10260_s13 + $0xe8] sm:$0xff]  }
 0x6e8   : > { %8049 = vmatprep.subr.bf16.mxu0 %v5333_v2 }
 0x6e9   : > { %8050 = vmatpush3.bf16.msra.mxu0 %v5333_v2  ;;  %v8605_v2 = vld [vmem:[%s10260_s13 + $0xc0] sm:$0xff]  }
 0x6ea   : > { %8095 = vmatprep.subr.bf16.mxu0 %v10272_v56 }
 0x6ec   : > { %8052 = vmatmul.mubr.msk.bf16.vlgmr.msra.gmra.mxu0 %vm643_vm0, %v8563_v3 }
 0x6ed   : > { %8055 = vmatprep.mubr.msk.bf16.mxu0 %vm643_vm0, %v8564_v1  ;;  %8096 = vmatpush3.bf16.msra.mxu0 %v8579_v16  ;;  %v8606_v1 = vld [vmem:[%s10260_s13 + $0xe0] sm:$0xff]   ;;  %v8607_v16 = vld [vmem:[%s10260_s13 + $0x118] sm:$0xff]  }
 0x6ee   : > { %8097 = vmatprep.subr.bf16.mxu0 %v10272_v56 }
 0x6f1   : > { %8098 = vmatpush3.bf16.msra.mxu0 %v8580_v57 }
 0x6f2   : > { %8099 = vmatprep.subr.bf16.mxu0 %v10272_v56 }
 0x6f4   : > { %8056 = vmatmul.mubr.msk.bf16.gmra.mxu0 %vm643_vm0, %v8565_v60  ;;  %v8608_v60 = vld [vmem:[%s10260_s13 + $0x138] sm:$0xff]  }
 0x6f5   : > { %8059 = vmatprep.mubr.msk.bf16.mxu0 %vm643_vm0, %v8566_v4  ;;  %8100 = vmatpush3.bf16.msra.mxu0 %v8581_v26 }
 0x6f6   : > { %8101 = vmatprep.subr.bf16.mxu0 %v10272_v56 }
 0x6f9   : > { %8102 = vmatpush3.bf16.msra.mxu0 %v8582_v10  ;;  %v8609_v10 = vld [vmem:[%s10260_s13 + $0x110] sm:$0xff]  }
 0x6fa   : > { %8119 = vmatprep.subr.bf16.mxu0 %v10272_v56 }
 0x6fc   : > { %8060 = vmatmul.mubr.msk.bf16.gmra.mxu0 %vm643_vm0, %v8567_v33  ;;  %v8610_v33 = vld [vmem:[%s10260_s13 + $0x130] sm:$0xff]  }
 0x6fd   : > { %8063 = vmatprep.mubr.msk.bf16.mxu0 %vm643_vm0, %v8568_v19 }
 0x704   : > { %8064 = vmatmul.mubr.msk.bf16.gmra.mxu0 %vm643_vm0, %v8569_v49  ;;  %v8611_v49 = vld [vmem:[%s10260_s13 + $0x108] sm:$0xff]  }
 0x705   : > { %8067 = vmatprep.mubr.msk.bf16.mxu0 %vm643_vm0, %v8570_v62 }
 0x70c   : > { %8068 = vmatmul.mubr.msk.bf16.gmra.mxu0 %vm643_vm0, %v8571_v14  ;;  %v8612_v14 = vld [vmem:[%s10260_s13 + $0x128] sm:$0xff]  }
 0x70d   : > { %8071 = vmatprep.mubr.msk.bf16.mxu0 %vm643_vm0, %v8572_v34  ;;  %v8613_v34 = vld [vmem:[%s10260_s13 + $0x100] sm:$0xff]  }
 0x714   : > { %8072 = vmatmul.mubr.msk.bf16.gmra.mxu0 %vm643_vm0, %v8574_v0 }
 0x715   : > { %8075 = vmatprep.mubr.msk.bf16.mxu0 %vm643_vm0, %v8575_v6  ;;  %v8614_v6 = vld [vmem:[%s10260_s13 + $0x120] sm:$0xff]  }
 0x71c   : > { %8076 = vmatmul.mubr.msk.bf16.gmra.mxu0 %vm643_vm0, %v8576_v15  ;;  %v8615_v15 = vld [vmem:[%s10260_s13 + $0x158] sm:$0xff]  }
 0x71d   : > { %8079 = vmatprep.mubr.msk.bf16.mxu0 %vm643_vm0, %v8577_v37 }
 0x724   : > { %8080 = vmatmul.mubr.msk.bf16.gmra.mxu0 %vm643_vm0, %v8578_v11  ;;  %v8616_v11 = vld [vmem:[%s10260_s13 + $0x178] sm:$0xff]  }
 0x725   : > { %8103 = vmatprep.mubr.msk.bf16.mxu0 %vm8649_vm12, %v10272_v56 }
 0x7ac   : > { %v8053_v38 = vpop.f32.mrf.mxu0 }
 0x7ae   : > { %v5496_v30 = vpop.f32.mrf.mxu0 }
 0x7b0   : > { %v8054_v53 = vpop.f32.mrf.mxu0 }
 0x7b1   : > { %v5624_v21 = vpack.c.bf16 %v8054_v53, %v8053_v38  ;;  %v8617_v53 = vld [vmem:[%s10260_s13 + $0x150] sm:$0xff]  }
 0x7b2   : > { %v5499_v35 = vpop.f32.mrf.mxu0 }
 0x7b3   : > { %v5623_v9 = vpack.c.bf16 %v5499_v35, %v5496_v30  ;;  %8092 = vmatmul.mubr.msk.bf16.vlgmr.msra.gmra.mxu1 %vm4062_vm3, %v5624_v21  ;;  %v8619_v35 = vld [vmem:[%s10260_s13 + $0x148] sm:$0xff]  }
 0x7b4   : > { %8108 = vmatpush3.bf16.msra.mxu1 %v8583_v61  ;;  %v8057_v54 = vpop.f32.mrf.mxu0  ;;  %8115 = vmatprep.mubr.msk.bf16.mxu1 %vm8649_vm12, %v10272_v56  ;;  %v8618_v61 = vld [vmem:[%s10260_s13 + $0x170] sm:$0xff]  }
 0x7b5   : > { %8104 = vmatmul.mubr.msk.bf16.vlgmr.msra.gmra.mxu0 %vm4062_vm3, %v5623_v9  ;;  %8109 = vmatprep.subr.bf16.mxu1 %v10272_v56  ;;  %v8620_v9 = vld [vmem:[%s10260_s13 + $0x168] sm:$0xff]  }
 0x7b6   : > { %8120 = vmatpush3.bf16.msra.mxu0 %v8584_v63  ;;  %v5512_v17 = vpop.f32.mrf.mxu0  ;;  %8127 = vmatprep.mubr.msk.bf16.mxu0 %vm8649_vm12, %v10272_v56 }
 0x7b7   : > { %8121 = vmatprep.subr.bf16.mxu0 %v10272_v56 }
 0x7b8   : > { %8110 = vmatpush3.bf16.msra.mxu1 %v8585_v25  ;;  %v8058_v8 = vpop.f32.mrf.mxu0  ;;  %v8621_v25 = vld [vmem:[%s10260_s13 + $0x140] sm:$0xff]  }
 0x7b9   : > { %8111 = vmatprep.subr.bf16.mxu1 %v10272_v56  ;;  %v5626_v59 = vpack.c.bf16 %v8058_v8, %v8057_v54  ;;  %v8624_v8 = vld [vmem:[%s10260_s13 + $0x1b8] sm:$0xff]  }
 0x7ba   : > { %8122 = vmatpush3.bf16.msra.mxu0 %v8586_v23  ;;  %v5515_v40 = vpop.f32.mrf.mxu0  ;;  %v8622_v23 = vld [vmem:[%s10260_s13 + $0x160] sm:$0xff]  }
 0x7bb   : > { %8123 = vmatprep.subr.bf16.mxu0 %v10272_v56  ;;  %v5625_v32 = vpack.c.bf16 %v5515_v40, %v5512_v17  ;;  %v8623_v17 = vld [vmem:[%s10260_s13 + $0x198] sm:$0xff]   ;;  %v8625_v40 = vld [vmem:[%s10260_s13 + $0x190] sm:$0xff]  }
 0x7bc   : > { %8112 = vmatpush3.bf16.msra.mxu1 %v8587_v51  ;;  %v8061_v18 = vpop.f32.mrf.mxu0 }
 0x7bd   : > { %8113 = vmatprep.subr.bf16.mxu1 %v10272_v56 }
 0x7be   : > { %8124 = vmatpush3.bf16.msra.mxu0 %v8588_v5  ;;  %v5528_v36 = vpop.f32.mrf.mxu0 }
 0x7bf   : > { %8125 = vmatprep.subr.bf16.mxu0 %v10272_v56 }
 0x7c0   : > { %8114 = vmatpush3.bf16.msra.mxu1 %v8589_v28  ;;  %v8062_v12 = vpop.f32.mrf.mxu0 }
 0x7c1   : > { %8131 = vmatprep.subr.bf16.mxu1 %v10272_v56  ;;  %v5628_v7 = vpack.c.bf16 %v8062_v12, %v8061_v18  ;;  %v8628_v18 = vld [vmem:[%s10260_s13 + $0x1a8] sm:$0xff]   ;;  %v8632_v12 = vld [vmem:[%s10260_s13 + $0x1f8] sm:$0xff]  }
 0x7c2   : > { %8126 = vmatpush3.bf16.msra.mxu0 %v8590_v24  ;;  %v5531_v42 = vpop.f32.mrf.mxu0  ;;  %v8626_v24 = vld [vmem:[%s10260_s13 + $0x1b0] sm:$0xff]  }
 0x7c3   : > { %8116 = vmatmul.mubr.msk.bf16.vlgmr.msra.gmra.mxu1 %vm4062_vm3, %v5625_v32  ;;  %8143 = vmatprep.subr.bf16.mxu0 %v10272_v56  ;;  %v5627_v48 = vpack.c.bf16 %v5531_v42, %v5528_v36  ;;  %v8627_v32 = vld [vmem:[%s10260_s13 + $0x188] sm:$0xff]   ;;  %v8631_v36 = vld [vmem:[%s10260_s13 + $0x1d8] sm:$0xff]   ;;  %v8633_v42 = vld [vmem:[%s10260_s13 + $0x1d0] sm:$0xff]  }
 0x7c4   : > { %8132 = vmatpush3.bf16.msra.mxu1 %v8591_v41  ;;  %8139 = vmatprep.mubr.msk.bf16.mxu1 %vm8649_vm12, %v10272_v56  ;;  %v8065_v22 = vpop.f32.mrf.mxu0 }
 0x7c5   : > { %8128 = vmatmul.mubr.msk.bf16.vlgmr.msra.gmra.mxu0 %vm4062_vm3, %v5626_v59  ;;  %8133 = vmatprep.subr.bf16.mxu1 %v10272_v56  ;;  %v8629_v59 = vld [vmem:[%s10260_s13 + $0x180] sm:$0xff]  }
 0x7c6   : > { %8144 = vmatpush3.bf16.msra.mxu0 %v8592_v29  ;;  %8151 = vmatprep.mubr.msk.bf16.mxu0 %vm8649_vm12, %v10272_v56  ;;  %v5544_v45 = vpop.f32.mrf.mxu0 }
 0x7c7   : > { %8145 = vmatprep.subr.bf16.mxu0 %v10272_v56 }
 0x7c8   : > { %8134 = vmatpush3.bf16.msra.mxu1 %v8593_v46  ;;  %v8066_v43 = vpop.f32.mrf.mxu0 }
 0x7c9   : > { %8135 = vmatprep.subr.bf16.mxu1 %v10272_v56  ;;  %v5630_v26 = vpack.c.bf16 %v8066_v43, %v8065_v22  ;;  %v8636_v22 = vld [vmem:[%s10260_s13 + $0x1e8] sm:$0xff]  }
 0x7ca   : > { %8146 = vmatpush3.bf16.msra.mxu0 %v8594_v31  ;;  %v5547_v3 = vpop.f32.mrf.mxu0  ;;  %v8630_v31 = vld [vmem:[%s10260_s13 + $0x1a0] sm:$0xff]  }
 0x7cb   : > { %8147 = vmatprep.subr.bf16.mxu0 %v10272_v56  ;;  %v5629_v57 = vpack.c.bf16 %v5547_v3, %v5544_v45 }
 0x7cc   : > { %8136 = vmatpush3.bf16.msra.mxu1 %v8595_v47  ;;  %v8069_v4 = vpop.f32.mrf.mxu0 }
 0x7cd   : > { %8137 = vmatprep.subr.bf16.mxu1 %v10272_v56 }
 0x7ce   : > { %8148 = vmatpush3.bf16.msra.mxu0 %v8596_v52  ;;  %v5560_v19 = vpop.f32.mrf.mxu0 }
 0x7cf   : > { %8149 = vmatprep.subr.bf16.mxu0 %v10272_v56 }
 0x7d0   : > { %8138 = vmatpush3.bf16.msra.mxu1 %v8597_v13  ;;  %v8070_v62 = vpop.f32.mrf.mxu0 }
 0x7d1   : > { %8155 = vmatprep.subr.bf16.mxu1 %v10272_v56  ;;  %v5632_v30 = vpack.c.bf16 %v8070_v62, %v8069_v4 }
 0x7d2   : > { %8150 = vmatpush3.bf16.msra.mxu0 %v8598_v50  ;;  %v5563_v0 = vpop.f32.mrf.mxu0  ;;  %v8634_v50 = vld [vmem:[%s10260_s13 + $0x1f0] sm:$0xff]  }
 0x7d3   : > { %8140 = vmatmul.mubr.msk.bf16.vlgmr.msra.gmra.mxu1 %vm4062_vm3, %v5627_v48  ;;  %8167 = vmatprep.subr.bf16.mxu0 %v10272_v56  ;;  %v5631_v37 = vpack.c.bf16 %v5563_v0, %v5560_v19  ;;  %v8635_v48 = vld [vmem:[%s10260_s13 + $0x1c8] sm:$0xff]  }
 0x7d4   : > { %8156 = vmatpush3.bf16.msra.mxu1 %v8599_v27  ;;  %8163 = vmatprep.mubr.msk.bf16.mxu1 %vm8649_vm12, %v10272_v56  ;;  %v8073_v38 = vpop.f32.mrf.mxu0 }
 0x7d5   : > { %8152 = vmatmul.mubr.msk.bf16.vlgmr.msra.gmra.mxu0 %vm4062_vm3, %v5628_v7  ;;  %8157 = vmatprep.subr.bf16.mxu1 %v10272_v56  ;;  %v8637_v7 = vld [vmem:[%s10260_s13 + $0x1c0] sm:$0xff]  }
 0x7d6   : > { %8168 = vmatpush3.bf16.msra.mxu0 %v8600_v39  ;;  %8175 = vmatprep.mubr.msk.bf16.mxu0 %vm8649_vm12, %v10272_v56  ;;  %v5576_v21 = vpop.f32.mrf.mxu0 }
 0x7d7   : > { %8169 = vmatprep.subr.bf16.mxu0 %v10272_v56 }
 0x7d8   : > { %8158 = vmatpush3.bf16.msra.mxu1 %v8601_v44  ;;  %v8074_v63 = vpop.f32.mrf.mxu0 }
 0x7d9   : > { %8159 = vmatprep.subr.bf16.mxu1 %v10272_v56  ;;  %v5634_v28 = vpack.c.bf16 %v8074_v63, %v8073_v38 }
 0x7da   : > { %8170 = vmatpush3.bf16.msra.mxu0 %v8602_v58  ;;  %v5579_v54 = vpop.f32.mrf.mxu0  ;;  %v8638_v58 = vld [vmem:[%s10260_s13 + $0x1e0] sm:$0xff]  }
 0x7db   : > { %8171 = vmatprep.subr.bf16.mxu0 %v10272_v56  ;;  %v5633_v51 = vpack.c.bf16 %v5579_v54, %v5576_v21 }
 0x7dc   : > { %8160 = vmatpush3.bf16.msra.mxu1 %v8603_v55  ;;  %v8077_v5 = vpop.f32.mrf.mxu0 }
 0x7dd   : > { %8161 = vmatprep.subr.bf16.mxu1 %v10272_v56 }
 0x7de   : > { %8172 = vmatpush3.bf16.msra.mxu0 %v8604_v20  ;;  %v5592_v41 = vpop.f32.mrf.mxu0 }
 0x7df   : > { %8173 = vmatprep.subr.bf16.mxu0 %v10272_v56 }
 0x7e0   : > { %8162 = vmatpush3.bf16.msra.mxu1 %v8605_v2  ;;  %v8078_v29 = vpop.f32.mrf.mxu0 }
 0x7e1   : > { %8179 = vmatprep.subr.bf16.mxu1 %v10272_v56  ;;  %v5636_v13 = vpack.c.bf16 %v8078_v29, %v8077_v5 }
 0x7e2   : > { %8174 = vmatpush3.bf16.msra.mxu0 %v8606_v1  ;;  %v5595_v46 = vpop.f32.mrf.mxu0 }
 0x7e3   : > { %8164 = vmatmul.mubr.msk.bf16.vlgmr.msra.gmra.mxu1 %vm4062_vm3, %v5629_v57  ;;  %8191 = vmatprep.subr.bf16.mxu0 %v10272_v56  ;;  %v5635_v47 = vpack.c.bf16 %v5595_v46, %v5592_v41 }
 0x7e4   : > { %8180 = vmatpush3.bf16.msra.mxu1 %v8607_v16  ;;  %8187 = vmatprep.mubr.msk.bf16.mxu1 %vm8649_vm12, %v10272_v56  ;;  %v8081_v52 = vpop.f32.mrf.mxu0 }
 0x7e5   : > { %8176 = vmatmul.mubr.msk.bf16.vlgmr.msra.gmra.mxu0 %vm4062_vm3, %v5630_v26  ;;  %8181 = vmatprep.subr.bf16.mxu1 %v10272_v56 }
 0x7e6   : > { %8192 = vmatpush3.bf16.msra.mxu0 %v8608_v60  ;;  %8199 = vmatprep.mubr.msk.bf16.mxu0 %vm8649_vm12, %v10272_v56  ;;  %v5608_v27 = vpop.f32.mrf.mxu0 }
 0x7e7   : > { %8193 = vmatprep.subr.bf16.mxu0 %v10272_v56 }
 0x7e8   : > { %8182 = vmatpush3.bf16.msra.mxu1 %v8609_v10  ;;  %v8082_v39 = vpop.f32.mrf.mxu0 }
 0x7e9   : > { %8183 = vmatprep.subr.bf16.mxu1 %v10272_v56  ;;  %v5638_v55 = vpack.c.bf16 %v8082_v39, %v8081_v52 }
 0x7ea   : > { %8194 = vmatpush3.bf16.msra.mxu0 %v8610_v33  ;;  %v5611_v44 = vpop.f32.mrf.mxu0 }
 0x7eb   : > { %8195 = vmatprep.subr.bf16.mxu0 %v10272_v56  ;;  %v5637_v45 = vpack.c.bf16 %v5611_v44, %v5608_v27 }
 0x7ec   : > { %8184 = vmatpush3.bf16.msra.mxu1 %v8611_v49 }
 0x7ed   : > { %8185 = vmatprep.subr.bf16.mxu1 %v10272_v56 }
 0x7ee   : > { %8196 = vmatpush3.bf16.msra.mxu0 %v8612_v14 }
 0x7ef   : > { %8197 = vmatprep.subr.bf16.mxu0 %v10272_v56 }
 0x7f0   : > { %8186 = vmatpush3.bf16.msra.mxu1 %v8613_v34 }
 0x7f1   : > { %8203 = vmatprep.subr.bf16.mxu1 %v10272_v56 }
 0x7f2   : > { %8198 = vmatpush3.bf16.msra.mxu0 %v8614_v6 }
 0x7f3   : > { %8188 = vmatmul.mubr.msk.bf16.vlgmr.msra.gmra.mxu1 %vm4062_vm3, %v5631_v37  ;;  %8215 = vmatprep.subr.bf16.mxu0 %v10272_v56 }
 0x7f4   : > { %8204 = vmatpush3.bf16.msra.mxu1 %v8615_v15  ;;  %8211 = vmatprep.mubr.msk.bf16.mxu1 %vm8649_vm12, %v10272_v56 }
 0x7f5   : > { %8200 = vmatmul.mubr.msk.bf16.vlgmr.msra.gmra.mxu0 %vm4062_vm3, %v5632_v30  ;;  %8205 = vmatprep.subr.bf16.mxu1 %v10272_v56 }
 0x7f6   : > { %8216 = vmatpush3.bf16.msra.mxu0 %v8616_v11  ;;  %8223 = vmatprep.mubr.msk.bf16.mxu0 %vm8649_vm12, %v10272_v56 }
 0x7f7   : > { %8217 = vmatprep.subr.bf16.mxu0 %v10272_v56 }
 0x7f8   : > { %8206 = vmatpush3.bf16.msra.mxu1 %v8617_v53 }
 0x7f9   : > { %8207 = vmatprep.subr.bf16.mxu1 %v10272_v56 }
 0x7fa   : > { %8218 = vmatpush3.bf16.msra.mxu0 %v8618_v61 }
 0x7fb   : > { %8219 = vmatprep.subr.bf16.mxu0 %v10272_v56 }
 0x7fc   : > { %8208 = vmatpush3.bf16.msra.mxu1 %v8619_v35 }
 0x7fd   : > { %8209 = vmatprep.subr.bf16.mxu1 %v10272_v56 }
 0x7fe   : > { %8220 = vmatpush3.bf16.msra.mxu0 %v8620_v9 }
 0x7ff   : > { %8221 = vmatprep.subr.bf16.mxu0 %v10272_v56 }
 0x800   : > { %8210 = vmatpush3.bf16.msra.mxu1 %v8621_v25 }
 0x801   : > { %8227 = vmatprep.subr.bf16.mxu1 %v10272_v56 }
 0x802   : > { %8222 = vmatpush3.bf16.msra.mxu0 %v8622_v23 }
 0x803   : > { %8212 = vmatmul.mubr.msk.bf16.vlgmr.msra.gmra.mxu1 %vm4062_vm3, %v5633_v51  ;;  %8239 = vmatprep.subr.bf16.mxu0 %v10272_v56 }
 0x804   : > { %8228 = vmatpush3.bf16.msra.mxu1 %v8623_v17  ;;  %8235 = vmatprep.mubr.msk.bf16.mxu1 %vm8649_vm12, %v10272_v56 }
 0x805   : > { %8224 = vmatmul.mubr.msk.bf16.vlgmr.msra.gmra.mxu0 %vm4062_vm3, %v5634_v28  ;;  %8229 = vmatprep.subr.bf16.mxu1 %v10272_v56 }
 0x806   : > { %8240 = vmatpush3.bf16.msra.mxu0 %v8624_v8  ;;  %8247 = vmatprep.mubr.msk.bf16.mxu0 %vm8649_vm12, %v10272_v56 }
 0x807   : > { %8241 = vmatprep.subr.bf16.mxu0 %v10272_v56 }
 0x808   : > { %8230 = vmatpush3.bf16.msra.mxu1 %v8625_v40 }
 0x809   : > { %8231 = vmatprep.subr.bf16.mxu1 %v10272_v56 }
 0x80a   : > { %8242 = vmatpush3.bf16.msra.mxu0 %v8626_v24 }
 0x80b   : > { %8243 = vmatprep.subr.bf16.mxu0 %v10272_v56 }
 0x80c   : > { %8232 = vmatpush3.bf16.msra.mxu1 %v8627_v32 }
 0x80d   : > { %8233 = vmatprep.subr.bf16.mxu1 %v10272_v56 }
 0x80e   : > { %8244 = vmatpush3.bf16.msra.mxu0 %v8628_v18 }
 0x80f   : > { %8245 = vmatprep.subr.bf16.mxu0 %v10272_v56 }
 0x810   : > { %8234 = vmatpush3.bf16.msra.mxu1 %v8629_v59 }
 0x811   : > { %8251 = vmatprep.subr.bf16.mxu1 %v10272_v56 }
 0x812   : > { %8246 = vmatpush3.bf16.msra.mxu0 %v8630_v31 }
 0x813   : > { %8236 = vmatmul.mubr.msk.bf16.vlgmr.msra.gmra.mxu1 %vm4062_vm3, %v5635_v47  ;;  %8263 = vmatprep.subr.bf16.mxu0 %v10272_v56 }
 0x814   : > { %8252 = vmatpush3.bf16.msra.mxu1 %v8631_v36  ;;  %8259 = vmatprep.mubr.msk.bf16.mxu1 %vm8649_vm12, %v10272_v56 }
 0x815   : > { %8248 = vmatmul.mubr.msk.bf16.vlgmr.msra.gmra.mxu0 %vm4062_vm3, %v5636_v13  ;;  %8253 = vmatprep.subr.bf16.mxu1 %v10272_v56 }
 0x816   : > { %8264 = vmatpush3.bf16.msra.mxu0 %v8632_v12  ;;  %8271 = vmatprep.mubr.msk.bf16.mxu0 %vm8649_vm12, %v10272_v56 }
 0x817   : > { %8265 = vmatprep.subr.bf16.mxu0 %v10272_v56 }
 0x818   : > { %8254 = vmatpush3.bf16.msra.mxu1 %v8633_v42 }
 0x819   : > { %8255 = vmatprep.subr.bf16.mxu1 %v10272_v56 }
 0x81a   : > { %8266 = vmatpush3.bf16.msra.mxu0 %v8634_v50 }
 0x81b   : > { %8267 = vmatprep.subr.bf16.mxu0 %v10272_v56 }
 0x81c   : > { %8256 = vmatpush3.bf16.msra.mxu1 %v8635_v48 }
 0x81d   : > { %8257 = vmatprep.subr.bf16.mxu1 %v10272_v56 }
 0x81e   : > { %8268 = vmatpush3.bf16.msra.mxu0 %v8636_v22 }
 0x81f   : > { %8269 = vmatprep.subr.bf16.mxu0 %v10272_v56 }
 0x820   : > { %8258 = vmatpush3.bf16.msra.mxu1 %v8637_v7 }
 0x822   : > { %8270 = vmatpush3.bf16.msra.mxu0 %v8638_v58 }
 0x823   : > { %8260 = vmatmul.mubr.msk.bf16.vlgmr.msra.gmra.mxu1 %vm4062_vm3, %v5637_v45 }
 0x825   : > { %8272 = vmatmul.mubr.msk.bf16.vlgmr.msra.gmra.mxu0 %vm4062_vm3, %v5638_v55 }
 0x873   : > { %v5828_v43 = vpop.f32.mrf.mxu1 }
 0x875   : > { %v8093_v20 = vpop.f32.mrf.mxu1  ;;  %v5896_v2 = vpop.f32.mrf.mxu0 }
 0x876   : > { %v5897_v3 = vadd.f32 %v5896_v2, %v5828_v43 }
 0x877   : > { %v5831_v1 = vpop.f32.mrf.mxu1  ;;  %v8105_v16 = vpop.f32.mrf.mxu0 }
 0x879   : > { %v8094_v57 = vpop.f32.mrf.mxu1  ;;  %v5899_v60 = vpop.f32.mrf.mxu0 }
 0x87a   : > { %v6907_v60 = vlaneseq }
 0x87b   : > { %v8106_v4 = vpop.f32.mrf.mxu0 }
 0x883   : > { %v5964_v26 = vpop.f32.mrf.mxu1 }
 0x884   : > { %v5971_v10 = vadd.f32 %v5964_v26, %v5897_v3 }
 0x885   : > { %v8117_v33 = vpop.f32.mrf.mxu1  ;;  %v6034_v19 = vpop.f32.mrf.mxu0 }
 0x886   : > { %v6041_v49 = vadd.f32 %v6034_v19, %v5971_v10  ;;  %v7419_v10 = vld [vmem:[%s10261_s14] ss:$0 sm:$0xff] }
 0x887   : > { %v5967_v62 = vpop.f32.mrf.mxu1  ;;  %v8129_v14 = vpop.f32.mrf.mxu0  ;;  %v7420_v19 = vld [vmem:[%s10262_s15] ss:$0 sm:$0xff] }
 0x889   : > { %v8118_v34 = vpop.f32.mrf.mxu1  ;;  %v6037_v0 = vpop.f32.mrf.mxu0 }
 0x88a   : > { %v6908_v34 = vshrl.u32 %v6907_v60, 7 }
 0x88b   : > { %v8130_v6 = vpop.f32.mrf.mxu0 }
 0x88c   : > { %vm6910_vm1 = vcmp.lt.s32.totalorder %v6908_v34, 1 }
 0x893   : > { %v6104_v56 = vpop.f32.mrf.mxu1 }
 0x894   : > { %v6111_v46 = vadd.f32 %v6104_v56, %v6041_v49 }
 0x895   : > { %v8141_v15 = vpop.f32.mrf.mxu1  ;;  %v6174_v37 = vpop.f32.mrf.mxu0 }
 0x896   : > { %v6181_v52 = vadd.f32 %v6174_v37, %v6111_v46 }
 0x897   : > { %v6107_v11 = vpop.f32.mrf.mxu1  ;;  %v8153_v38 = vpop.f32.mrf.mxu0 }
 0x899   : > { %v8142_v30 = vpop.f32.mrf.mxu1  ;;  %v6177_v53 = vpop.f32.mrf.mxu0 }
 0x89b   : > { %v8154_v61 = vpop.f32.mrf.mxu0 }
 0x8a3   : > { %v6244_v21 = vpop.f32.mrf.mxu1 }
 0x8a4   : > { %v6251_v42 = vadd.f32 %v6244_v21, %v6181_v52 }
 0x8a5   : > { %v8165_v35 = vpop.f32.mrf.mxu1  ;;  %v6314_v63 = vpop.f32.mrf.mxu0 }
 0x8a6   : > { %v6321_v50 = vadd.f32 %v6314_v63, %v6251_v42 }
 0x8a7   : > { %v6247_v9 = vpop.f32.mrf.mxu1  ;;  %v8177_v25 = vpop.f32.mrf.mxu0 }
 0x8a9   : > { %v8166_v54 = vpop.f32.mrf.mxu1  ;;  %v6317_v23 = vpop.f32.mrf.mxu0 }
 0x8ab   : > { %v8178_v17 = vpop.f32.mrf.mxu0 }
 0x8b3   : > { %v6384_v51 = vpop.f32.mrf.mxu1 }
 0x8b4   : > { %v6391_v27 = vadd.f32 %v6384_v51, %v6321_v50 }
 0x8b5   : > { %v8189_v8 = vpop.f32.mrf.mxu1  ;;  %v6454_v5 = vpop.f32.mrf.mxu0 }
 0x8b6   : > { %v6461_v7 = vadd.f32 %v6454_v5, %v6391_v27 }
 0x8b7   : > { %v6387_v28 = vpop.f32.mrf.mxu1  ;;  %v8201_v40 = vpop.f32.mrf.mxu0 }
 0x8b9   : > { %v8190_v24 = vpop.f32.mrf.mxu1  ;;  %v6457_v41 = vpop.f32.mrf.mxu0 }
 0x8bb   : > { %v8202_v32 = vpop.f32.mrf.mxu0 }
 0x8c3   : > { %v6524_v29 = vpop.f32.mrf.mxu1 }
 0x8c4   : > { %v6531_v45 = vadd.f32 %v6524_v29, %v6461_v7 }
 0x8c5   : > { %v8213_v18 = vpop.f32.mrf.mxu1  ;;  %v6594_v59 = vpop.f32.mrf.mxu0 }
 0x8c6   : > { %v6601_v2 = vadd.f32 %v6594_v59, %v6531_v45 }
 0x8c7   : > { %v6527_v31 = vpop.f32.mrf.mxu1  ;;  %v8225_v36 = vpop.f32.mrf.mxu0 }
 0x8c9   : > { %v8214_v47 = vpop.f32.mrf.mxu1  ;;  %v6597_v12 = vpop.f32.mrf.mxu0 }
 0x8cb   : > { %v8226_v13 = vpop.f32.mrf.mxu0 }
 0x8d3   : > { %v6664_v48 = vpop.f32.mrf.mxu1 }
 0x8d4   : > { %v6671_v3 = vadd.f32 %v6664_v48, %v6601_v2 }
 0x8d5   : > { %v8237_v39 = vpop.f32.mrf.mxu1  ;;  %v6734_v22 = vpop.f32.mrf.mxu0 }
 0x8d6   : > { %v6741_v1 = vadd.f32 %v6734_v22, %v6671_v3 }
 0x8d7   : > { %v6667_v44 = vpop.f32.mrf.mxu1  ;;  %v8249_v58 = vpop.f32.mrf.mxu0 }
 0x8d9   : > { %v8238_v55 = vpop.f32.mrf.mxu1  ;;  %v6737_v43 = vpop.f32.mrf.mxu0 }
 0x8db   : > { %v8250_v20 = vpop.f32.mrf.mxu0 }
 0x8e3   : > { %v6804_v16 = vpop.f32.mrf.mxu1 }
 0x8e4   : > { %v6811_v57 = vadd.f32 %v6804_v16, %v6741_v1 }
 0x8e5   : > { %v8261_v4 = vpop.f32.mrf.mxu1  ;;  %v6874_v26 = vpop.f32.mrf.mxu0 }
 0x8e6   : > { %v6881_v33 = vadd.f32 %v6874_v26, %v6811_v57 }
 0x8e7   : > { %v6807_v49 = vpop.f32.mrf.mxu1  ;;  %v8273_v62 = vpop.f32.mrf.mxu0 }
 0x8e8   : > { %v6890_v14 = vmul.f32 %v7419_v10, %v6881_v33 }
 0x8e9   : > { %v8262_v0 = vpop.f32.mrf.mxu1  ;;  %v6877_v6 = vpop.f32.mrf.mxu0 }
 0x8ea   : > { %v6899_v56 = vadd.f32 %v7420_v19, %v6890_v14 }
 0x8eb   : > { %v8274_v15 = vpop.f32.mrf.mxu0 }
 0x8ec   : > { %vm6901_vm0 = vcmp.gt.f32.partialorder %v6899_v56, 0.0  ;;  %v6903_v37 = vmul.f32 0.01, %v6899_v56 }
 0x8ee   : > { %v6905_v11 = vsel %vm6901_vm0, %v6899_v56, %v6903_v37 }
 0x8ef   : > { %v6912_v38 = vsel %vm6910_vm1, %v6905_v11, 0.0 }
 0x8f0   : > { %6914 = vst [vmem:[%s10233_s30] sm:$0xff] %v6912_v38 }
 0x8f1 PF: > { %s26_s21 = sadd.s32 1, %s8645_s21  }
 0x8f2   : > { %p23_p4 = scmp.ge.s32.totalorder %s26_s21, 4  }
 0x8f4   :  { %25 = sbr.rel (!%p23_p4) target bundleno = 2 (0x2), region = 114 }

</bundles_post_ra>
